<compile_context>
chip_gen: v6e
topology: v6e:2x2x1
jax: 0.10.0
libtpu: 0.0.40
codegen_flags: <defaults>
</compile_context>

<pallas_src>
import numpy as np
import jax
import jax.numpy as jnp
from jax.experimental import pallas as pl
from jax.experimental.pallas import tpu as pltpu

D_MODEL = 60          # word_embedding_dim(50) + 2 * pos_embedding_dim(5)
N_HEAD = 10
HEAD_DIM = D_MODEL // N_HEAD
FF_DIM = 2048         # nn.TransformerEncoderLayer default dim_feedforward
N_LAYERS = 2
LN_EPS = 1e-5
NEG_INF = -1e30


def _layer_norm(x, gamma, beta):
    mu = jnp.mean(x, axis=-1, keepdims=True)
    var = jnp.mean((x - mu) ** 2, axis=-1, keepdims=True)
    return (x - mu) * jax.lax.rsqrt(var + LN_EPS) * gamma + beta


def encoder_kernel(x_ref, bias_ref, wqkv_ref, bqkv_ref, wo_ref, bo_ref,
                   g1_ref, be1_ref, w1_ref, bf1_ref, w2_ref, bf2_ref,
                   g2_ref, be2_ref, o_ref):
    S, B, D = x_ref.shape
    T = S * B
    # token-flatten (s-major); all matmuls / LN / FF / Mish are layout-agnostic.
    x = x_ref[...].astype(jnp.float32).reshape(T, D)
    bias = bias_ref[...]                                   # (T, T) additive mask

    for l in range(N_LAYERS):
        # ---------- multi-head self attention (batched over heads) ----------
        # wqkv columns are head-major: [q_h | k_h | v_h] blocks of 3*HEAD_DIM,
        # with the 1/sqrt(HEAD_DIM) scale pre-folded into the q columns/bias.
        qkv = jnp.dot(x, wqkv_ref[l],
                      preferred_element_type=jnp.float32) + bqkv_ref[l]   # (T, 3D)
        heads = jnp.stack(
            [qkv[:, h * 3 * HEAD_DIM:(h + 1) * 3 * HEAD_DIM]
             for h in range(N_HEAD)], axis=0)              # (H, T, 3*hd)
        q = heads[:, :, :HEAD_DIM]
        k = heads[:, :, HEAD_DIM:2 * HEAD_DIM]
        v = heads[:, :, 2 * HEAD_DIM:]

        s = jnp.einsum('hqd,hkd->hqk', q, k,
                       preferred_element_type=jnp.float32)  # (H, T, T)
        s = s + bias                                        # kill cross-batch pairs
        s = s - jnp.max(s, axis=-1, keepdims=True)
        p = jnp.exp(s)
        p = p * pl.reciprocal(jnp.sum(p, axis=-1, keepdims=True), approx=True)
        ctx = jnp.einsum('hqk,hkd->hqd', p, v,
                         preferred_element_type=jnp.float32)  # (H, T, hd)
        attn = jnp.concatenate([ctx[h] for h in range(N_HEAD)], axis=-1)   # (T, D)
        attn = jnp.dot(attn, wo_ref[l],
                       preferred_element_type=jnp.float32) + bo_ref[l]
        # dropout layers are identity at inference time
        x = _layer_norm(x + attn, g1_ref[l], be1_ref[l])

        # ---------- feed-forward (bf16 weights on the MXU, f32 accumulation) ----------
        h1 = jnp.dot(x.astype(jnp.bfloat16), w1_ref[l],
                     preferred_element_type=jnp.float32) + bf1_ref[l]
        h1 = jnp.maximum(h1, 0.0)                           # relu
        h2 = jnp.dot(h1.astype(jnp.bfloat16), w2_ref[l],
                     preferred_element_type=jnp.float32) + bf2_ref[l]
        x = _layer_norm(x + h2, g2_ref[l], be2_ref[l])

    # TODO(synk): self.drop = nn.Dropout(0.1) — identity in eval mode, no RNG applied.
    # Mish: x * tanh(softplus(x)); match PyTorch F.softplus threshold=20.
    sp = jnp.where(x > 20.0, x, jnp.log1p(jnp.exp(jnp.minimum(x, 20.0))))
    y = x * jnp.tanh(sp)
    o_ref[...] = y.reshape(S, B, D).astype(o_ref.dtype)


def init_params(key):
    ks = jax.random.split(key, 6)

    def rnd(k, shape, scale=0.05):
        return (scale * jax.random.normal(k, shape)).astype(jnp.float32)

    # Attention in-projection, stored pre-transposed so the kernel computes x @ W,
    # with output columns permuted head-major ([q_h | k_h | v_h] per head).
    # Porting PyTorch weights: take in_proj_weight.T (D, 3D), split q/k/v thirds,
    # interleave the per-head HEAD_DIM-column slices in [q_h|k_h|v_h] order.
    # The 1/sqrt(HEAD_DIM) attention scale is folded into the q columns & q bias.
    wqkv = rnd(ks[0], (N_LAYERS, D_MODEL, 3 * D_MODEL))
    bqkv = rnd(ks[1], (N_LAYERS, 1, 3 * D_MODEL), 0.01)
    is_q = (jnp.arange(3 * D_MODEL) % (3 * HEAD_DIM)) < HEAD_DIM
    scale = 1.0 / (HEAD_DIM ** 0.5)
    wqkv = jnp.where(is_q[None, None, :], wqkv * scale, wqkv)
    bqkv = jnp.where(is_q[None, None, :], bqkv * scale, bqkv)

    wo = rnd(ks[2], (N_LAYERS, D_MODEL, D_MODEL))                      # out_proj.weight.T
    bo = jnp.zeros((N_LAYERS, 1, D_MODEL), jnp.float32)
    g1 = jnp.ones((N_LAYERS, 1, D_MODEL), jnp.float32)                 # norm1.weight
    be1 = jnp.zeros((N_LAYERS, 1, D_MODEL), jnp.float32)               # norm1.bias
    w1 = rnd(ks[3], (N_LAYERS, D_MODEL, FF_DIM)).astype(jnp.bfloat16)  # linear1.weight.T
    bf1 = rnd(ks[4], (N_LAYERS, 1, FF_DIM), 0.01)                      # linear1.bias
    w2 = rnd(ks[5], (N_LAYERS, FF_DIM, D_MODEL)).astype(jnp.bfloat16)  # linear2.weight.T
    bf2 = jnp.zeros((N_LAYERS, 1, D_MODEL), jnp.float32)               # linear2.bias
    g2 = jnp.ones((N_LAYERS, 1, D_MODEL), jnp.float32)                 # norm2.weight
    be2 = jnp.zeros((N_LAYERS, 1, D_MODEL), jnp.float32)               # norm2.bias
    return (wqkv, bqkv, wo, bo, g1, be1, w1, bf1, w2, bf2, g2, be2)


@jax.jit
def encoder_forward(x_sbd, params):
    # PyTorch nn.TransformerEncoder default layout (S, B, D) is consumed directly
    # (kernel token-flattens internally) — no host-side transposes.
    S, B, D = x_sbd.shape
    T = S * B
    # Additive attention mask forbidding cross-batch attention for the flattened
    # token order t = s*B + b (constant, baked at trace time).
    bid = np.arange(T) % B
    attn_bias = np.where(bid[:, None] == bid[None, :], 0.0, NEG_INF).astype(np.float32)
    n_inputs = 2 + len(params)
    return pl.pallas_call(
        encoder_kernel,
        out_shape=jax.ShapeDtypeStruct(x_sbd.shape, x_sbd.dtype),
        in_specs=[pl.BlockSpec(memory_space=pltpu.MemorySpace.VMEM)] * n_inputs,
        out_specs=pl.BlockSpec(memory_space=pltpu.MemorySpace.VMEM),
    )(x_sbd, jnp.asarray(attn_bias), *params)


if __name__ == "__main__":
    key = jax.random.PRNGKey(0)
    k_in, k_par = jax.random.split(key)
    S, B = 8, 2
    x = jax.random.normal(k_in, (S, B, D_MODEL), dtype=jnp.float32)
    params = init_params(k_par)

    out = encoder_forward(x, params)
    jax.block_until_ready(out)
    assert out.shape == (S, B, D_MODEL) and out.dtype == jnp.float32
    assert bool(jnp.all(jnp.isfinite(out)))
    print("KERNEL_OK")
</pallas_src>

<mosaic_0001>
module attributes {stable_mosaic.version = 11 : i64} {
  func.func @encoder_kernel(%arg0: memref<8x2x60xf32, #tpu.memory_space<vmem>>, %arg1: memref<16x16xf32, #tpu.memory_space<vmem>>, %arg2: memref<2x60x180xf32, #tpu.memory_space<vmem>>, %arg3: memref<2x1x180xf32, #tpu.memory_space<vmem>>, %arg4: memref<2x60x60xf32, #tpu.memory_space<vmem>>, %arg5: memref<2x1x60xf32, #tpu.memory_space<vmem>>, %arg6: memref<2x1x60xf32, #tpu.memory_space<vmem>>, %arg7: memref<2x1x60xf32, #tpu.memory_space<vmem>>, %arg8: memref<2x60x2048xbf16, #tpu.memory_space<vmem>>, %arg9: memref<2x1x2048xf32, #tpu.memory_space<vmem>>, %arg10: memref<2x2048x60xbf16, #tpu.memory_space<vmem>>, %arg11: memref<2x1x60xf32, #tpu.memory_space<vmem>>, %arg12: memref<2x1x60xf32, #tpu.memory_space<vmem>>, %arg13: memref<2x1x60xf32, #tpu.memory_space<vmem>>, %arg14: memref<8x2x60xf32, #tpu.memory_space<vmem>>) attributes {dimension_semantics = [], scalar_prefetch = 0 : i64, scratch_operands = 0 : i64, tpu.core_type = #tpu.core_type<tc>} {
    %c0 = arith.constant 0 : index
    %c0_0 = arith.constant 0 : index
    %c0_1 = arith.constant 0 : index
    %0 = vector.load %arg0[%c0, %c0_0, %c0_1] : memref<8x2x60xf32, #tpu.memory_space<vmem>>, vector<8x2x60xf32>
    %1 = vector.shape_cast %0 : vector<8x2x60xf32> to vector<16x60xf32>
    %c0_2 = arith.constant 0 : index
    %c0_3 = arith.constant 0 : index
    %2 = vector.load %arg1[%c0_2, %c0_3] : memref<16x16xf32, #tpu.memory_space<vmem>>, vector<16x16xf32>
    %c0_4 = arith.constant 0 : index
    %c0_5 = arith.constant 0 : index
    %c0_6 = arith.constant 0 : index
    %3 = vector.load %arg2[%c0_4, %c0_5, %c0_6] : memref<2x60x180xf32, #tpu.memory_space<vmem>>, vector<1x60x180xf32>
    %4 = vector.shape_cast %3 : vector<1x60x180xf32> to vector<60x180xf32>
    %cst = arith.constant dense<0.000000e+00> : vector<16x180xf32>
    %5 = tpu.matmul %1, %4, %cst {dimension_numbers = #tpu.dot_dimension_numbers<[1], [0], [0], [1], [0, 0, 1, 1], [], []>} : vector<16x60xf32>, vector<60x180xf32>, vector<16x180xf32> -> vector<16x180xf32>
    %c0_7 = arith.constant 0 : index
    %c0_8 = arith.constant 0 : index
    %c0_9 = arith.constant 0 : index
    %6 = vector.load %arg3[%c0_7, %c0_8, %c0_9] : memref<2x1x180xf32, #tpu.memory_space<vmem>>, vector<1x1x180xf32>
    %7 = vector.shape_cast %6 : vector<1x1x180xf32> to vector<1x180xf32>
    %8 = vector.broadcast %7 : vector<1x180xf32> to vector<16x180xf32>
    %9 = arith.addf %5, %8 : vector<16x180xf32>
    %10 = vector.extract_strided_slice %9 {offsets = [0, 0], sizes = [16, 18], strides = [1, 1]} : vector<16x180xf32> to vector<16x18xf32>
    %11 = vector.extract_strided_slice %9 {offsets = [0, 18], sizes = [16, 18], strides = [1, 1]} : vector<16x180xf32> to vector<16x18xf32>
    %12 = vector.extract_strided_slice %9 {offsets = [0, 36], sizes = [16, 18], strides = [1, 1]} : vector<16x180xf32> to vector<16x18xf32>
    %13 = vector.extract_strided_slice %9 {offsets = [0, 54], sizes = [16, 18], strides = [1, 1]} : vector<16x180xf32> to vector<16x18xf32>
    %14 = vector.extract_strided_slice %9 {offsets = [0, 72], sizes = [16, 18], strides = [1, 1]} : vector<16x180xf32> to vector<16x18xf32>
    %15 = vector.extract_strided_slice %9 {offsets = [0, 90], sizes = [16, 18], strides = [1, 1]} : vector<16x180xf32> to vector<16x18xf32>
    %16 = vector.extract_strided_slice %9 {offsets = [0, 108], sizes = [16, 18], strides = [1, 1]} : vector<16x180xf32> to vector<16x18xf32>
    %17 = vector.extract_strided_slice %9 {offsets = [0, 126], sizes = [16, 18], strides = [1, 1]} : vector<16x180xf32> to vector<16x18xf32>
    %18 = vector.extract_strided_slice %9 {offsets = [0, 144], sizes = [16, 18], strides = [1, 1]} : vector<16x180xf32> to vector<16x18xf32>
    %19 = vector.extract_strided_slice %9 {offsets = [0, 162], sizes = [16, 18], strides = [1, 1]} : vector<16x180xf32> to vector<16x18xf32>
    %20 = vector.shape_cast %10 : vector<16x18xf32> to vector<1x16x18xf32>
    %21 = vector.shape_cast %11 : vector<16x18xf32> to vector<1x16x18xf32>
    %22 = vector.shape_cast %12 : vector<16x18xf32> to vector<1x16x18xf32>
    %23 = vector.shape_cast %13 : vector<16x18xf32> to vector<1x16x18xf32>
    %24 = vector.shape_cast %14 : vector<16x18xf32> to vector<1x16x18xf32>
    %25 = vector.shape_cast %15 : vector<16x18xf32> to vector<1x16x18xf32>
    %26 = vector.shape_cast %16 : vector<16x18xf32> to vector<1x16x18xf32>
    %27 = vector.shape_cast %17 : vector<16x18xf32> to vector<1x16x18xf32>
    %28 = vector.shape_cast %18 : vector<16x18xf32> to vector<1x16x18xf32>
    %29 = vector.shape_cast %19 : vector<16x18xf32> to vector<1x16x18xf32>
    %30 = tpu.concatenate %20, %21, %22, %23, %24, %25, %26, %27, %28, %29 in 0 : vector<1x16x18xf32>, vector<1x16x18xf32>, vector<1x16x18xf32>, vector<1x16x18xf32>, vector<1x16x18xf32>, vector<1x16x18xf32>, vector<1x16x18xf32>, vector<1x16x18xf32>, vector<1x16x18xf32>, vector<1x16x18xf32> -> vector<10x16x18xf32>
    %31 = vector.extract_strided_slice %30 {offsets = [0, 0, 0], sizes = [10, 16, 6], strides = [1, 1, 1]} : vector<10x16x18xf32> to vector<10x16x6xf32>
    %32 = vector.extract_strided_slice %30 {offsets = [0, 0, 6], sizes = [10, 16, 6], strides = [1, 1, 1]} : vector<10x16x18xf32> to vector<10x16x6xf32>
    %33 = vector.extract_strided_slice %30 {offsets = [0, 0, 12], sizes = [10, 16, 6], strides = [1, 1, 1]} : vector<10x16x18xf32> to vector<10x16x6xf32>
    "tpu.trace_start"() <{level = 10 : i32, message = "hqd,hkd->hqk"}> : () -> ()
    %cst_10 = arith.constant dense<0.000000e+00> : vector<10x16x16xf32>
    %34 = tpu.matmul %31, %32, %cst_10 {dimension_numbers = #tpu.dot_dimension_numbers<[2], [2], [1], [1], [0, 0, 0, 1, 1, 1], [0], [0]>} : vector<10x16x6xf32>, vector<10x16x6xf32>, vector<10x16x16xf32> -> vector<10x16x16xf32>
    "tpu.trace_stop"() : () -> ()
    %35 = vector.shape_cast %2 : vector<16x16xf32> to vector<1x16x16xf32>
    %36 = vector.broadcast %35 : vector<1x16x16xf32> to vector<10x16x16xf32>
    %37 = arith.addf %34, %36 : vector<10x16x16xf32>
    %cst_11 = arith.constant dense<0xFF800000> : vector<10x16xf32>
    %38 = vector.multi_reduction <maximumf>, %37, %cst_11 [2] : vector<10x16x16xf32> to vector<10x16xf32>
    %39 = vector.shape_cast %38 : vector<10x16xf32> to vector<10x16x1xf32>
    %40 = vector.broadcast %39 : vector<10x16x1xf32> to vector<10x16x16xf32>
    %41 = arith.subf %37, %40 : vector<10x16x16xf32>
    %42 = math.exp %41 : vector<10x16x16xf32>
    %cst_12 = arith.constant dense<0.000000e+00> : vector<10x16xf32>
    %43 = vector.multi_reduction <add>, %42, %cst_12 [2] : vector<10x16x16xf32> to vector<10x16xf32>
    %44 = vector.shape_cast %43 : vector<10x16xf32> to vector<10x16x1xf32>
    %45 = tpu.reciprocal %44 {approx = true} : vector<10x16x1xf32> -> vector<10x16x1xf32>
    %46 = vector.broadcast %45 : vector<10x16x1xf32> to vector<10x16x16xf32>
    %47 = arith.mulf %42, %46 : vector<10x16x16xf32>
    "tpu.trace_start"() <{level = 10 : i32, message = "hqk,hkd->hqd"}> : () -> ()
    %cst_13 = arith.constant dense<0.000000e+00> : vector<10x16x6xf32>
    %48 = tpu.matmul %47, %33, %cst_13 {dimension_numbers = #tpu.dot_dimension_numbers<[2], [1], [1], [2], [0, 0, 0, 1, 1, 2], [0], [0]>} : vector<10x16x16xf32>, vector<10x16x6xf32>, vector<10x16x6xf32> -> vector<10x16x6xf32>
    "tpu.trace_stop"() : () -> ()
    %49 = vector.extract_strided_slice %48 {offsets = [0, 0, 0], sizes = [1, 16, 6], strides = [1, 1, 1]} : vector<10x16x6xf32> to vector<1x16x6xf32>
    %50 = vector.shape_cast %49 : vector<1x16x6xf32> to vector<16x6xf32>
    %51 = vector.extract_strided_slice %48 {offsets = [1, 0, 0], sizes = [1, 16, 6], strides = [1, 1, 1]} : vector<10x16x6xf32> to vector<1x16x6xf32>
    %52 = vector.shape_cast %51 : vector<1x16x6xf32> to vector<16x6xf32>
    %53 = vector.extract_strided_slice %48 {offsets = [2, 0, 0], sizes = [1, 16, 6], strides = [1, 1, 1]} : vector<10x16x6xf32> to vector<1x16x6xf32>
    %54 = vector.shape_cast %53 : vector<1x16x6xf32> to vector<16x6xf32>
    %55 = vector.extract_strided_slice %48 {offsets = [3, 0, 0], sizes = [1, 16, 6], strides = [1, 1, 1]} : vector<10x16x6xf32> to vector<1x16x6xf32>
    %56 = vector.shape_cast %55 : vector<1x16x6xf32> to vector<16x6xf32>
    %57 = vector.extract_strided_slice %48 {offsets = [4, 0, 0], sizes = [1, 16, 6], strides = [1, 1, 1]} : vector<10x16x6xf32> to vector<1x16x6xf32>
    %58 = vector.shape_cast %57 : vector<1x16x6xf32> to vector<16x6xf32>
    %59 = vector.extract_strided_slice %48 {offsets = [5, 0, 0], sizes = [1, 16, 6], strides = [1, 1, 1]} : vector<10x16x6xf32> to vector<1x16x6xf32>
    %60 = vector.shape_cast %59 : vector<1x16x6xf32> to vector<16x6xf32>
    %61 = vector.extract_strided_slice %48 {offsets = [6, 0, 0], sizes = [1, 16, 6], strides = [1, 1, 1]} : vector<10x16x6xf32> to vector<1x16x6xf32>
    %62 = vector.shape_cast %61 : vector<1x16x6xf32> to vector<16x6xf32>
    %63 = vector.extract_strided_slice %48 {offsets = [7, 0, 0], sizes = [1, 16, 6], strides = [1, 1, 1]} : vector<10x16x6xf32> to vector<1x16x6xf32>
    %64 = vector.shape_cast %63 : vector<1x16x6xf32> to vector<16x6xf32>
    %65 = vector.extract_strided_slice %48 {offsets = [8, 0, 0], sizes = [1, 16, 6], strides = [1, 1, 1]} : vector<10x16x6xf32> to vector<1x16x6xf32>
    %66 = vector.shape_cast %65 : vector<1x16x6xf32> to vector<16x6xf32>
    %67 = vector.extract_strided_slice %48 {offsets = [9, 0, 0], sizes = [1, 16, 6], strides = [1, 1, 1]} : vector<10x16x6xf32> to vector<1x16x6xf32>
    %68 = vector.shape_cast %67 : vector<1x16x6xf32> to vector<16x6xf32>
    %69 = tpu.concatenate %50, %52, %54, %56, %58, %60, %62, %64, %66, %68 in 1 : vector<16x6xf32>, vector<16x6xf32>, vector<16x6xf32>, vector<16x6xf32>, vector<16x6xf32>, vector<16x6xf32>, vector<16x6xf32>, vector<16x6xf32>, vector<16x6xf32>, vector<16x6xf32> -> vector<16x60xf32>
    %c0_14 = arith.constant 0 : index
    %c0_15 = arith.constant 0 : index
    %c0_16 = arith.constant 0 : index
    %70 = vector.load %arg4[%c0_14, %c0_15, %c0_16] : memref<2x60x60xf32, #tpu.memory_space<vmem>>, vector<1x60x60xf32>
    %71 = vector.shape_cast %70 : vector<1x60x60xf32> to vector<60x60xf32>
    %cst_17 = arith.constant dense<0.000000e+00> : vector<16x60xf32>
    %72 = tpu.matmul %69, %71, %cst_17 {dimension_numbers = #tpu.dot_dimension_numbers<[1], [0], [0], [1], [0, 0, 1, 1], [], []>} : vector<16x60xf32>, vector<60x60xf32>, vector<16x60xf32> -> vector<16x60xf32>
    %c0_18 = arith.constant 0 : index
    %c0_19 = arith.constant 0 : index
    %c0_20 = arith.constant 0 : index
    %73 = vector.load %arg5[%c0_18, %c0_19, %c0_20] : memref<2x1x60xf32, #tpu.memory_space<vmem>>, vector<1x1x60xf32>
    %74 = vector.shape_cast %73 : vector<1x1x60xf32> to vector<1x60xf32>
    %75 = vector.broadcast %74 : vector<1x60xf32> to vector<16x60xf32>
    %76 = arith.addf %72, %75 : vector<16x60xf32>
    %77 = arith.addf %1, %76 : vector<16x60xf32>
    %c0_21 = arith.constant 0 : index
    %c0_22 = arith.constant 0 : index
    %c0_23 = arith.constant 0 : index
    %78 = vector.load %arg6[%c0_21, %c0_22, %c0_23] : memref<2x1x60xf32, #tpu.memory_space<vmem>>, vector<1x1x60xf32>
    %79 = vector.shape_cast %78 : vector<1x1x60xf32> to vector<1x60xf32>
    %c0_24 = arith.constant 0 : index
    %c0_25 = arith.constant 0 : index
    %c0_26 = arith.constant 0 : index
    %80 = vector.load %arg7[%c0_24, %c0_25, %c0_26] : memref<2x1x60xf32, #tpu.memory_space<vmem>>, vector<1x1x60xf32>
    %81 = vector.shape_cast %80 : vector<1x1x60xf32> to vector<1x60xf32>
    %cst_27 = arith.constant dense<0.000000e+00> : vector<16xf32>
    %82 = vector.multi_reduction <add>, %77, %cst_27 [1] : vector<16x60xf32> to vector<16xf32>
    %83 = vector.shape_cast %82 : vector<16xf32> to vector<16x1xf32>
    %cst_28 = arith.constant 6.000000e+01 : f32
    %84 = vector.broadcast %cst_28 : f32 to vector<16x1xf32>
    %85 = arith.divf %83, %84 : vector<16x1xf32>
    %86 = vector.broadcast %85 : vector<16x1xf32> to vector<16x60xf32>
    %87 = arith.subf %77, %86 : vector<16x60xf32>
    %88 = arith.mulf %87, %87 : vector<16x60xf32>
    %cst_29 = arith.constant dense<0.000000e+00> : vector<16xf32>
    %89 = vector.multi_reduction <add>, %88, %cst_29 [1] : vector<16x60xf32> to vector<16xf32>
    %90 = vector.shape_cast %89 : vector<16xf32> to vector<16x1xf32>
    %cst_30 = arith.constant 6.000000e+01 : f32
    %91 = vector.broadcast %cst_30 : f32 to vector<16x1xf32>
    %92 = arith.divf %90, %91 : vector<16x1xf32>
    %93 = vector.broadcast %85 : vector<16x1xf32> to vector<16x60xf32>
    %94 = arith.subf %77, %93 : vector<16x60xf32>
    %cst_31 = arith.constant 9.99999974E-6 : f32
    %95 = vector.broadcast %cst_31 : f32 to vector<16x1xf32>
    %96 = arith.addf %92, %95 : vector<16x1xf32>
    %97 = math.rsqrt %96 : vector<16x1xf32>
    %98 = vector.broadcast %97 : vector<16x1xf32> to vector<16x60xf32>
    %99 = arith.mulf %94, %98 : vector<16x60xf32>
    %100 = vector.broadcast %79 : vector<1x60xf32> to vector<16x60xf32>
    %101 = arith.mulf %99, %100 : vector<16x60xf32>
    %102 = vector.broadcast %81 : vector<1x60xf32> to vector<16x60xf32>
    %103 = arith.addf %101, %102 : vector<16x60xf32>
    %104 = arith.truncf %103 : vector<16x60xf32> to vector<16x60xbf16>
    %c0_32 = arith.constant 0 : index
    %c0_33 = arith.constant 0 : index
    %c0_34 = arith.constant 0 : index
    %105 = vector.load %arg8[%c0_32, %c0_33, %c0_34] : memref<2x60x2048xbf16, #tpu.memory_space<vmem>>, vector<1x60x2048xbf16>
    %106 = vector.shape_cast %105 : vector<1x60x2048xbf16> to vector<60x2048xbf16>
    %cst_35 = arith.constant dense<0.000000e+00> : vector<16x2048xf32>
    %107 = tpu.matmul %104, %106, %cst_35 {dimension_numbers = #tpu.dot_dimension_numbers<[1], [0], [0], [1], [0, 0, 1, 1], [], []>} : vector<16x60xbf16>, vector<60x2048xbf16>, vector<16x2048xf32> -> vector<16x2048xf32>
    %c0_36 = arith.constant 0 : index
    %c0_37 = arith.constant 0 : index
    %c0_38 = arith.constant 0 : index
    %108 = vector.load %arg9[%c0_36, %c0_37, %c0_38] : memref<2x1x2048xf32, #tpu.memory_space<vmem>>, vector<1x1x2048xf32>
    %109 = vector.shape_cast %108 : vector<1x1x2048xf32> to vector<1x2048xf32>
    %110 = vector.broadcast %109 : vector<1x2048xf32> to vector<16x2048xf32>
    %111 = arith.addf %107, %110 : vector<16x2048xf32>
    %cst_39 = arith.constant 0.000000e+00 : f32
    %112 = vector.broadcast %cst_39 : f32 to vector<16x2048xf32>
    %113 = arith.maximumf %111, %112 : vector<16x2048xf32>
    %114 = arith.truncf %113 : vector<16x2048xf32> to vector<16x2048xbf16>
    %c0_40 = arith.constant 0 : index
    %c0_41 = arith.constant 0 : index
    %c0_42 = arith.constant 0 : index
    %115 = vector.load %arg10[%c0_40, %c0_41, %c0_42] : memref<2x2048x60xbf16, #tpu.memory_space<vmem>>, vector<1x2048x60xbf16>
    %116 = vector.shape_cast %115 : vector<1x2048x60xbf16> to vector<2048x60xbf16>
    %cst_43 = arith.constant dense<0.000000e+00> : vector<16x60xf32>
    %117 = tpu.matmul %114, %116, %cst_43 {dimension_numbers = #tpu.dot_dimension_numbers<[1], [0], [0], [1], [0, 0, 1, 1], [], []>} : vector<16x2048xbf16>, vector<2048x60xbf16>, vector<16x60xf32> -> vector<16x60xf32>
    %c0_44 = arith.constant 0 : index
    %c0_45 = arith.constant 0 : index
    %c0_46 = arith.constant 0 : index
    %118 = vector.load %arg11[%c0_44, %c0_45, %c0_46] : memref<2x1x60xf32, #tpu.memory_space<vmem>>, vector<1x1x60xf32>
    %119 = vector.shape_cast %118 : vector<1x1x60xf32> to vector<1x60xf32>
    %120 = vector.broadcast %119 : vector<1x60xf32> to vector<16x60xf32>
    %121 = arith.addf %117, %120 : vector<16x60xf32>
    %122 = arith.addf %103, %121 : vector<16x60xf32>
    %c0_47 = arith.constant 0 : index
    %c0_48 = arith.constant 0 : index
    %c0_49 = arith.constant 0 : index
    %123 = vector.load %arg12[%c0_47, %c0_48, %c0_49] : memref<2x1x60xf32, #tpu.memory_space<vmem>>, vector<1x1x60xf32>
    %124 = vector.shape_cast %123 : vector<1x1x60xf32> to vector<1x60xf32>
    %c0_50 = arith.constant 0 : index
    %c0_51 = arith.constant 0 : index
    %c0_52 = arith.constant 0 : index
    %125 = vector.load %arg13[%c0_50, %c0_51, %c0_52] : memref<2x1x60xf32, #tpu.memory_space<vmem>>, vector<1x1x60xf32>
    %126 = vector.shape_cast %125 : vector<1x1x60xf32> to vector<1x60xf32>
    %cst_53 = arith.constant dense<0.000000e+00> : vector<16xf32>
    %127 = vector.multi_reduction <add>, %122, %cst_53 [1] : vector<16x60xf32> to vector<16xf32>
    %128 = vector.shape_cast %127 : vector<16xf32> to vector<16x1xf32>
    %cst_54 = arith.constant 6.000000e+01 : f32
    %129 = vector.broadcast %cst_54 : f32 to vector<16x1xf32>
    %130 = arith.divf %128, %129 : vector<16x1xf32>
    %131 = vector.broadcast %130 : vector<16x1xf32> to vector<16x60xf32>
    %132 = arith.subf %122, %131 : vector<16x60xf32>
    %133 = arith.mulf %132, %132 : vector<16x60xf32>
    %cst_55 = arith.constant dense<0.000000e+00> : vector<16xf32>
    %134 = vector.multi_reduction <add>, %133, %cst_55 [1] : vector<16x60xf32> to vector<16xf32>
    %135 = vector.shape_cast %134 : vector<16xf32> to vector<16x1xf32>
    %cst_56 = arith.constant 6.000000e+01 : f32
    %136 = vector.broadcast %cst_56 : f32 to vector<16x1xf32>
    %137 = arith.divf %135, %136 : vector<16x1xf32>
    %138 = vector.broadcast %130 : vector<16x1xf32> to vector<16x60xf32>
    %139 = arith.subf %122, %138 : vector<16x60xf32>
    %cst_57 = arith.constant 9.99999974E-6 : f32
    %140 = vector.broadcast %cst_57 : f32 to vector<16x1xf32>
    %141 = arith.addf %137, %140 : vector<16x1xf32>
    %142 = math.rsqrt %141 : vector<16x1xf32>
    %143 = vector.broadcast %142 : vector<16x1xf32> to vector<16x60xf32>
    %144 = arith.mulf %139, %143 : vector<16x60xf32>
    %145 = vector.broadcast %124 : vector<1x60xf32> to vector<16x60xf32>
    %146 = arith.mulf %144, %145 : vector<16x60xf32>
    %147 = vector.broadcast %126 : vector<1x60xf32> to vector<16x60xf32>
    %148 = arith.addf %146, %147 : vector<16x60xf32>
    %c1 = arith.constant 1 : index
    %c0_58 = arith.constant 0 : index
    %c0_59 = arith.constant 0 : index
    %149 = vector.load %arg2[%c1, %c0_58, %c0_59] : memref<2x60x180xf32, #tpu.memory_space<vmem>>, vector<1x60x180xf32>
    %150 = vector.shape_cast %149 : vector<1x60x180xf32> to vector<60x180xf32>
    %cst_60 = arith.constant dense<0.000000e+00> : vector<16x180xf32>
    %151 = tpu.matmul %148, %150, %cst_60 {dimension_numbers = #tpu.dot_dimension_numbers<[1], [0], [0], [1], [0, 0, 1, 1], [], []>} : vector<16x60xf32>, vector<60x180xf32>, vector<16x180xf32> -> vector<16x180xf32>
    %c1_61 = arith.constant 1 : index
    %c0_62 = arith.constant 0 : index
    %c0_63 = arith.constant 0 : index
    %152 = vector.load %arg3[%c1_61, %c0_62, %c0_63] : memref<2x1x180xf32, #tpu.memory_space<vmem>>, vector<1x1x180xf32>
    %153 = vector.shape_cast %152 : vector<1x1x180xf32> to vector<1x180xf32>
    %154 = vector.broadcast %153 : vector<1x180xf32> to vector<16x180xf32>
    %155 = arith.addf %151, %154 : vector<16x180xf32>
    %156 = vector.extract_strided_slice %155 {offsets = [0, 0], sizes = [16, 18], strides = [1, 1]} : vector<16x180xf32> to vector<16x18xf32>
    %157 = vector.extract_strided_slice %155 {offsets = [0, 18], sizes = [16, 18], strides = [1, 1]} : vector<16x180xf32> to vector<16x18xf32>
    %158 = vector.extract_strided_slice %155 {offsets = [0, 36], sizes = [16, 18], strides = [1, 1]} : vector<16x180xf32> to vector<16x18xf32>
    %159 = vector.extract_strided_slice %155 {offsets = [0, 54], sizes = [16, 18], strides = [1, 1]} : vector<16x180xf32> to vector<16x18xf32>
    %160 = vector.extract_strided_slice %155 {offsets = [0, 72], sizes = [16, 18], strides = [1, 1]} : vector<16x180xf32> to vector<16x18xf32>
    %161 = vector.extract_strided_slice %155 {offsets = [0, 90], sizes = [16, 18], strides = [1, 1]} : vector<16x180xf32> to vector<16x18xf32>
    %162 = vector.extract_strided_slice %155 {offsets = [0, 108], sizes = [16, 18], strides = [1, 1]} : vector<16x180xf32> to vector<16x18xf32>
    %163 = vector.extract_strided_slice %155 {offsets = [0, 126], sizes = [16, 18], strides = [1, 1]} : vector<16x180xf32> to vector<16x18xf32>
    %164 = vector.extract_strided_slice %155 {offsets = [0, 144], sizes = [16, 18], strides = [1, 1]} : vector<16x180xf32> to vector<16x18xf32>
    %165 = vector.extract_strided_slice %155 {offsets = [0, 162], sizes = [16, 18], strides = [1, 1]} : vector<16x180xf32> to vector<16x18xf32>
    %166 = vector.shape_cast %156 : vector<16x18xf32> to vector<1x16x18xf32>
    %167 = vector.shape_cast %157 : vector<16x18xf32> to vector<1x16x18xf32>
    %168 = vector.shape_cast %158 : vector<16x18xf32> to vector<1x16x18xf32>
    %169 = vector.shape_cast %159 : vector<16x18xf32> to vector<1x16x18xf32>
    %170 = vector.shape_cast %160 : vector<16x18xf32> to vector<1x16x18xf32>
    %171 = vector.shape_cast %161 : vector<16x18xf32> to vector<1x16x18xf32>
    %172 = vector.shape_cast %162 : vector<16x18xf32> to vector<1x16x18xf32>
    %173 = vector.shape_cast %163 : vector<16x18xf32> to vector<1x16x18xf32>
    %174 = vector.shape_cast %164 : vector<16x18xf32> to vector<1x16x18xf32>
    %175 = vector.shape_cast %165 : vector<16x18xf32> to vector<1x16x18xf32>
    %176 = tpu.concatenate %166, %167, %168, %169, %170, %171, %172, %173, %174, %175 in 0 : vector<1x16x18xf32>, vector<1x16x18xf32>, vector<1x16x18xf32>, vector<1x16x18xf32>, vector<1x16x18xf32>, vector<1x16x18xf32>, vector<1x16x18xf32>, vector<1x16x18xf32>, vector<1x16x18xf32>, vector<1x16x18xf32> -> vector<10x16x18xf32>
    %177 = vector.extract_strided_slice %176 {offsets = [0, 0, 0], sizes = [10, 16, 6], strides = [1, 1, 1]} : vector<10x16x18xf32> to vector<10x16x6xf32>
    %178 = vector.extract_strided_slice %176 {offsets = [0, 0, 6], sizes = [10, 16, 6], strides = [1, 1, 1]} : vector<10x16x18xf32> to vector<10x16x6xf32>
    %179 = vector.extract_strided_slice %176 {offsets = [0, 0, 12], sizes = [10, 16, 6], strides = [1, 1, 1]} : vector<10x16x18xf32> to vector<10x16x6xf32>
    "tpu.trace_start"() <{level = 10 : i32, message = "hqd,hkd->hqk"}> : () -> ()
    %cst_64 = arith.constant dense<0.000000e+00> : vector<10x16x16xf32>
    %180 = tpu.matmul %177, %178, %cst_64 {dimension_numbers = #tpu.dot_dimension_numbers<[2], [2], [1], [1], [0, 0, 0, 1, 1, 1], [0], [0]>} : vector<10x16x6xf32>, vector<10x16x6xf32>, vector<10x16x16xf32> -> vector<10x16x16xf32>
    "tpu.trace_stop"() : () -> ()
    %181 = vector.shape_cast %2 : vector<16x16xf32> to vector<1x16x16xf32>
    %182 = vector.broadcast %181 : vector<1x16x16xf32> to vector<10x16x16xf32>
    %183 = arith.addf %180, %182 : vector<10x16x16xf32>
    %cst_65 = arith.constant dense<0xFF800000> : vector<10x16xf32>
    %184 = vector.multi_reduction <maximumf>, %183, %cst_65 [2] : vector<10x16x16xf32> to vector<10x16xf32>
    %185 = vector.shape_cast %184 : vector<10x16xf32> to vector<10x16x1xf32>
    %186 = vector.broadcast %185 : vector<10x16x1xf32> to vector<10x16x16xf32>
    %187 = arith.subf %183, %186 : vector<10x16x16xf32>
    %188 = math.exp %187 : vector<10x16x16xf32>
    %cst_66 = arith.constant dense<0.000000e+00> : vector<10x16xf32>
    %189 = vector.multi_reduction <add>, %188, %cst_66 [2] : vector<10x16x16xf32> to vector<10x16xf32>
    %190 = vector.shape_cast %189 : vector<10x16xf32> to vector<10x16x1xf32>
    %191 = tpu.reciprocal %190 {approx = true} : vector<10x16x1xf32> -> vector<10x16x1xf32>
    %192 = vector.broadcast %191 : vector<10x16x1xf32> to vector<10x16x16xf32>
    %193 = arith.mulf %188, %192 : vector<10x16x16xf32>
    "tpu.trace_start"() <{level = 10 : i32, message = "hqk,hkd->hqd"}> : () -> ()
    %cst_67 = arith.constant dense<0.000000e+00> : vector<10x16x6xf32>
    %194 = tpu.matmul %193, %179, %cst_67 {dimension_numbers = #tpu.dot_dimension_numbers<[2], [1], [1], [2], [0, 0, 0, 1, 1, 2], [0], [0]>} : vector<10x16x16xf32>, vector<10x16x6xf32>, vector<10x16x6xf32> -> vector<10x16x6xf32>
    "tpu.trace_stop"() : () -> ()
    %195 = vector.extract_strided_slice %194 {offsets = [0, 0, 0], sizes = [1, 16, 6], strides = [1, 1, 1]} : vector<10x16x6xf32> to vector<1x16x6xf32>
    %196 = vector.shape_cast %195 : vector<1x16x6xf32> to vector<16x6xf32>
    %197 = vector.extract_strided_slice %194 {offsets = [1, 0, 0], sizes = [1, 16, 6], strides = [1, 1, 1]} : vector<10x16x6xf32> to vector<1x16x6xf32>
    %198 = vector.shape_cast %197 : vector<1x16x6xf32> to vector<16x6xf32>
    %199 = vector.extract_strided_slice %194 {offsets = [2, 0, 0], sizes = [1, 16, 6], strides = [1, 1, 1]} : vector<10x16x6xf32> to vector<1x16x6xf32>
    %200 = vector.shape_cast %199 : vector<1x16x6xf32> to vector<16x6xf32>
    %201 = vector.extract_strided_slice %194 {offsets = [3, 0, 0], sizes = [1, 16, 6], strides = [1, 1, 1]} : vector<10x16x6xf32> to vector<1x16x6xf32>
    %202 = vector.shape_cast %201 : vector<1x16x6xf32> to vector<16x6xf32>
    %203 = vector.extract_strided_slice %194 {offsets = [4, 0, 0], sizes = [1, 16, 6], strides = [1, 1, 1]} : vector<10x16x6xf32> to vector<1x16x6xf32>
    %204 = vector.shape_cast %203 : vector<1x16x6xf32> to vector<16x6xf32>
    %205 = vector.extract_strided_slice %194 {offsets = [5, 0, 0], sizes = [1, 16, 6], strides = [1, 1, 1]} : vector<10x16x6xf32> to vector<1x16x6xf32>
    %206 = vector.shape_cast %205 : vector<1x16x6xf32> to vector<16x6xf32>
    %207 = vector.extract_strided_slice %194 {offsets = [6, 0, 0], sizes = [1, 16, 6], strides = [1, 1, 1]} : vector<10x16x6xf32> to vector<1x16x6xf32>
    %208 = vector.shape_cast %207 : vector<1x16x6xf32> to vector<16x6xf32>
    %209 = vector.extract_strided_slice %194 {offsets = [7, 0, 0], sizes = [1, 16, 6], strides = [1, 1, 1]} : vector<10x16x6xf32> to vector<1x16x6xf32>
    %210 = vector.shape_cast %209 : vector<1x16x6xf32> to vector<16x6xf32>
    %211 = vector.extract_strided_slice %194 {offsets = [8, 0, 0], sizes = [1, 16, 6], strides = [1, 1, 1]} : vector<10x16x6xf32> to vector<1x16x6xf32>
    %212 = vector.shape_cast %211 : vector<1x16x6xf32> to vector<16x6xf32>
    %213 = vector.extract_strided_slice %194 {offsets = [9, 0, 0], sizes = [1, 16, 6], strides = [1, 1, 1]} : vector<10x16x6xf32> to vector<1x16x6xf32>
    %214 = vector.shape_cast %213 : vector<1x16x6xf32> to vector<16x6xf32>
    %215 = tpu.concatenate %196, %198, %200, %202, %204, %206, %208, %210, %212, %214 in 1 : vector<16x6xf32>, vector<16x6xf32>, vector<16x6xf32>, vector<16x6xf32>, vector<16x6xf32>, vector<16x6xf32>, vector<16x6xf32>, vector<16x6xf32>, vector<16x6xf32>, vector<16x6xf32> -> vector<16x60xf32>
    %c1_68 = arith.constant 1 : index
    %c0_69 = arith.constant 0 : index
    %c0_70 = arith.constant 0 : index
    %216 = vector.load %arg4[%c1_68, %c0_69, %c0_70] : memref<2x60x60xf32, #tpu.memory_space<vmem>>, vector<1x60x60xf32>
    %217 = vector.shape_cast %216 : vector<1x60x60xf32> to vector<60x60xf32>
    %cst_71 = arith.constant dense<0.000000e+00> : vector<16x60xf32>
    %218 = tpu.matmul %215, %217, %cst_71 {dimension_numbers = #tpu.dot_dimension_numbers<[1], [0], [0], [1], [0, 0, 1, 1], [], []>} : vector<16x60xf32>, vector<60x60xf32>, vector<16x60xf32> -> vector<16x60xf32>
    %c1_72 = arith.constant 1 : index
    %c0_73 = arith.constant 0 : index
    %c0_74 = arith.constant 0 : index
    %219 = vector.load %arg5[%c1_72, %c0_73, %c0_74] : memref<2x1x60xf32, #tpu.memory_space<vmem>>, vector<1x1x60xf32>
    %220 = vector.shape_cast %219 : vector<1x1x60xf32> to vector<1x60xf32>
    %221 = vector.broadcast %220 : vector<1x60xf32> to vector<16x60xf32>
    %222 = arith.addf %218, %221 : vector<16x60xf32>
    %223 = arith.addf %148, %222 : vector<16x60xf32>
    %c1_75 = arith.constant 1 : index
    %c0_76 = arith.constant 0 : index
    %c0_77 = arith.constant 0 : index
    %224 = vector.load %arg6[%c1_75, %c0_76, %c0_77] : memref<2x1x60xf32, #tpu.memory_space<vmem>>, vector<1x1x60xf32>
    %225 = vector.shape_cast %224 : vector<1x1x60xf32> to vector<1x60xf32>
    %c1_78 = arith.constant 1 : index
    %c0_79 = arith.constant 0 : index
    %c0_80 = arith.constant 0 : index
    %226 = vector.load %arg7[%c1_78, %c0_79, %c0_80] : memref<2x1x60xf32, #tpu.memory_space<vmem>>, vector<1x1x60xf32>
    %227 = vector.shape_cast %226 : vector<1x1x60xf32> to vector<1x60xf32>
    %cst_81 = arith.constant dense<0.000000e+00> : vector<16xf32>
    %228 = vector.multi_reduction <add>, %223, %cst_81 [1] : vector<16x60xf32> to vector<16xf32>
    %229 = vector.shape_cast %228 : vector<16xf32> to vector<16x1xf32>
    %cst_82 = arith.constant 6.000000e+01 : f32
    %230 = vector.broadcast %cst_82 : f32 to vector<16x1xf32>
    %231 = arith.divf %229, %230 : vector<16x1xf32>
    %232 = vector.broadcast %231 : vector<16x1xf32> to vector<16x60xf32>
    %233 = arith.subf %223, %232 : vector<16x60xf32>
    %234 = arith.mulf %233, %233 : vector<16x60xf32>
    %cst_83 = arith.constant dense<0.000000e+00> : vector<16xf32>
    %235 = vector.multi_reduction <add>, %234, %cst_83 [1] : vector<16x60xf32> to vector<16xf32>
    %236 = vector.shape_cast %235 : vector<16xf32> to vector<16x1xf32>
    %cst_84 = arith.constant 6.000000e+01 : f32
    %237 = vector.broadcast %cst_84 : f32 to vector<16x1xf32>
    %238 = arith.divf %236, %237 : vector<16x1xf32>
    %239 = vector.broadcast %231 : vector<16x1xf32> to vector<16x60xf32>
    %240 = arith.subf %223, %239 : vector<16x60xf32>
    %cst_85 = arith.constant 9.99999974E-6 : f32
    %241 = vector.broadcast %cst_85 : f32 to vector<16x1xf32>
    %242 = arith.addf %238, %241 : vector<16x1xf32>
    %243 = math.rsqrt %242 : vector<16x1xf32>
    %244 = vector.broadcast %243 : vector<16x1xf32> to vector<16x60xf32>
    %245 = arith.mulf %240, %244 : vector<16x60xf32>
    %246 = vector.broadcast %225 : vector<1x60xf32> to vector<16x60xf32>
    %247 = arith.mulf %245, %246 : vector<16x60xf32>
    %248 = vector.broadcast %227 : vector<1x60xf32> to vector<16x60xf32>
    %249 = arith.addf %247, %248 : vector<16x60xf32>
    %250 = arith.truncf %249 : vector<16x60xf32> to vector<16x60xbf16>
    %c1_86 = arith.constant 1 : index
    %c0_87 = arith.constant 0 : index
    %c0_88 = arith.constant 0 : index
    %251 = vector.load %arg8[%c1_86, %c0_87, %c0_88] : memref<2x60x2048xbf16, #tpu.memory_space<vmem>>, vector<1x60x2048xbf16>
    %252 = vector.shape_cast %251 : vector<1x60x2048xbf16> to vector<60x2048xbf16>
    %cst_89 = arith.constant dense<0.000000e+00> : vector<16x2048xf32>
    %253 = tpu.matmul %250, %252, %cst_89 {dimension_numbers = #tpu.dot_dimension_numbers<[1], [0], [0], [1], [0, 0, 1, 1], [], []>} : vector<16x60xbf16>, vector<60x2048xbf16>, vector<16x2048xf32> -> vector<16x2048xf32>
    %c1_90 = arith.constant 1 : index
    %c0_91 = arith.constant 0 : index
    %c0_92 = arith.constant 0 : index
    %254 = vector.load %arg9[%c1_90, %c0_91, %c0_92] : memref<2x1x2048xf32, #tpu.memory_space<vmem>>, vector<1x1x2048xf32>
    %255 = vector.shape_cast %254 : vector<1x1x2048xf32> to vector<1x2048xf32>
    %256 = vector.broadcast %255 : vector<1x2048xf32> to vector<16x2048xf32>
    %257 = arith.addf %253, %256 : vector<16x2048xf32>
    %cst_93 = arith.constant 0.000000e+00 : f32
    %258 = vector.broadcast %cst_93 : f32 to vector<16x2048xf32>
    %259 = arith.maximumf %257, %258 : vector<16x2048xf32>
    %260 = arith.truncf %259 : vector<16x2048xf32> to vector<16x2048xbf16>
    %c1_94 = arith.constant 1 : index
    %c0_95 = arith.constant 0 : index
    %c0_96 = arith.constant 0 : index
    %261 = vector.load %arg10[%c1_94, %c0_95, %c0_96] : memref<2x2048x60xbf16, #tpu.memory_space<vmem>>, vector<1x2048x60xbf16>
    %262 = vector.shape_cast %261 : vector<1x2048x60xbf16> to vector<2048x60xbf16>
    %cst_97 = arith.constant dense<0.000000e+00> : vector<16x60xf32>
    %263 = tpu.matmul %260, %262, %cst_97 {dimension_numbers = #tpu.dot_dimension_numbers<[1], [0], [0], [1], [0, 0, 1, 1], [], []>} : vector<16x2048xbf16>, vector<2048x60xbf16>, vector<16x60xf32> -> vector<16x60xf32>
    %c1_98 = arith.constant 1 : index
    %c0_99 = arith.constant 0 : index
    %c0_100 = arith.constant 0 : index
    %264 = vector.load %arg11[%c1_98, %c0_99, %c0_100] : memref<2x1x60xf32, #tpu.memory_space<vmem>>, vector<1x1x60xf32>
    %265 = vector.shape_cast %264 : vector<1x1x60xf32> to vector<1x60xf32>
    %266 = vector.broadcast %265 : vector<1x60xf32> to vector<16x60xf32>
    %267 = arith.addf %263, %266 : vector<16x60xf32>
    %268 = arith.addf %249, %267 : vector<16x60xf32>
    %c1_101 = arith.constant 1 : index
    %c0_102 = arith.constant 0 : index
    %c0_103 = arith.constant 0 : index
    %269 = vector.load %arg12[%c1_101, %c0_102, %c0_103] : memref<2x1x60xf32, #tpu.memory_space<vmem>>, vector<1x1x60xf32>
    %270 = vector.shape_cast %269 : vector<1x1x60xf32> to vector<1x60xf32>
    %c1_104 = arith.constant 1 : index
    %c0_105 = arith.constant 0 : index
    %c0_106 = arith.constant 0 : index
    %271 = vector.load %arg13[%c1_104, %c0_105, %c0_106] : memref<2x1x60xf32, #tpu.memory_space<vmem>>, vector<1x1x60xf32>
    %272 = vector.shape_cast %271 : vector<1x1x60xf32> to vector<1x60xf32>
    %cst_107 = arith.constant dense<0.000000e+00> : vector<16xf32>
    %273 = vector.multi_reduction <add>, %268, %cst_107 [1] : vector<16x60xf32> to vector<16xf32>
    %274 = vector.shape_cast %273 : vector<16xf32> to vector<16x1xf32>
    %cst_108 = arith.constant 6.000000e+01 : f32
    %275 = vector.broadcast %cst_108 : f32 to vector<16x1xf32>
    %276 = arith.divf %274, %275 : vector<16x1xf32>
    %277 = vector.broadcast %276 : vector<16x1xf32> to vector<16x60xf32>
    %278 = arith.subf %268, %277 : vector<16x60xf32>
    %279 = arith.mulf %278, %278 : vector<16x60xf32>
    %cst_109 = arith.constant dense<0.000000e+00> : vector<16xf32>
    %280 = vector.multi_reduction <add>, %279, %cst_109 [1] : vector<16x60xf32> to vector<16xf32>
    %281 = vector.shape_cast %280 : vector<16xf32> to vector<16x1xf32>
    %cst_110 = arith.constant 6.000000e+01 : f32
    %282 = vector.broadcast %cst_110 : f32 to vector<16x1xf32>
    %283 = arith.divf %281, %282 : vector<16x1xf32>
    %284 = vector.broadcast %276 : vector<16x1xf32> to vector<16x60xf32>
    %285 = arith.subf %268, %284 : vector<16x60xf32>
    %cst_111 = arith.constant 9.99999974E-6 : f32
    %286 = vector.broadcast %cst_111 : f32 to vector<16x1xf32>
    %287 = arith.addf %283, %286 : vector<16x1xf32>
    %288 = math.rsqrt %287 : vector<16x1xf32>
    %289 = vector.broadcast %288 : vector<16x1xf32> to vector<16x60xf32>
    %290 = arith.mulf %285, %289 : vector<16x60xf32>
    %291 = vector.broadcast %270 : vector<1x60xf32> to vector<16x60xf32>
    %292 = arith.mulf %290, %291 : vector<16x60xf32>
    %293 = vector.broadcast %272 : vector<1x60xf32> to vector<16x60xf32>
    %294 = arith.addf %292, %293 : vector<16x60xf32>
    %cst_112 = arith.constant 2.000000e+01 : f32
    %295 = vector.broadcast %cst_112 : f32 to vector<16x60xf32>
    %296 = arith.cmpf ogt, %294, %295 : vector<16x60xf32>
    %cst_113 = arith.constant 2.000000e+01 : f32
    %297 = vector.broadcast %cst_113 : f32 to vector<16x60xf32>
    %298 = arith.minimumf %294, %297 : vector<16x60xf32>
    %299 = math.exp %298 : vector<16x60xf32>
    %300 = math.log1p %299 : vector<16x60xf32>
    %301 = arith.select %296, %294, %300 : vector<16x60xi1>, vector<16x60xf32>
    %302 = math.tanh %301 : vector<16x60xf32>
    %303 = arith.mulf %294, %302 : vector<16x60xf32>
    %304 = vector.shape_cast %303 : vector<16x60xf32> to vector<8x2x60xf32>
    %c0_114 = arith.constant 0 : index
    %c0_115 = arith.constant 0 : index
    %c0_116 = arith.constant 0 : index
    %305 = vector.load %arg14[%c0_114, %c0_115, %c0_116] : memref<8x2x60xf32, #tpu.memory_space<vmem>>, vector<8x2x60xf32>
    tpu.vector_store %arg14[%c0_114, %c0_115, %c0_116], %304 {strides = array<i32>} : memref<8x2x60xf32, #tpu.memory_space<vmem>>, vector<8x2x60xf32>,
    return
  }
}

</mosaic_0001>

<bundles_post_ra>
// kernel: encoder_forward.1
= control target key start
LH: loop header
LB: loop body
LE: loop exit
PB: predicated region body
PF: predicated region fallthrough
CT: control target
= control target key end

     0   :  { %vm134_vm0 = vcmask 1043456   ;;  %v77_v3 = vlaneseq  ;;  %v13391_v6 = vmov 0.0   ;;  %v13392_v8 = vmov 1983009808   ;;  %s16862_s0 = inlined_call_operand.vmem [shape: f32[8,2,60], index: 0, kind: input, shape index: {}]   ;;  %s16863_s1 = inlined_call_operand.vmem [shape: f32[16,16], index: 1, kind: input, shape index: {}]   ;;  %s16864_s2 = inlined_call_operand.vmem [shape: f32[2,60,180], index: 2, kind: input, shape index: {}]   ;;  %s16865_s3 = inlined_call_operand.vmem [shape: f32[2,1,180], index: 3, kind: input, shape index: {}]   ;;  %s16866_s4 = inlined_call_operand.vmem [shape: f32[2,60,60], index: 4, kind: input, shape index: {}]   ;;  %s16867_s5 = inlined_call_operand.vmem [shape: f32[2,1,60], index: 5, kind: input, shape index: {}]   ;;  %s16868_s6 = inlined_call_operand.vmem [shape: f32[2,1,60], index: 6, kind: input, shape index: {}]   ;;  %s16869_s7 = inlined_call_operand.vmem [shape: f32[2,1,60], index: 7, kind: input, shape index: {}]   ;;  %s16870_s8 = inlined_call_operand.vmem [shape: bf16[2,60,2048], index: 8, kind: input, shape index: {}]   ;;  %s16871_s9 = inlined_call_operand.vmem [shape: f32[2,1,2048], index: 9, kind: input, shape index: {}]   ;;  %s16872_s10 = inlined_call_operand.vmem [shape: bf16[2,2048,60], index: 10, kind: input, shape index: {}]   ;;  %s16873_s11 = inlined_call_operand.vmem [shape: f32[2,1,60], index: 11, kind: input, shape index: {}]   ;;  %s16874_s12 = inlined_call_operand.vmem [shape: f32[2,1,60], index: 12, kind: input, shape index: {}]   ;;  %s16875_s13 = inlined_call_operand.vmem [shape: f32[2,1,60], index: 13, kind: input, shape index: {}]   ;;  %s16876_s14 = inlined_call_operand.hbm [shape: f32[8,2,60], index: 14, kind: output, shape index: {}]  }
   0x1   :  { %v74_v0 = vld [vmem:[%s16864_s2 + $0x78] sm:$0xf]  ;;  %v73_v1 = vld [vmem:[%s16864_s2 + $0x70] sm:$0xf]  ;;  %v72_v2 = vld [vmem:[%s16864_s2 + $0x68] sm:$0xff]  ;;  %205 = vmatprep.mubr.f32.mxu0 %v13391_v6  ;;  %v98_v9 = vunpack.c.l.s4 %v13392_v8  ;;  %vm129_vm1 = vcmask 490496  }
   0x2   :  { %11085 = vmatprep.subr.msk.mxu0 %vm134_vm0, %v74_v0  ;;  %v71_v4 = vld [vmem:[%s16864_s2 + $0x60] sm:$0xff]  ;;  %v70_v5 = vld [vmem:[%s16864_s2 + $0x58] sm:$0xff]  ;;  %v13513_v7 = vshrl.u32 %v77_v3, 7  ;;  %v69_v10 = vld [vmem:[%s16864_s2 + $0x50] sm:$0xff] }
   0x3   :  { %11086 = vmatpush1.msk.msra.mxu0 %vm134_vm0, %v73_v1  ;;  %v68_v11 = vld [vmem:[%s16864_s2 + $0x48] sm:$0xff]  ;;  %v67_v12 = vld [vmem:[%s16864_s2 + $0x40] sm:$0xff]  ;;  %v66_v13 = vld [vmem:[%s16864_s2 + $0x38] sm:$0xff]  ;;  %v99_v14 = vunpack.c.0.s8 %v98_v9 }
   0x4   :  { %159 = vmatprep.subr.mxu0 %v72_v2  ;;  %v65_v15 = vld [vmem:[%s16864_s2 + $0x30] sm:$0xff]  ;;  %v49_v16 = vld [vmem:[%s16862_s0] sm:$0x3]  ;;  %v50_v17 = vld [vmem:[%s16862_s0 + $0x2] sm:$0x3] }
   0x5   :  { %160 = vmatpush1.msra.mxu0 %v71_v4  ;;  %v64_v18 = vld [vmem:[%s16864_s2 + $0x28] sm:$0xff]  ;;  %v51_v19 = vld [vmem:[%s16862_s0 + $0x4] sm:$0x3]  ;;  %v52_v20 = vld [vmem:[%s16862_s0 + $0x6] sm:$0x3]  ;;  %v95_v21 = vcombine.low %v49_v16, %v50_v17  ;;  %v13546_v22 = vsub.s32 %v99_v14, %v13513_v7 }
   0x6   :  { %161 = vmatprep.subr.mxu0 %v70_v5  ;;  %v53_v23 = vld [vmem:[%s16862_s0 + $0x8] sm:$0x3]  ;;  %v63_v24 = vld [vmem:[%s16864_s2 + $0x20] sm:$0xff]  ;;  %v96_v25 = vcombine.low %v51_v19, %v52_v20  ;;  %v54_v26 = vld [vmem:[%s16862_s0 + $0xa] sm:$0x3] }
   0x7   :  { %162 = vmatpush1.msra.mxu0 %v69_v10  ;;  %v55_v27 = vld [vmem:[%s16862_s0 + $0xc] sm:$0x3]  ;;  %v56_v28 = vld [vmem:[%s16862_s0 + $0xe] sm:$0x3]  ;;  %v62_v29 = vld [vmem:[%s16864_s2 + $0x18] sm:$0xff]  ;;  %v103_v31 = vrot.slane %v95_v21, %v13546_v22  ;;  %v112_v33 = vcombine.low %v53_v23, %v54_v26 }
   0x8   :  { %163 = vmatprep.subr.mxu0 %v68_v11  ;;  %v61_v30 = vld [vmem:[%s16864_s2 + $0x10] sm:$0xff]  ;;  %v110_v32 = vrot.slane %v96_v25, %v13546_v22  ;;  %v113_v34 = vcombine.low %v55_v27, %v56_v28  ;;  %v60_v35 = vld [vmem:[%s16864_s2 + $0x8] sm:$0xff]  ;;  %v59_v36 = vld [vmem:[%s16864_s2] sm:$0xff] }
   0x9   :  { %164 = vmatpush1.msra.mxu0 %v67_v12  ;;  %v120_v38 = vrot.slane %v112_v33, %v13546_v22 }
   0xa   :  { %165 = vmatprep.subr.mxu0 %v66_v13  ;;  %v111_v37 = vcombine.low %v103_v31, %v110_v32  ;;  %v127_v39 = vrot.slane %v113_v34, %v13546_v22 }
   0xb   :  { %166 = vmatpush1.msra.mxu0 %v65_v15 }
   0xc   :  { %167 = vmatprep.subr.mxu0 %v64_v18  ;;  %v128_v40 = vcombine.low %v120_v38, %v127_v39 }
   0xd   :  { %168 = vmatpush1.msra.mxu0 %v63_v24 }
   0xe   :  { %169 = vmatprep.subr.mxu0 %v62_v29 }
   0xf   :  { %170 = vmatpush1.msra.mxu0 %v61_v30 }
  0x10   :  { %171 = vmatprep.subr.mxu0 %v60_v35 }
  0x11   :  { %172 = vmatpush1.msra.mxu0 %v59_v36 }
  0x12   :  { %11087 = vmatmul.mubr.msk.f32.vlgmr.msra.gmra.mxu0 %vm129_vm1, %v111_v37 }
  0x13   :  { %211 = vmatprep.mubr.f32.mxu0 %v13391_v6 }
  0x16   :  { %11088 = vmatmul.mubr.msk.f32.gmra.mxu0 %vm129_vm1, %v128_v40 }
  0x17   :  { %19 = vsyncpa [#allocation3], 0  ;;  %v13583_v41 = vsub.s32 0, %v13513_v7  ;;  %v75_v42 = vld [vmem:[%s16865_s3] sm:$0x3]  ;;  %vm269_vm2 = vcmask 48128  }
  0x18   :  { %s13393_s15 = smov 92   ;;  %s13394_s16 = smov 110   ;;  %v13612_v49 = vsub.s32 1, %v13513_v7  ;;  %vm254_vm3 = vcmask 15360   ;;  %vm1136_vm4 = vcmask 130048   ;;  %vm2301_vm5 = vcmask 97280  }
  0x19   :  { %16917 = vst [vmem:[#allocation5_spill] sm:$0xff] %v13583_v41  ;;  %v80_v43 = vrot.slane %v75_v42, %v13583_v41  ;;  %s13395_s17 = smov 74   ;;  %s13396_s18 = smov 38   ;;  %vm2304_vm6 = vcmask 146432   ;;  %vm2307_vm7 = vcmask 195584   ;;  %vm2310_vm8 = vcmask 244736  }
  0x1a   :  { %s13397_s19 = smov 56   ;;  %v84_v51 = vrot.slane %v75_v42, %v13612_v49  ;;  %s13398_s20 = smov 20   ;;  %v13820_v42 = vld [vmem:[%s16863_s1 + $0x8] sm:$0xff]  ;;  %vm2313_vm9 = vcmask 293888   ;;  %vm2316_vm10 = vcmask 343040   ;;  %vm2319_vm11 = vcmask 392192  }
  0x1b   :  { %s13399_s21 = smov 2   ;;  %s16887_s22 = smov 94   ;;  %vm2322_vm12 = vcmask 441344   ;;  %vm3311_vm13 = vcmask 1045504  }
  0x1c   :  { %s16901_s23 = smov 112   ;;  %s16883_s24 = smov 122  }
  0x1d   :  { %s16879_s25 = smov 116   ;;  %s16877_s30 = smov 6  }
  0x1e   :  { %s16881_s26 = smov 12   ;;  %s16885_s29 = smov 24  }
  0x1f   :  { %s16897_s27 = smov 36   ;;  %s16895_s28 = smov 42  }
  0xd2   :  { %v207_v44 = vpop.f32.mrf.mxu0 }
  0xd3   :  { %v13589_v45 = vadd.f32 %v207_v44, %v80_v43  ;;  %v13825_v44 = vld [vmem:[%s16863_s1] sm:$0xff] }
  0xd4   :  { %v209_v46 = vpop.f32.mrf.mxu0 }
  0xd5   :  { %12536 = vmatprep.mubr.msk.f32.mxu1 %vm269_vm2, %v13589_v45  ;;  %v210_v53 = vadd.f32 %v209_v46, %v84_v51 }
  0xd6   :  { %v213_v47 = vpop.f32.mrf.mxu0 }
  0xd7   :  { %v13593_v48 = vadd.f32 %v213_v47, %v80_v43 }
  0xd8   :  { %v215_v50 = vpop.f32.mrf.mxu0 }
  0xd9   :  { %226 = vrot.lane.b32.xlu1 %v13593_v48, %s13393_s15  ;;  %222 = vrot.lane.b32.xlu0 %v13593_v48, %s13394_s16  ;;  %v216_v52 = vadd.f32 %v215_v50, %v84_v51 }
  0xdd   :  { %224 = vrot.lane.b32.xlu1 %v13589_v45, %s13393_s15  ;;  %220 = vrot.lane.b32.xlu0 %v13589_v45, %s13394_s16 }
  0xe1   :  { %228 = vrot.lane.b32.xlu1 %v13589_v45, %s13395_s17  ;;  %230 = vrot.lane.b32.xlu0 %v13593_v48, %s13395_s17 }
  0xe5   :  { %236 = vrot.lane.b32.xlu1 %v13589_v45, %s13396_s18  ;;  %232 = vrot.lane.b32.xlu0 %v13589_v45, %s13397_s19 }
  0xe9   :  { %238 = vrot.lane.b32.xlu1 %v13593_v48, %s13396_s18  ;;  %234 = vrot.lane.b32.xlu0 %v13593_v48, %s13397_s19 }
  0xed   :  { %240 = vrot.lane.b32.xlu1 %v13589_v45, %s13398_s20  ;;  %242 = vrot.lane.b32.xlu0 %v13593_v48, %s13398_s20 }
  0xf1   :  { %250 = vrot.lane.b32.xlu1 %v13593_v48, %s13399_s21  ;;  %252 = vrot.lane.b32.xlu0 %v216_v52, %s13399_s21 }
  0xf5   :  { %248 = vrot.lane.b32.xlu1 %v210_v53, %s13399_s21  ;;  %246 = vrot.lane.b32.xlu0 %v13589_v45, %s13399_s21 }
  0xf9   :  { %263 = vrot.lane.b32.xlu1 %v216_v52, %s16887_s22  ;;  %259 = vrot.lane.b32.xlu0 %v216_v52, %s16901_s23 }
  0xfd   :  { %261 = vrot.lane.b32.xlu1 %v210_v53, %s16887_s22  ;;  %257 = vrot.lane.b32.xlu0 %v210_v53, %s16901_s23  ;;  %s16899_s22 = smov 30   ;;  %s16936_s23 = smov 54  }
 0x101   :  { %265 = vrot.lane.b32.xlu1 %v13589_v45, %s16883_s24  ;;  %267 = vrot.lane.b32.xlu0 %v13593_v48, %s16883_s24 }
 0x14b   :  { %v13637_v54 = vpop.permute.xlu1 %226  ;;  %v13639_v55 = vpop.permute.xlu0 %222 }
 0x14c   :  { %355 = vrot.lane.b32.xlu0 %v13639_v55, %s16883_s24 }
 0x14f   :  { %v13643_v56 = vpop.permute.xlu1 %224  ;;  %v221_v57 = vpop.permute.xlu0 %220 }
 0x150   :  { %442 = vrot.lane.b32.xlu0 %v13637_v54, %s16883_s24  ;;  %353 = vrot.lane.b32.xlu1 %v221_v57, %s16883_s24 }
 0x153   :  { %v13648_v58 = vpop.permute.xlu1 %228  ;;  %v13650_v59 = vpop.permute.xlu0 %230 }
 0x154   :  { %440 = vrot.lane.b32.xlu1 %v13643_v56, %s16883_s24  ;;  %529 = vrot.lane.b32.xlu0 %v13650_v59, %s16883_s24 }
 0x157   :  { %v13656_v60 = vpop.permute.xlu1 %236  ;;  %v233_v61 = vpop.permute.xlu0 %232 }
 0x158   :  { %527 = vrot.lane.b32.xlu1 %v13648_v58, %s16883_s24  ;;  %12564 = vmatprep.mubr.msk.f32.mxu0 %vm269_vm2, %v233_v61 }
 0x15b   :  { %v13661_v62 = vpop.permute.xlu1 %238  ;;  %v13663_v63 = vpop.permute.xlu0 %234 }
 0x15c   :  { %703 = vrot.lane.b32.xlu1 %v13661_v62, %s16883_s24  ;;  %616 = vrot.lane.b32.xlu0 %v13663_v63, %s16883_s24 }
 0x15f   :  { %v13669_v0 = vpop.permute.xlu1 %240  ;;  %v13671_v1 = vpop.permute.xlu0 %242 }
 0x160   :  { %701 = vrot.lane.b32.xlu1 %v13656_v60, %s16883_s24  ;;  %614 = vrot.lane.b32.xlu0 %v233_v61, %s16883_s24 }
 0x163   :  { %v251_v2 = vpop.permute.xlu1 %250  ;;  %v253_v3 = vpop.permute.xlu0 %252 }
 0x164   :  { %790 = vrot.lane.b32.xlu0 %v13671_v1, %s16883_s24  ;;  %v13679_v4 = vsel %vm254_vm3, %v251_v2, %v253_v3 }
 0x165   :  { %877 = vrot.lane.b32.xlu1 %v13679_v4, %s16883_s24 }
 0x167   :  { %v249_v5 = vpop.permute.xlu1 %248  ;;  %v247_v8 = vpop.permute.xlu0 %246 }
 0x168   :  { %788 = vrot.lane.b32.xlu0 %v13669_v0, %s16883_s24  ;;  %v13686_v9 = vsel %vm254_vm3, %v247_v8, %v249_v5 }
 0x169   :  { %875 = vrot.lane.b32.xlu1 %v13686_v9, %s16883_s24 }
 0x16b   :  { %v13690_v10 = vpop.permute.xlu1 %263  ;;  %v13692_v11 = vpop.permute.xlu0 %259 }
 0x16c   :  { %964 = vrot.lane.b32.xlu0 %v13692_v11, %s16883_s24 }
 0x16d   :  { %1051 = vrot.lane.b32.xlu1 %v13690_v10, %s16883_s24 }
 0x16f   :  { %v13698_v12 = vpop.permute.xlu1 %261  ;;  %v13700_v13 = vpop.permute.xlu0 %257 }
 0x170   :  { %962 = vrot.lane.b32.xlu0 %v13700_v13, %s16883_s24 }
 0x171   :  { %1049 = vrot.lane.b32.xlu1 %v13698_v12, %s16883_s24  ;;  %s16891_s24 = smov 54  }
 0x173   :  { %v268_v14 = vpop.permute.xlu0 %267  ;;  %v266_v15 = vpop.permute.xlu1 %265 }
 0x174   :  { %1446 = vrot.lane.b32.xlu0 %v13639_v55, %s16879_s25  ;;  %12532 = vmatprep.subr.msk.mxu1 %vm269_vm2, %v268_v14 }
 0x175   :  { %1359 = vrot.lane.b32.xlu1 %v13593_v48, %s16879_s25  ;;  %12533 = vmatpush3.xpose.msk.msra.mxu1 %vm269_vm2, %v268_v14 }
 0x176   :  { %12534 = vmatprep.subr.msk.mxu1 %vm269_vm2, %v266_v15 }
 0x178   :  { %1533 = vrot.lane.b32.xlu0 %v13637_v54, %s16879_s25 }
 0x179   :  { %1357 = vrot.lane.b32.xlu1 %v13589_v45, %s16879_s25  ;;  %12535 = vmatpush3.xpose.msk.msra.mxu1 %vm269_vm2, %v266_v15 }
 0x17c   :  { %1531 = vrot.lane.b32.xlu0 %v13643_v56, %s16879_s25  ;;  %12537 = vmatmul.mubr.msk.f32.vlgmr.msra.gmra.mxu1 %vm269_vm2, %v13593_v48 }
 0x17d   :  { %1444 = vrot.lane.b32.xlu1 %v221_v57, %s16879_s25  ;;  %12543 = vmatprep.mubr.msk.f32.mxu1 %vm269_vm2, %v221_v57 }
 0x180   :  { %1707 = vrot.lane.b32.xlu0 %v13663_v63, %s16879_s25 }
 0x181   :  { %1620 = vrot.lane.b32.xlu1 %v13650_v59, %s16879_s25 }
 0x184   :  { %1705 = vrot.lane.b32.xlu0 %v233_v61, %s16879_s25 }
 0x185   :  { %1618 = vrot.lane.b32.xlu1 %v13648_v58, %s16879_s25 }
 0x188   :  { %1881 = vrot.lane.b32.xlu0 %v13671_v1, %s16879_s25 }
 0x189   :  { %1794 = vrot.lane.b32.xlu1 %v13661_v62, %s16879_s25 }
 0x18c   :  { %1879 = vrot.lane.b32.xlu0 %v13669_v0, %s16879_s25 }
 0x18d   :  { %1792 = vrot.lane.b32.xlu1 %v13656_v60, %s16879_s25 }
 0x191   :  { %1966 = vrot.lane.b32.xlu1 %v13686_v9, %s16879_s25 }
 0x195   :  { %1968 = vrot.lane.b32.xlu1 %v13679_v4, %s16879_s25 }
 0x1be   :  { %v356_v16 = vpop.permute.xlu0 %355 }
 0x1bf   :  { %12539 = vmatprep.subr.msk.mxu1 %vm269_vm2, %v356_v16 }
 0x1c0   :  { %12540 = vmatpush3.xpose.msk.msra.mxu1 %vm269_vm2, %v356_v16 }
 0x1c2   :  { %v354_v17 = vpop.permute.xlu1 %353  ;;  %v443_v18 = vpop.permute.xlu0 %442 }
 0x1c3   :  { %12541 = vmatprep.subr.msk.mxu1 %vm269_vm2, %v354_v17 }
 0x1c4   :  { %12542 = vmatpush3.xpose.msk.msra.mxu1 %vm269_vm2, %v354_v17 }
 0x1c5   :  { %12546 = vmatprep.subr.msk.mxu1 %vm269_vm2, %v443_v18 }
 0x1c6   :  { %v441_v19 = vpop.permute.xlu1 %440  ;;  %v530_v20 = vpop.permute.xlu0 %529 }
 0x1c7   :  { %12544 = vmatmul.mubr.msk.f32.vlgmr.msra.gmra.mxu1 %vm269_vm2, %v13639_v55 }
 0x1c8   :  { %12547 = vmatpush3.xpose.msk.msra.mxu1 %vm269_vm2, %v443_v18  ;;  %12550 = vmatprep.mubr.msk.f32.mxu1 %vm269_vm2, %v13643_v56 }
 0x1c9   :  { %12548 = vmatprep.subr.msk.mxu1 %vm269_vm2, %v441_v19 }
 0x1ca   :  { %v528_v21 = vpop.permute.xlu1 %527 }
 0x1cc   :  { %12549 = vmatpush3.xpose.msk.msra.mxu1 %vm269_vm2, %v441_v19 }
 0x1cd   :  { %12553 = vmatprep.subr.msk.mxu1 %vm269_vm2, %v530_v20 }
 0x1ce   :  { %v704_v23 = vpop.permute.xlu1 %703  ;;  %v617_v24 = vpop.permute.xlu0 %616 }
 0x1cf   :  { %12551 = vmatmul.mubr.msk.f32.vlgmr.msra.gmra.mxu1 %vm269_vm2, %v13637_v54  ;;  %12560 = vmatprep.subr.msk.mxu0 %vm269_vm2, %v617_v24 }
 0x1d0   :  { %12554 = vmatpush3.xpose.msk.msra.mxu1 %vm269_vm2, %v530_v20  ;;  %12557 = vmatprep.mubr.msk.f32.mxu1 %vm269_vm2, %v13648_v58 }
 0x1d1   :  { %12561 = vmatpush3.xpose.msk.msra.mxu0 %vm269_vm2, %v617_v24  ;;  %12555 = vmatprep.subr.msk.mxu1 %vm269_vm2, %v528_v21 }
 0x1d2   :  { %v702_v25 = vpop.permute.xlu1 %701  ;;  %v615_v26 = vpop.permute.xlu0 %614 }
 0x1d3   :  { %12562 = vmatprep.subr.msk.mxu0 %vm269_vm2, %v615_v26 }
 0x1d4   :  { %12556 = vmatpush3.xpose.msk.msra.mxu1 %vm269_vm2, %v528_v21 }
 0x1d5   :  { %12563 = vmatpush3.xpose.msk.msra.mxu0 %vm269_vm2, %v615_v26  ;;  %12567 = vmatprep.subr.msk.mxu1 %vm269_vm2, %v704_v23 }
 0x1d6   :  { %v791_v27 = vpop.permute.xlu0 %790 }
 0x1d7   :  { %v878_v28 = vpop.permute.xlu1 %877  ;;  %12558 = vmatmul.mubr.msk.f32.vlgmr.msra.gmra.mxu1 %vm269_vm2, %v13650_v59  ;;  %12574 = vmatprep.subr.msk.mxu0 %vm269_vm2, %v791_v27 }
 0x1d8   :  { %12565 = vmatmul.mubr.msk.f32.vlgmr.msra.gmra.mxu0 %vm269_vm2, %v13663_v63  ;;  %12568 = vmatpush3.xpose.msk.msra.mxu1 %vm269_vm2, %v704_v23 }
 0x1d9   :  { %12571 = vmatprep.mubr.msk.f32.mxu1 %vm269_vm2, %v13656_v60  ;;  %12575 = vmatpush3.xpose.msk.msra.mxu0 %vm269_vm2, %v791_v27 }
 0x1da   :  { %12578 = vmatprep.mubr.msk.f32.mxu0 %vm269_vm2, %v13669_v0  ;;  %12569 = vmatprep.subr.msk.mxu1 %vm269_vm2, %v702_v25  ;;  %v789_v29 = vpop.permute.xlu0 %788 }
 0x1db   :  { %v876_v30 = vpop.permute.xlu1 %875  ;;  %12576 = vmatprep.subr.msk.mxu0 %vm269_vm2, %v789_v29 }
 0x1dc   :  { %12570 = vmatpush3.xpose.msk.msra.mxu1 %vm269_vm2, %v702_v25 }
 0x1dd   :  { %12577 = vmatpush3.xpose.msk.msra.mxu0 %vm269_vm2, %v789_v29  ;;  %12581 = vmatprep.subr.msk.mxu1 %vm269_vm2, %v878_v28 }
 0x1de   :  { %v965_v31 = vpop.permute.xlu0 %964 }
 0x1df   :  { %v1052_v32 = vpop.permute.xlu1 %1051  ;;  %12572 = vmatmul.mubr.msk.f32.vlgmr.msra.gmra.mxu1 %vm269_vm2, %v13661_v62  ;;  %12588 = vmatprep.subr.msk.mxu0 %vm269_vm2, %v965_v31 }
 0x1e0   :  { %12579 = vmatmul.mubr.msk.f32.vlgmr.msra.gmra.mxu0 %vm269_vm2, %v13671_v1  ;;  %12582 = vmatpush3.xpose.msk.msra.mxu1 %vm269_vm2, %v878_v28 }
 0x1e1   :  { %12585 = vmatprep.mubr.msk.f32.mxu1 %vm269_vm2, %v13686_v9  ;;  %12589 = vmatpush3.xpose.msk.msra.mxu0 %vm269_vm2, %v965_v31 }
 0x1e2   :  { %12592 = vmatprep.mubr.msk.f32.mxu0 %vm269_vm2, %v13700_v13  ;;  %12583 = vmatprep.subr.msk.mxu1 %vm269_vm2, %v876_v30  ;;  %v963_v33 = vpop.permute.xlu0 %962 }
 0x1e3   :  { %v1050_v34 = vpop.permute.xlu1 %1049  ;;  %12590 = vmatprep.subr.msk.mxu0 %vm269_vm2, %v963_v33 }
 0x1e4   :  { %12584 = vmatpush3.xpose.msk.msra.mxu1 %vm269_vm2, %v876_v30 }
 0x1e5   :  { %12591 = vmatpush3.xpose.msk.msra.mxu0 %vm269_vm2, %v963_v33  ;;  %12595 = vmatprep.subr.msk.mxu1 %vm269_vm2, %v1052_v32 }
 0x1e6   :  { %v1447_v35 = vpop.permute.xlu0 %1446 }
 0x1e7   :  { %v1360_v36 = vpop.permute.xlu1 %1359  ;;  %12586 = vmatmul.mubr.msk.f32.vlgmr.msra.gmra.mxu1 %vm269_vm2, %v13679_v4 }
 0x1e8   :  { %12593 = vmatmul.mubr.msk.f32.vlgmr.msra.gmra.mxu0 %vm269_vm2, %v13692_v11  ;;  %12596 = vmatpush3.xpose.msk.msra.mxu1 %vm269_vm2, %v1052_v32 }
 0x1e9   :  { %12599 = vmatprep.mubr.msk.f32.mxu1 %vm269_vm2, %v13698_v12  ;;  %12602 = vmatprep.subr.mxu0 %v1360_v36 }
 0x1ea   :  { %12597 = vmatprep.subr.msk.mxu1 %vm269_vm2, %v1050_v34  ;;  %12603 = vmatpush3.msra.mxu0 %v1360_v36  ;;  %v13809_v38 = vpop.permute.xlu0 %1533 }
 0x1eb   :  { %v1358_v37 = vpop.permute.xlu1 %1357 }
 0x1ec   :  { %12598 = vmatpush3.xpose.msk.msra.mxu1 %vm269_vm2, %v1050_v34  ;;  %12604 = vmatprep.subr.mxu0 %v1358_v37 }
 0x1ed   :  { %12605 = vmatpush3.msra.mxu0 %v1358_v37  ;;  %12609 = vmatprep.subr.mxu1 %v1447_v35 }
 0x1ee   :  { %12616 = vmatprep.subr.mxu0 %v13809_v38 }
 0x1ef   :  { %v1445_v39 = vpop.permute.xlu1 %1444  ;;  %12600 = vmatmul.mubr.msk.f32.vlgmr.msra.gmra.mxu1 %vm269_vm2, %v13690_v10 }
 0x1f0   :  { %12610 = vmatpush3.msra.mxu1 %v1447_v35 }
 0x1f1   :  { %12611 = vmatprep.subr.mxu1 %v1445_v39 }
 0x1f2   :  { %12612 = vmatpush3.msra.mxu1 %v1445_v39 }
 0x1f3   :  { %v13814_v40 = vpop.permute.xlu1 %1620 }
 0x1f4   :  { %12623 = vmatprep.subr.mxu1 %v13814_v40 }
 0x23c   :  { %v12538_v43 = vpop.f32.mrf.mxu1 }
 0x23d   :  { %v13828_v45 = vadd.f32 %v12538_v43, %v13820_v42 }
 0x23e   :  { %v344_v46 = vpop.f32.mrf.mxu1 }
 0x23f   :  { %v13831_v47 = vadd.f32 %v344_v46, %v13825_v44  ;;  %v1140_v48 = vsel %vm1136_vm4, %v13828_v45, -inf }
 0x240   :  { %1141 = vmax.xlane.f32.xlu1 %v1140_v48 }
 0x241   :  { %v1137_v50 = vsel %vm1136_vm4, %v13831_v47, -inf }
 0x242   :  { %1138 = vmax.xlane.f32.xlu0 %v1137_v50 }
 0x287   :  { %v12545_v51 = vpop.f32.mrf.mxu1 }
 0x288   :  { %v13838_v52 = vadd.f32 %v12545_v51, %v13820_v42 }
 0x289   :  { %v431_v54 = vpop.f32.mrf.mxu1 }
 0x28a   :  { %v1146_v53 = vsel %vm1136_vm4, %v13838_v52, -inf  ;;  %v13846_v60 = vadd.f32 %v431_v54, %v13825_v44 }
 0x28b   :  { %1147 = vmax.xlane.f32.xlu0 %v1146_v53  ;;  %v13918_v53 = vpop.permute.xlu0 %1531 }
 0x28c   :  { %v1143_v3 = vsel %vm1136_vm4, %v13846_v60, -inf }
 0x28f   :  { %v12552_v55 = vpop.f32.mrf.mxu1 }
 0x290   :  { %v13859_v2 = vadd.f32 %v12552_v55, %v13820_v42 }
 0x291   :  { %v518_v58 = vpop.f32.mrf.mxu1 }
 0x292   :  { %v13854_v63 = vadd.f32 %v518_v58, %v13825_v44  ;;  %v1152_v17 = vsel %vm1136_vm4, %v13859_v2, -inf }
 0x294   :  { %v1149_v8 = vsel %vm1136_vm4, %v13854_v63, -inf }
 0x297   :  { %v12559_v0 = vpop.f32.mrf.mxu1 }
 0x298   :  { %v12566_v56 = vpop.f32.mrf.mxu0  ;;  %v13879_v20 = vadd.f32 %v12559_v0, %v13820_v42 }
 0x299   :  { %v13843_v57 = vadd.f32 %v12566_v56, %v13820_v42  ;;  %v605_v5 = vpop.f32.mrf.mxu1  ;;  %v13925_v56 = vpop.permute.xlu1 %1618 }
 0x29a   :  { %v692_v59 = vpop.f32.mrf.mxu0  ;;  %v13874_v18 = vadd.f32 %v605_v5, %v13825_v44  ;;  %v1158_v30 = vsel %vm1136_vm4, %v13879_v20, -inf }
 0x29b   :  { %v13849_v61 = vadd.f32 %v692_v59, %v13825_v44  ;;  %v1164_v62 = vsel %vm1136_vm4, %v13843_v57, -inf  ;;  %v13931_v59 = vpop.permute.xlu0 %1707 }
 0x29c   :  { %1165 = vmax.xlane.f32.xlu0 %v1164_v62  ;;  %v1155_v26 = vsel %vm1136_vm4, %v13874_v18, -inf }
 0x29d   :  { %v1161_v1 = vsel %vm1136_vm4, %v13849_v61, -inf  ;;  %v13933_v62 = vpop.permute.xlu1 %1794 }
 0x29e   :  { %1162 = vmax.xlane.f32.xlu1 %v1161_v1 }
 0x29f   :  { %v12573_v14 = vpop.f32.mrf.mxu1 }
 0x2a0   :  { %v12580_v4 = vpop.f32.mrf.mxu0  ;;  %1144 = vmax.xlane.f32.xlu0 %v1143_v3  ;;  %v13899_v34 = vadd.f32 %v12573_v14, %v13820_v42 }
 0x2a1   :  { %v13866_v15 = vadd.f32 %v12580_v4, %v13820_v42  ;;  %v779_v21 = vpop.f32.mrf.mxu1  ;;  %v13937_v0 = vpop.permute.xlu1 %1792 }
 0x2a2   :  { %v866_v9 = vpop.f32.mrf.mxu0  ;;  %1150 = vmax.xlane.f32.xlu1 %v1149_v8  ;;  %v13894_v31 = vadd.f32 %v779_v21, %v13825_v44  ;;  %v1170_v48 = vsel %vm1136_vm4, %v13899_v34, -inf }
 0x2a3   :  { %v13869_v16 = vadd.f32 %v866_v9, %v13825_v44  ;;  %v1176_v23 = vsel %vm1136_vm4, %v13866_v15, -inf }
 0x2a4   :  { %1153 = vmax.xlane.f32.xlu0 %v1152_v17  ;;  %v1167_v39 = vsel %vm1136_vm4, %v13894_v31, -inf }
 0x2a5   :  { %v1173_v19 = vsel %vm1136_vm4, %v13869_v16, -inf  ;;  %v13941_v3 = vpop.permute.xlu1 %1966 }
 0x2a6   :  { %1174 = vmax.xlane.f32.xlu1 %v1173_v19 }
 0x2a7   :  { %v12587_v25 = vpop.f32.mrf.mxu1 }
 0x2a8   :  { %v12594_v24 = vpop.f32.mrf.mxu0  ;;  %1177 = vmax.xlane.f32.xlu0 %v1176_v23  ;;  %v13909_v46 = vadd.f32 %v12587_v25, %v13820_v42 }
 0x2a9   :  { %v13886_v28 = vadd.f32 %v12594_v24, %v13820_v42  ;;  %v953_v32 = vpop.f32.mrf.mxu1  ;;  %v13947_v5 = vpop.permute.xlu1 %1968 }
 0x2aa   :  { %v1040_v27 = vpop.f32.mrf.mxu0  ;;  %1156 = vmax.xlane.f32.xlu1 %v1155_v26  ;;  %v13904_v37 = vadd.f32 %v953_v32, %v13825_v44  ;;  %v1182_v55 = vsel %vm1136_vm4, %v13909_v46, -inf }
 0x2ab   :  { %v13889_v29 = vadd.f32 %v1040_v27, %v13825_v44  ;;  %v1188_v36 = vsel %vm1136_vm4, %v13886_v28, -inf }
 0x2ac   :  { %1159 = vmax.xlane.f32.xlu0 %v1158_v30  ;;  %v1179_v51 = vsel %vm1136_vm4, %v13904_v37, -inf }
 0x2ad   :  { %v1185_v33 = vsel %vm1136_vm4, %v13889_v29, -inf }
 0x2ae   :  { %1186 = vmax.xlane.f32.xlu1 %v1185_v33 }
 0x2af   :  { %v12601_v35 = vpop.f32.mrf.mxu1 }
 0x2b0   :  { %1189 = vmax.xlane.f32.xlu0 %v1188_v36  ;;  %v13921_v54 = vadd.f32 %v12601_v35, %v13820_v42  ;;  %v13935_v42 = vpop.permute.xlu0 %1705 }
 0x2b1   :  { %v1127_v43 = vpop.f32.mrf.mxu1 }
 0x2b2   :  { %1168 = vmax.xlane.f32.xlu1 %v1167_v39  ;;  %v13914_v50 = vadd.f32 %v1127_v43, %v13825_v44  ;;  %v1194_v44 = vsel %vm1136_vm4, %v13921_v54, -inf }
 0x2b4   :  { %1171 = vmax.xlane.f32.xlu0 %v1170_v48  ;;  %v1191_v58 = vsel %vm1136_vm4, %v13914_v50, -inf  ;;  %v13939_v1 = vpop.permute.xlu0 %1881 }
 0x2b6   :  { %1180 = vmax.xlane.f32.xlu1 %v1179_v51 }
 0x2b8   :  { %1183 = vmax.xlane.f32.xlu0 %v1182_v55  ;;  %v13945_v4 = vpop.permute.xlu0 %1879 }
 0x2ba   :  { %1192 = vmax.xlane.f32.xlu1 %v1191_v58 }
 0x2bc   :  { %1195 = vmax.xlane.f32.xlu0 %v1194_v44 }
 0x2c9   :  { %v1142_v9 = vpop.xlane.xlu1 %1141 }
 0x2ca   :  { %v1198_v17 = vsub.f32 %v13828_v45, %v1142_v9 }
 0x2cb   :  { %2142 = vrot.lane.b32.xlu1 %v13690_v10, %s16879_s25  ;;  %v1139_v8 = vpop.xlane.xlu0 %1138 }
 0x2cc   :  { %v1197_v14 = vsub.f32 %v13831_v47, %v1139_v8  ;;  %v1219_v21 = vmul.f32 1.442695, %v1198_v17 }
 0x2ce   :  { %v1217_v19 = vmul.f32 1.442695, %v1197_v14 }
 0x2d0   :  { %13135 = vpow2.f32 %v1217_v19 }
 0x2d1   :  { %13137 = vpow2.f32 %v1219_v21 }
 0x2d2   :  { %2055 = vrot.lane.b32.xlu0 %v13692_v11, %s16879_s25 }
 0x2dd   :  { %v13953_v23 = vpop.eup %13135 }
 0x2de   :  { %v13955_v10 = vpop.eup %13137  ;;  %v1257_v24 = vsel %vm1136_vm4, %v13953_v23, 0.0 }
 0x2df   :  { %v1260_v11 = vsel %vm1136_vm4, %v13955_v10, 0.0 }
 0x2ef   :  { %1258 = vadd.xlane.f32.xlu1 %v1257_v24 }
 0x2f1   :  { %1261 = vadd.xlane.f32.xlu0 %v1260_v11 }
 0x314   :  { %v1148_v25 = vpop.xlane.xlu0 %1147 }
 0x315   :  { %v1200_v47 = vsub.f32 %v13838_v52, %v1148_v25 }
 0x317   :  { %v1223_v45 = vmul.f32 1.442695, %v1200_v47 }
 0x319   :  { %13139 = vpow2.f32 %v1223_v45 }
 0x325   :  { %v1166_v26 = vpop.xlane.xlu0 %1165 }
 0x326   :  { %v13962_v27 = vpop.eup %13139  ;;  %v1206_v30 = vsub.f32 %v13843_v57, %v1166_v26 }
 0x327   :  { %v1163_v32 = vpop.xlane.xlu1 %1162  ;;  %v1266_v33 = vsel %vm1136_vm4, %v13962_v27, 0.0 }
 0x328   :  { %v1235_v35 = vmul.f32 1.442695, %v1206_v30  ;;  %v1205_v36 = vsub.f32 %v13849_v61, %v1163_v32  ;;  %1267 = vadd.xlane.f32.xlu0 %v1266_v33 }
 0x329   :  { %v1145_v39 = vpop.xlane.xlu0 %1144 }
 0x32a   :  { %13141 = vpow2.f32 %v1235_v35  ;;  %v1199_v43 = vsub.f32 %v13846_v60, %v1145_v39  ;;  %v1233_v52 = vmul.f32 1.442695, %v1205_v36 }
 0x32b   :  { %v1151_v48 = vpop.xlane.xlu1 %1150 }
 0x32c   :  { %v1221_v51 = vmul.f32 1.442695, %v1199_v43  ;;  %v1201_v55 = vsub.f32 %v13854_v63, %v1151_v48 }
 0x32d   :  { %v1154_v58 = vpop.xlane.xlu0 %1153 }
 0x32e   :  { %13143 = vpow2.f32 %v1221_v51  ;;  %v1202_v57 = vsub.f32 %v13859_v2, %v1154_v58  ;;  %v1225_v44 = vmul.f32 1.442695, %v1201_v55 }
 0x32f   :  { %13145 = vpow2.f32 %v1233_v52  ;;  %v1175_v8 = vpop.xlane.xlu1 %1174 }
 0x330   :  { %v1227_v9 = vmul.f32 1.442695, %v1202_v57  ;;  %v1209_v61 = vsub.f32 %v13869_v16, %v1175_v8 }
 0x331   :  { %v1178_v14 = vpop.xlane.xlu0 %1177 }
 0x332   :  { %13147 = vpow2.f32 %v1227_v9  ;;  %v1210_v17 = vsub.f32 %v13866_v15, %v1178_v14  ;;  %v1241_v60 = vmul.f32 1.442695, %v1209_v61 }
 0x333   :  { %13149 = vpow2.f32 %v1225_v44  ;;  %v1157_v19 = vpop.xlane.xlu1 %1156 }
 0x334   :  { %v1243_v21 = vmul.f32 1.442695, %v1210_v17  ;;  %v1203_v63 = vsub.f32 %v13874_v18, %v1157_v19 }
 0x335   :  { %v1160_v24 = vpop.xlane.xlu0 %1159 }
 0x336   :  { %13151 = vpow2.f32 %v1243_v21  ;;  %v1204_v2 = vsub.f32 %v13879_v20, %v1160_v24  ;;  %v1229_v25 = vmul.f32 1.442695, %v1203_v63 }
 0x337   :  { %v13975_v11 = vpop.eup %13141  ;;  %13153 = vpow2.f32 %v1241_v60  ;;  %v1187_v47 = vpop.xlane.xlu1 %1186 }
 0x338   :  { %v1231_v16 = vmul.f32 1.442695, %v1204_v2  ;;  %v1213_v45 = vsub.f32 %v13889_v29, %v1187_v47  ;;  %v1284_v15 = vsel %vm1136_vm4, %v13975_v11, 0.0 }
 0x339   :  { %1285 = vadd.xlane.f32.xlu0 %v1284_v15  ;;  %v1190_v26 = vpop.xlane.xlu0 %1189 }
 0x33a   :  { %13155 = vpow2.f32 %v1231_v16  ;;  %v1214_v18 = vsub.f32 %v13886_v28, %v1190_v26  ;;  %v1249_v33 = vmul.f32 1.442695, %v1213_v45 }
 0x33b   :  { %v13981_v30 = vpop.eup %13143  ;;  %13157 = vpow2.f32 %v1229_v25  ;;  %v1169_v20 = vpop.xlane.xlu1 %1168 }
 0x33c   :  { %v13983_v32 = vpop.eup %13145  ;;  %v1251_v35 = vmul.f32 1.442695, %v1214_v18  ;;  %v1207_v36 = vsub.f32 %v13894_v31, %v1169_v20  ;;  %v1263_v29 = vsel %vm1136_vm4, %v13981_v30, 0.0 }
 0x33d   :  { %1264 = vadd.xlane.f32.xlu1 %v1263_v29  ;;  %v1172_v39 = vpop.xlane.xlu0 %1171  ;;  %v1281_v51 = vsel %vm1136_vm4, %v13983_v32, 0.0 }
 0x33e   :  { %13159 = vpow2.f32 %v1251_v35  ;;  %v1208_v43 = vsub.f32 %v13899_v34, %v1172_v39  ;;  %v1237_v28 = vmul.f32 1.442695, %v1207_v36 }
 0x33f   :  { %v13989_v52 = vpop.eup %13147  ;;  %v1181_v48 = vpop.xlane.xlu1 %1180  ;;  %13161 = vpow2.f32 %v1249_v33 }
 0x340   :  { %v13993_v55 = vpop.eup %13149  ;;  %v1239_v58 = vmul.f32 1.442695, %v1208_v43  ;;  %v1211_v31 = vsub.f32 %v13904_v37, %v1181_v48  ;;  %v1272_v57 = vsel %vm1136_vm4, %v13989_v52, 0.0 }
 0x341   :  { %1282 = vadd.xlane.f32.xlu1 %v1281_v51  ;;  %1273 = vadd.xlane.f32.xlu0 %v1272_v57  ;;  %v1184_v44 = vpop.xlane.xlu0 %1183  ;;  %v1269_v61 = vsel %vm1136_vm4, %v13993_v55, 0.0 }
 0x342   :  { %13163 = vpow2.f32 %v1239_v58  ;;  %v1212_v34 = vsub.f32 %v13909_v46, %v1184_v44  ;;  %v1245_v17 = vmul.f32 1.442695, %v1211_v31 }
 0x343   :  { %v13999_v8 = vpop.eup %13151  ;;  %13165 = vpow2.f32 %v1237_v28  ;;  %v1193_v9 = vpop.xlane.xlu1 %1192 }
 0x344   :  { %v14003_v14 = vpop.eup %13153  ;;  %v1247_v37 = vmul.f32 1.442695, %v1212_v34  ;;  %v1215_v60 = vsub.f32 %v13914_v50, %v1193_v9  ;;  %v1296_v19 = vsel %vm1136_vm4, %v13999_v8, 0.0 }
 0x345   :  { %1270 = vadd.xlane.f32.xlu1 %v1269_v61  ;;  %1297 = vadd.xlane.f32.xlu0 %v1296_v19  ;;  %v1196_v21 = vpop.xlane.xlu0 %1195  ;;  %v1293_v24 = vsel %vm1136_vm4, %v14003_v14, 0.0 }
 0x346   :  { %13167 = vpow2.f32 %v1247_v37  ;;  %v1216_v46 = vsub.f32 %v13921_v54, %v1196_v21  ;;  %v1253_v25 = vmul.f32 1.442695, %v1215_v60 }
 0x347   :  { %v14009_v63 = vpop.eup %13155  ;;  %13169 = vpow2.f32 %v1245_v17  ;;  %v14055_v31 = vpop.permute.xlu1 %2142 }
 0x348   :  { %v14013_v2 = vpop.eup %13157  ;;  %v1255_v47 = vmul.f32 1.442695, %v1216_v46  ;;  %v1278_v50 = vsel %vm1136_vm4, %v14009_v63, 0.0 }
 0x349   :  { %1294 = vadd.xlane.f32.xlu1 %v1293_v24  ;;  %1279 = vadd.xlane.f32.xlu0 %v1278_v50  ;;  %v1275_v54 = vsel %vm1136_vm4, %v14013_v2, 0.0  ;;  %v14057_v57 = vpop.permute.xlu0 %2055 }
 0x34a   :  { %13171 = vpow2.f32 %v1255_v47 }
 0x34b   :  { %v14017_v16 = vpop.eup %13159  ;;  %13173 = vpow2.f32 %v1253_v25 }
 0x34c   :  { %v1308_v45 = vsel %vm1136_vm4, %v14017_v16, 0.0  ;;  %v14023_v15 = vpop.eup %13161 }
 0x34d   :  { %1276 = vadd.xlane.f32.xlu1 %v1275_v54  ;;  %1309 = vadd.xlane.f32.xlu0 %v1308_v45  ;;  %v1305_v20 = vsel %vm1136_vm4, %v14023_v15, 0.0 }
 0x34f   :  { %v14025_v26 = vpop.eup %13163 }
 0x350   :  { %v14027_v18 = vpop.eup %13165  ;;  %v1290_v33 = vsel %vm1136_vm4, %v14025_v26, 0.0 }
 0x351   :  { %1306 = vadd.xlane.f32.xlu1 %v1305_v20  ;;  %1291 = vadd.xlane.f32.xlu0 %v1290_v33  ;;  %v1287_v36 = vsel %vm1136_vm4, %v14027_v18, 0.0 }
 0x353   :  { %v14033_v35 = vpop.eup %13167 }
 0x354   :  { %v1302_v29 = vsel %vm1136_vm4, %v14033_v35, 0.0  ;;  %v14039_v39 = vpop.eup %13169 }
 0x355   :  { %1288 = vadd.xlane.f32.xlu1 %v1287_v36  ;;  %1303 = vadd.xlane.f32.xlu0 %v1302_v29  ;;  %v1299_v28 = vsel %vm1136_vm4, %v14039_v39, 0.0 }
 0x357   :  { %v14041_v43 = vpop.eup %13171 }
 0x358   :  { %v1314_v48 = vsel %vm1136_vm4, %v14041_v43, 0.0  ;;  %v14047_v51 = vpop.eup %13173 }
 0x359   :  { %1300 = vadd.xlane.f32.xlu1 %v1299_v28  ;;  %1315 = vadd.xlane.f32.xlu0 %v1314_v48  ;;  %v1311_v58 = vsel %vm1136_vm4, %v14047_v51, 0.0 }
 0x35d   :  { %1312 = vadd.xlane.f32.xlu1 %v1311_v58 }
 0x36e   :  { %2140 = vrot.lane.b32.xlu1 %v13698_v12, %s16879_s25 }
 0x36f   :  { %2053 = vrot.lane.b32.xlu0 %v13700_v13, %s16879_s25  ;;  %s16934_s25 = smov 42  }
 0x378   :  { %v1259_v44 = vpop.xlane.xlu1 %1258 }
 0x379   :  { %13175 = vrcp.f32 %v1259_v44 }
 0x37a   :  { %v1262_v34 = vpop.xlane.xlu0 %1261 }
 0x37b   :  { %13177 = vrcp.f32 %v1262_v34 }
 0x386   :  { %v13176_v9 = vpop.eup %13175 }
 0x387   :  { %v1337_v61 = vmul.f32 %v13176_v9, %v13953_v23 }
 0x388   :  { %v13178_v17 = vpop.eup %13177 }
 0x389   :  { %12606 = vmatprep.mubr.msk.f32.mxu0 %vm1136_vm4, %v1337_v61  ;;  %v1338_v37 = vmul.f32 %v13178_v17, %v13955_v10 }
 0x38b   :  { %12607 = vmatmul.mubr.msk.f32.vlgmr.msra.gmra.mxu0 %vm1136_vm4, %v1338_v37 }
 0x38c   :  { %12617 = vmatpush3.msra.mxu0 %v13809_v38 }
 0x38d   :  { %12618 = vmatprep.subr.mxu0 %v13918_v53 }
 0x38e   :  { %12619 = vmatpush3.msra.mxu0 %v13918_v53 }
 0x38f   :  { %12630 = vmatprep.subr.mxu0 %v13931_v59 }
 0x3b1   :  { %v1268_v12 = vpop.xlane.xlu0 %1267 }
 0x3b2   :  { %13179 = vrcp.f32 %v1268_v12 }
 0x3bf   :  { %v13180_v24 = vpop.eup %13179 }
 0x3c0   :  { %v1340_v54 = vmul.f32 %v13180_v24, %v13962_v27 }
 0x3c2   :  { %v1286_v13 = vpop.xlane.xlu0 %1285 }
 0x3c6   :  { %v1265_v60 = vpop.xlane.xlu1 %1264 }
 0x3c7   :  { %13181 = vrcp.f32 %v1265_v60 }
 0x3ca   :  { %v1283_v23 = vpop.xlane.xlu1 %1282  ;;  %v1274_v19 = vpop.xlane.xlu0 %1273 }
 0x3cb   :  { %13183 = vrcp.f32 %v1283_v23  ;;  %v2332_v23 = vld [vmem:[%s16866_s4 + $0x38] sm:$0xf] }
 0x3cc   :  { %13185 = vrcp.f32 %v1274_v19 }
 0x3ce   :  { %v1271_v10 = vpop.xlane.xlu1 %1270  ;;  %v1298_v21 = vpop.xlane.xlu0 %1297 }
 0x3cf   :  { %13187 = vrcp.f32 %v1271_v10  ;;  %v2331_v10 = vld [vmem:[%s16866_s4 + $0x30] sm:$0xff] }
 0x3d0   :  { %13189 = vrcp.f32 %v1286_v13 }
 0x3d2   :  { %v1295_v38 = vpop.xlane.xlu1 %1294  ;;  %v1280_v46 = vpop.xlane.xlu0 %1279 }
 0x3d3   :  { %13191 = vrcp.f32 %v1295_v38 }
 0x3d4   :  { %v13182_v53 = vpop.eup %13181  ;;  %13193 = vrcp.f32 %v1298_v21 }
 0x3d5   :  { %v1339_v25 = vmul.f32 %v13182_v53, %v13981_v30  ;;  %13195 = vrcp.f32 %v1280_v46  ;;  %v2330_v46 = vld [vmem:[%s16866_s4 + $0x28] sm:$0xff] }
 0x3d6   :  { %v1277_v47 = vpop.xlane.xlu1 %1276  ;;  %v1310_v50 = vpop.xlane.xlu0 %1309 }
 0x3d7   :  { %13197 = vrcp.f32 %v1277_v47  ;;  %12613 = vmatprep.mubr.msk.f32.mxu1 %vm1136_vm4, %v1339_v25  ;;  %v2329_v25 = vld [vmem:[%s16866_s4 + $0x20] sm:$0xff] }
 0x3d8   :  { %12614 = vmatmul.mubr.msk.f32.vlgmr.msra.gmra.mxu1 %vm1136_vm4, %v1340_v54  ;;  %v13184_v45 = vpop.eup %13183 }
 0x3d9   :  { %12624 = vmatpush3.msra.mxu1 %v13814_v40  ;;  %v13186_v36 = vpop.eup %13185  ;;  %v1345_v58 = vmul.f32 %v13184_v45, %v13983_v32  ;;  %v2327_v45 = vld [vmem:[%s16866_s4 + $0x10] sm:$0xff] }
 0x3da   :  { %12625 = vmatprep.subr.mxu1 %v13925_v56  ;;  %v1307_v20 = vpop.xlane.xlu1 %1306  ;;  %v1292_v33 = vpop.xlane.xlu0 %1291  ;;  %v1342_v40 = vmul.f32 %v13186_v36, %v13989_v52 }
 0x3db   :  { %13199 = vrcp.f32 %v1307_v20  ;;  %12626 = vmatpush3.msra.mxu1 %v13925_v56 }
 0x3dc   :  { %v13188_v30 = vpop.eup %13187  ;;  %13201 = vrcp.f32 %v1310_v50  ;;  %12637 = vmatprep.subr.mxu1 %v13933_v62  ;;  %v2328_v50 = vld [vmem:[%s16866_s4 + $0x18] sm:$0xff] }
 0x3dd   :  { %v1341_v27 = vmul.f32 %v13188_v30, %v13993_v55  ;;  %13203 = vrcp.f32 %v1292_v33  ;;  %v13190_v48 = vpop.eup %13189  ;;  %v2326_v33 = vld [vmem:[%s16866_s4 + $0x8] sm:$0xff] }
 0x3de   :  { %v1289_v29 = vpop.xlane.xlu1 %1288  ;;  %v1304_v28 = vpop.xlane.xlu0 %1303  ;;  %v1346_v52 = vmul.f32 %v13190_v48, %v13975_v11 }
 0x3df   :  { %13205 = vrcp.f32 %v1289_v29  ;;  %12620 = vmatprep.mubr.msk.f32.mxu0 %vm1136_vm4, %v1341_v27  ;;  %v2325_v27 = vld [vmem:[%s16866_s4] sm:$0xff] }
 0x3e0   :  { %v13192_v44 = vpop.eup %13191  ;;  %12621 = vmatmul.mubr.msk.f32.vlgmr.msra.gmra.mxu0 %vm1136_vm4, %v1342_v40  ;;  %13207 = vrcp.f32 %v1304_v28 }
 0x3e1   :  { %12631 = vmatpush3.msra.mxu0 %v13931_v59  ;;  %12634 = vmatprep.mubr.msk.f32.mxu0 %vm1136_vm4, %v1345_v58  ;;  %v13194_v56 = vpop.eup %13193  ;;  %v1349_v32 = vmul.f32 %v13192_v44, %v14003_v14 }
 0x3e2   :  { %12632 = vmatprep.subr.mxu0 %v13935_v42  ;;  %v1301_v55 = vpop.xlane.xlu1 %1300  ;;  %v13196_v34 = vpop.eup %13195  ;;  %v1350_v14 = vmul.f32 %v13194_v56, %v13999_v8 }
 0x3e3   :  { %13209 = vrcp.f32 %v1301_v55  ;;  %12633 = vmatpush3.msra.mxu0 %v13935_v42  ;;  %v1316_v9 = vpop.xlane.xlu0 %1315  ;;  %v1344_v42 = vmul.f32 %v13196_v34, %v14009_v63 }
 0x3e4   :  { %v13198_v61 = vpop.eup %13197  ;;  %12644 = vmatprep.subr.mxu0 %v13939_v1  ;;  %12635 = vmatmul.mubr.msk.f32.vlgmr.msra.gmra.mxu0 %vm1136_vm4, %v1346_v52  ;;  %13211 = vrcp.f32 %v1316_v9 }
 0x3e5   :  { %12645 = vmatpush3.msra.mxu0 %v13939_v1  ;;  %12648 = vmatprep.mubr.msk.f32.mxu0 %vm1136_vm4, %v1349_v32  ;;  %v1343_v59 = vmul.f32 %v13198_v61, %v14013_v2 }
 0x3e6   :  { %12646 = vmatprep.subr.mxu0 %v13945_v4  ;;  %v1313_v11 = vpop.xlane.xlu1 %1312 }
 0x3e7   :  { %13213 = vrcp.f32 %v1313_v11  ;;  %12647 = vmatpush3.msra.mxu0 %v13945_v4  ;;  %12627 = vmatprep.mubr.msk.f32.mxu1 %vm1136_vm4, %v1343_v59  ;;  %v2054_v63 = vpop.permute.xlu0 %2053 }
 0x3e8   :  { %v13200_v17 = vpop.eup %13199  ;;  %12658 = vmatprep.subr.mxu0 %v14057_v57  ;;  %12628 = vmatmul.mubr.msk.f32.vlgmr.msra.gmra.mxu1 %vm1136_vm4, %v1344_v42 }
 0x3e9   :  { %v13202_v1 = vpop.eup %13201  ;;  %12638 = vmatpush3.msra.mxu1 %v13933_v62  ;;  %12649 = vmatmul.mubr.msk.f32.vlgmr.msra.gmra.mxu0 %vm1136_vm4, %v1350_v14  ;;  %v1353_v2 = vmul.f32 %v13200_v17, %v14023_v15 }
 0x3ea   :  { %12659 = vmatpush3.msra.mxu0 %v14057_v57  ;;  %12639 = vmatprep.subr.mxu1 %v13937_v0  ;;  %v13204_v4 = vpop.eup %13203  ;;  %v1354_v37 = vmul.f32 %v13202_v1, %v14017_v16 }
 0x3eb   :  { %12660 = vmatprep.subr.mxu0 %v2054_v63  ;;  %12640 = vmatpush3.msra.mxu1 %v13937_v0  ;;  %v1348_v15 = vmul.f32 %v13204_v4, %v14025_v26 }
 0x3ec   :  { %v13206_v8 = vpop.eup %13205  ;;  %12661 = vmatpush3.msra.mxu0 %v2054_v63  ;;  %12651 = vmatprep.subr.mxu1 %v13947_v5 }
 0x3ed   :  { %12662 = vmatprep.mubr.msk.f32.mxu0 %vm1136_vm4, %v1353_v2  ;;  %v1347_v62 = vmul.f32 %v13206_v8, %v14027_v18  ;;  %v13208_v57 = vpop.eup %13207  ;;  %v2141_v18 = vpop.permute.xlu1 %2140  ;;  %12672 = vmatprep.subr.msk.mxu0 %vm134_vm0, %v2332_v23 }
 0x3ee   :  { %12663 = vmatmul.mubr.msk.f32.vlgmr.msra.gmra.mxu0 %vm1136_vm4, %v1354_v37  ;;  %v1352_v16 = vmul.f32 %v13208_v57, %v14033_v35 }
 0x3ef   :  { %12641 = vmatprep.mubr.msk.f32.mxu1 %vm1136_vm4, %v1347_v62  ;;  %12673 = vmatpush3.msk.msra.mxu0 %vm134_vm0, %v2332_v23 }
 0x3f0   :  { %v13210_v12 = vpop.eup %13209  ;;  %12642 = vmatmul.mubr.msk.f32.vlgmr.msra.gmra.mxu1 %vm1136_vm4, %v1348_v15  ;;  %12674 = vmatprep.subr.mxu0 %v2331_v10 }
 0x3f1   :  { %12652 = vmatpush3.msra.mxu1 %v13947_v5  ;;  %v1351_v0 = vmul.f32 %v13210_v12, %v14039_v39  ;;  %v13212_v13 = vpop.eup %13211  ;;  %12675 = vmatpush3.msra.mxu0 %v2331_v10 }
 0x3f2   :  { %12653 = vmatprep.subr.mxu1 %v13941_v3  ;;  %v1356_v39 = vmul.f32 %v13212_v13, %v14041_v43  ;;  %12676 = vmatprep.subr.mxu0 %v2330_v46 }
 0x3f3   :  { %12654 = vmatpush3.msra.mxu1 %v13941_v3  ;;  %12655 = vmatprep.mubr.msk.f32.mxu1 %vm1136_vm4, %v1351_v0 }
 0x3f4   :  { %v13214_v26 = vpop.eup %13213  ;;  %12665 = vmatprep.subr.mxu1 %v14055_v31  ;;  %12656 = vmatmul.mubr.msk.f32.vlgmr.msra.gmra.mxu1 %vm1136_vm4, %v1352_v16 }
 0x3f5   :  { %12666 = vmatpush3.msra.mxu1 %v14055_v31  ;;  %v1355_v5 = vmul.f32 %v13214_v26, %v14047_v51  ;;  %12677 = vmatpush3.msra.mxu0 %v2330_v46 }
 0x3f6   :  { %12667 = vmatprep.subr.mxu1 %v2141_v18  ;;  %12678 = vmatprep.subr.mxu0 %v2329_v25 }
 0x3f7   :  { %12668 = vmatpush3.msra.mxu1 %v2141_v18  ;;  %12669 = vmatprep.mubr.msk.f32.mxu1 %vm1136_vm4, %v1355_v5 }
 0x3f8   :  { %12670 = vmatmul.mubr.msk.f32.vlgmr.msra.gmra.mxu1 %vm1136_vm4, %v1356_v39  ;;  %12679 = vmatpush3.msra.mxu0 %v2329_v25 }
 0x3f9   :  { %12680 = vmatprep.subr.mxu0 %v2328_v50 }
 0x3fa   :  { %12681 = vmatpush3.msra.mxu0 %v2328_v50 }
 0x3fb   :  { %12682 = vmatprep.subr.mxu0 %v2327_v45 }
 0x3fc   :  { %12683 = vmatpush3.msra.mxu0 %v2327_v45 }
 0x3fd   :  { %12684 = vmatprep.subr.mxu0 %v2326_v33 }
 0x3fe   :  { %12685 = vmatpush3.msra.mxu0 %v2326_v33 }
 0x3ff   :  { %12686 = vmatprep.subr.mxu0 %v2325_v27 }
 0x400   :  { %12687 = vmatpush3.msra.mxu0 %v2325_v27  ;;  %v13361_v27 = vld [vmem:[%s16862_s0 + $0xc] sm:$0x3] }
 0x44b   :  { %v14126_v35 = vpop.f32.mrf.mxu0 }
 0x44d   :  { %v14129_v31 = vpop.f32.mrf.mxu0 }
 0x498   :  { %v12615_v3 = vpop.f32.mrf.mxu1 }
 0x499   :  { %2231 = vrot.lane.b32.xlu1 %v12615_v3, %s16877_s30 }
 0x49a   :  { %v1522_v60 = vpop.f32.mrf.mxu1 }
 0x49b   :  { %2229 = vrot.lane.b32.xlu0 %v1522_v60, %s16877_s30  ;;  %s16929_s30 = smov 12  }
 0x4a0   :  { %v12622_v51 = vpop.f32.mrf.mxu0 }
 0x4a1   :  { %2239 = vrot.lane.b32.xlu1 %v12622_v51, %s16881_s26 }
 0x4a2   :  { %v1609_v43 = vpop.f32.mrf.mxu0 }
 0x4a3   :  { %2237 = vrot.lane.b32.xlu0 %v1609_v43, %s16881_s26  ;;  %s16889_s26 = smov 18   ;;  %v11149_v43 = vld [vmem:[%s16867_s5] ss:$0 sm:$0xff] }
 0x4a4   :  { %v12636_v19 = vpop.f32.mrf.mxu0 }
 0x4a5   :  { %2255 = vrot.lane.b32.xlu1 %v12636_v19, %s16885_s29 }
 0x4a6   :  { %v1783_v21 = vpop.f32.mrf.mxu0 }
 0x4a7   :  { %2253 = vrot.lane.b32.xlu0 %v1783_v21, %s16885_s29  ;;  %s16893_s29 = smov 48  }
 0x4a8   :  { %v12629_v38 = vpop.f32.mrf.mxu1 }
 0x4a9   :  { %v12650_v24 = vpop.f32.mrf.mxu0  ;;  %2247 = vrot.lane.b32.xlu1 %v12629_v38, %s16889_s26 }
 0x4aa   :  { %v1696_v53 = vpop.f32.mrf.mxu1 }
 0x4ab   :  { %v1957_v47 = vpop.f32.mrf.mxu0  ;;  %2245 = vrot.lane.b32.xlu0 %v1696_v53, %s16889_s26 }
 0x4ad   :  { %2271 = vrot.lane.b32.xlu1 %v12650_v24, %s16897_s27 }
 0x4ae   :  { %v12664_v54 = vpop.f32.mrf.mxu0 }
 0x4af   :  { %2269 = vrot.lane.b32.xlu0 %v1957_v47, %s16897_s27 }
 0x4b0   :  { %v12643_v20 = vpop.f32.mrf.mxu1  ;;  %v2131_v36 = vpop.f32.mrf.mxu0 }
 0x4b1   :  { %2287 = vrot.lane.b32.xlu1 %v12664_v54, %s16893_s29  ;;  %v13359_v54 = vld [vmem:[%s16862_s0 + $0x8] sm:$0x3] }
 0x4b2   :  { %v1870_v30 = vpop.f32.mrf.mxu1 }
 0x4b3   :  { %2285 = vrot.lane.b32.xlu0 %v2131_v36, %s16893_s29  ;;  %s16930_s29 = smov 18  }
 0x4b4   :  { %v12657_v29 = vpop.f32.mrf.mxu1 }
 0x4b5   :  { %2263 = vrot.lane.b32.xlu1 %v12643_v20, %s16899_s22  ;;  %v13360_v20 = vld [vmem:[%s16862_s0 + $0xa] sm:$0x3] }
 0x4b6   :  { %v2044_v28 = vpop.f32.mrf.mxu1 }
 0x4b7   :  { %2261 = vrot.lane.b32.xlu0 %v1870_v30, %s16899_s22 }
 0x4b8   :  { %v12671_v40 = vpop.f32.mrf.mxu1 }
 0x4b9   :  { %2279 = vrot.lane.b32.xlu1 %v12657_v29, %s16895_s28 }
 0x4ba   :  { %v2218_v48 = vpop.f32.mrf.mxu1 }
 0x4bb   :  { %2277 = vrot.lane.b32.xlu0 %v2044_v28, %s16895_s28  ;;  %v13362_v28 = vld [vmem:[%s16862_s0 + $0xe] sm:$0x3] }
 0x4bd   :  { %2295 = vrot.lane.b32.xlu1 %v12671_v40, %s16891_s24 }
 0x4bf   :  { %2293 = vrot.lane.b32.xlu0 %v2218_v48, %s16891_s24 }
 0x50b   :  { %v2232_v58 = vpop.permute.xlu1 %2231 }
 0x50c   :  { %v2300_v14 = vsel %vm269_vm2, %v14126_v35, %v2232_v58 }
 0x50d   :  { %v2230_v44 = vpop.permute.xlu0 %2229 }
 0x50e   :  { %v2299_v42 = vsel %vm269_vm2, %v14129_v31, %v2230_v44  ;;  %v13363_v44 = vld [vmem:[%s16862_s0] sm:$0x3] }
 0x513   :  { %v2240_v56 = vpop.permute.xlu1 %2239 }
 0x514   :  { %v2303_v2 = vsel %vm2301_vm5, %v2300_v14, %v2240_v56 }
 0x515   :  { %v2238_v55 = vpop.permute.xlu0 %2237 }
 0x516   :  { %v2302_v17 = vsel %vm2301_vm5, %v2299_v42, %v2238_v55  ;;  %v13364_v55 = vld [vmem:[%s16862_s0 + $0x2] sm:$0x3] }
 0x517   :  { %v2256_v52 = vpop.permute.xlu1 %2255 }
 0x519   :  { %v2254_v34 = vpop.permute.xlu0 %2253 }
 0x51b   :  { %v2248_v9 = vpop.permute.xlu1 %2247 }
 0x51c   :  { %v2306_v4 = vsel %vm2304_vm6, %v2303_v2, %v2248_v9 }
 0x51d   :  { %v2246_v32 = vpop.permute.xlu0 %2245  ;;  %v2309_v15 = vsel %vm2307_vm7, %v2306_v4, %v2256_v52 }
 0x51e   :  { %v2305_v63 = vsel %vm2304_vm6, %v2302_v17, %v2246_v32  ;;  %v13366_v32 = vld [vmem:[%s16862_s0 + $0x6] sm:$0x3] }
 0x51f   :  { %v2272_v61 = vpop.permute.xlu1 %2271  ;;  %v2308_v37 = vsel %vm2307_vm7, %v2305_v63, %v2254_v34  ;;  %v13365_v34 = vld [vmem:[%s16862_s0 + $0x4] sm:$0x3] }
 0x521   :  { %v2270_v59 = vpop.permute.xlu0 %2269 }
 0x523   :  { %v2288_v11 = vpop.permute.xlu1 %2287 }
 0x525   :  { %v2286_v1 = vpop.permute.xlu0 %2285 }
 0x527   :  { %v2264_v8 = vpop.permute.xlu1 %2263 }
 0x528   :  { %v2312_v12 = vsel %vm2310_vm8, %v2309_v15, %v2264_v8 }
 0x529   :  { %v2262_v62 = vpop.permute.xlu0 %2261  ;;  %v2315_v26 = vsel %vm2313_vm9, %v2312_v12, %v2272_v61 }
 0x52a   :  { %v2311_v57 = vsel %vm2310_vm8, %v2308_v37, %v2262_v62  ;;  %v13413_v62 = vmov 269488144  }
 0x52b   :  { %v2280_v0 = vpop.permute.xlu1 %2279  ;;  %v2314_v16 = vsel %vm2313_vm9, %v2311_v57, %v2270_v59  ;;  %v2534_v15 = vunpack.c.l.s4 %v13413_v62  ;;  %v13414_v57 = vmov 842150450  }
 0x52c   :  { %v2318_v5 = vsel %vm2316_vm10, %v2315_v26, %v2280_v0  ;;  %v2541_v12 = vunpack.c.l.s4 %v13414_v57  ;;  %v13415_v0 = vmov 1414812756  }
 0x52d   :  { %v2278_v13 = vpop.permute.xlu0 %2277  ;;  %v2321_v60 = vsel %vm2319_vm11, %v2318_v5, %v2288_v11 }
 0x52e   :  { %v2317_v18 = vsel %vm2316_vm10, %v2314_v16, %v2278_v13  ;;  %v2548_v16 = vunpack.c.l.s4 %v13415_v0  ;;  %v13416_v13 = vmov 1987475062   ;;  %v2542_v5 = vunpack.c.0.s8 %v2541_v12  ;;  %v2888_v12 = vld [vmem:[%s16870_s8 + $0x100] sm:$0xff] }
 0x52f   :  { %v2296_v39 = vpop.permute.xlu1 %2295  ;;  %v2320_v3 = vsel %vm2319_vm11, %v2317_v18, %v2286_v1  ;;  %v2555_v26 = vunpack.c.l.s4 %v13416_v13  ;;  %v2535_v18 = vunpack.c.0.s8 %v2534_v15  ;;  %v2913_v15 = vld [vmem:[%s16870_s8 + $0x1c8] sm:$0x33]  ;;  %v2896_v0 = vld [vmem:[%s16870_s8 + $0x140] sm:$0xff] }
 0x530   :  { %v2324_v51 = vsel %vm2322_vm12, %v2321_v60, %v2296_v39  ;;  %v2549_v39 = vunpack.c.0.s8 %v2548_v16  ;;  %v14236_v60 = vsub.s32 %v2542_v5, %v13513_v7  ;;  %v16903_v16 = vmov 0   ;;  %v2889_v5 = vld [vmem:[%s16870_s8 + $0x108] sm:$0xff] }
 0x531   :  { %v2294_v35 = vpop.permute.xlu0 %2293  ;;  %3392 = vmatprep.mubr.bf16.mxu1 %v16903_v16 }
 0x532   :  { %v2323_v31 = vsel %vm2322_vm12, %v2320_v3, %v2294_v35  ;;  %v2556_v3 = vunpack.c.0.s8 %v2555_v26  ;;  %v14233_v35 = vsub.s32 %v2535_v18, %v13513_v7  ;;  %v11188_v18 = vcombine.high %v2888_v12, %v2896_v0 }
 0x533   :  { %12688 = vmatprep.mubr.msk.f32.mxu0 %vm129_vm1, %v2323_v31  ;;  %v14239_v31 = vsub.s32 %v2549_v39, %v13513_v7  ;;  %v2897_v39 = vld [vmem:[%s16870_s8 + $0x148] sm:$0xff] }
 0x534   :  { %12689 = vmatmul.mubr.msk.f32.vlgmr.msra.gmra.mxu0 %vm129_vm1, %v2324_v51  ;;  %v14242_v51 = vsub.s32 %v2556_v3, %v13513_v7  ;;  %v2872_v3 = vld [vmem:[%s16870_s8 + $0x80] sm:$0xff] }
 0x535   :  { %3435 = vmatprep.mubr.bf16.mxu0 %v16903_v16 }
 0x5f4   :  { %v12690_v23 = vpop.f32.mrf.mxu0 }
 0x5f5   :  { %v2421_v19 = vadd.f32 %v12690_v23, %v11149_v43 }
 0x5f6   :  { %v2415_v10 = vpop.f32.mrf.mxu0 }
 0x5f7   :  { %v2443_v21 = vcombine.high %v2421_v19, %v2421_v19  ;;  %v2450_v38 = vrot.slane %v2421_v19, %v13546_v22  ;;  %v2416_v46 = vadd.f32 %v11149_v43, %v2415_v10 }
 0x5f9   :  { %v2457_v24 = vrot.slane %v2443_v21, %v13546_v22  ;;  %v2458_v53 = vcombine.high %v2450_v38, %v2450_v38  ;;  %v2426_v25 = vcombine.high %v2416_v46, %v2416_v46  ;;  %v2433_v47 = vrot.slane %v2416_v46, %v13546_v22 }
 0x5fa   :  { %v2472_v45 = vadd.f32 %v13359_v54, %v2450_v38 }
 0x5fb   :  { %v2459_v50 = vcombine.high %v2457_v24, %v2457_v24  ;;  %v2473_v33 = vadd.f32 %v13360_v20, %v2458_v53  ;;  %v2440_v36 = vrot.slane %v2426_v25, %v13546_v22  ;;  %v2441_v30 = vcombine.high %v2433_v47, %v2433_v47 }
 0x5fc   :  { %v2474_v29 = vadd.f32 %v13361_v27, %v2457_v24  ;;  %v2468_v56 = vadd.f32 %v13363_v44, %v2433_v47 }
 0x5fd   :  { %v2475_v40 = vadd.f32 %v13362_v28, %v2459_v50  ;;  %v2503_v48 = vcombine.low %v2472_v45, %v2473_v33  ;;  %v2442_v58 = vcombine.high %v2440_v36, %v2440_v36  ;;  %v2469_v52 = vadd.f32 %v13364_v55, %v2441_v30 }
 0x5fe   :  { %v2470_v9 = vadd.f32 %v13365_v34, %v2440_v36 }
 0x5ff   :  { %v2471_v61 = vadd.f32 %v13366_v32, %v2442_v58  ;;  %v2504_v59 = vcombine.low %v2474_v29, %v2475_v40  ;;  %v2486_v11 = vcombine.low %v2468_v56, %v2469_v52  ;;  %v2511_v42 = vrot.slane %v2503_v48, %v13546_v22 }
 0x601   :  { %v2518_v14 = vrot.slane %v2504_v59, %v13546_v22  ;;  %v2487_v17 = vcombine.low %v2470_v9, %v2471_v61  ;;  %v2494_v2 = vrot.slane %v2486_v11, %v13546_v22 }
 0x603   :  { %v2519_v1 = vcombine.low %v2511_v42, %v2518_v14  ;;  %v2501_v63 = vrot.slane %v2487_v17, %v13546_v22 }
 0x605   :  { %v2525_v4 = vsel %vm129_vm1, %v2519_v1, 0.0  ;;  %v2502_v8 = vcombine.low %v2494_v2, %v2501_v63 }
 0x606   :  { %2526 = vadd.xlane.f32.xlu1 %v2525_v4  ;;  %v2904_v4 = vld [vmem:[%s16870_s8 + $0x180] sm:$0xff] }
 0x607   :  { %v2522_v37 = vsel %vm129_vm1, %v2502_v8, 0.0  ;;  %v2912_v8 = vld [vmem:[%s16870_s8 + $0x1c0] sm:$0x33] }
 0x608   :  { %2523 = vadd.xlane.f32.xlu0 %v2522_v37  ;;  %v2905_v37 = vld [vmem:[%s16870_s8 + $0x188] sm:$0xff]  ;;  %v11204_v62 = vcombine.high %v2904_v4, %v2912_v8  ;;  %v11203_v57 = vcombine.low %v2904_v4, %v2912_v8 }
 0x609   :  { %v11206_v13 = vcombine.high %v2905_v37, %v2913_v15  ;;  %v11205_v26 = vcombine.low %v2905_v37, %v2913_v15  ;;  %v11153_v37 = vld [vmem:[%s16868_s6] ss:$0 sm:$0xff] }
 0x60a   :  { %11219 = vmatprep.subr.msk.bf16.mxu1 %vm3311_vm13, %v11204_v62  ;;  %v11154_v62 = vld [vmem:[%s16869_s7] ss:$0 sm:$0xff]  ;;  %v2748_v15 = vcombine.high %v11153_v37, %v11153_v37 }
 0x60b   :  { %11221 = vmatprep.subr.msk.bf16.mxu0 %vm3311_vm13, %v11206_v13 }
 0x68f   :  { %v2527_v43 = vpop.xlane.xlu1 %2526 }
 0x690   :  { %v2530_v23 = vmul.f32 0.016666668, %v2527_v43  ;;  %v3313_v43 = vsel %vm3311_vm13, %v11203_v57, 0  ;;  %v2782_v57 = vcombine.high %v11154_v62, %v11154_v62 }
 0x691   :  { %v2524_v19 = vpop.xlane.xlu0 %2523  ;;  %3369 = vmatpush1.bf16.msra.mxu1 %v3313_v43 }
 0x692   :  { %v2567_v10 = vrot.slane %v2530_v23, %v14233_v35  ;;  %v2574_v21 = vrot.slane %v2530_v23, %v14236_v60  ;;  %v2581_v38 = vrot.slane %v2530_v23, %v14239_v31  ;;  %v2588_v46 = vrot.slane %v2530_v23, %v14242_v51  ;;  %3370 = vmatprep.subr.bf16.mxu1 %v11188_v18 }
 0x693   :  { %v2529_v24 = vmul.f32 0.016666668, %v2524_v19  ;;  %v11190_v23 = vcombine.high %v2889_v5, %v2897_v39  ;;  %v2880_v19 = vld [vmem:[%s16870_s8 + $0xc0] sm:$0xff]  ;;  %v2796_v18 = vrot.slane %v2782_v57, %v13546_v22 }
 0x694   :  { %v14248_v53 = vsub.f32 %v2472_v45, %v2567_v10  ;;  %v14250_v25 = vsub.f32 %v2473_v33, %v2574_v21  ;;  %v14252_v47 = vsub.f32 %v2474_v29, %v2581_v38  ;;  %v14254_v50 = vsub.f32 %v2475_v40, %v2588_v46  ;;  %v2873_v10 = vld [vmem:[%s16870_s8 + $0x88] sm:$0xff] }
 0x695   :  { %v2539_v54 = vrot.slane %v2529_v24, %v14233_v35  ;;  %v2546_v20 = vrot.slane %v2529_v24, %v14236_v60  ;;  %v2553_v36 = vrot.slane %v2529_v24, %v14239_v31  ;;  %v2560_v30 = vrot.slane %v2529_v24, %v14242_v51  ;;  %v2881_v21 = vld [vmem:[%s16870_s8 + $0xc8] sm:$0xff] }
 0x696   :  { %v2609_v27 = vmul.f32 %v14248_v53, %v14248_v53  ;;  %v2610_v45 = vmul.f32 %v14250_v25, %v14250_v25  ;;  %v2611_v33 = vmul.f32 %v14252_v47, %v14252_v47  ;;  %v2612_v29 = vmul.f32 %v14254_v50, %v14254_v50 }
 0x697   :  { %v14268_v28 = vsub.f32 %v2468_v56, %v2539_v54  ;;  %v14270_v40 = vsub.f32 %v2469_v52, %v2546_v20  ;;  %v14272_v48 = vsub.f32 %v2470_v9, %v2553_v36  ;;  %v14274_v58 = vsub.f32 %v2471_v61, %v2560_v30  ;;  %v2856_v36 = vld [vmem:[%s16870_s8] sm:$0xff] }
 0x698   :  { %v2638_v44 = vcombine.low %v2609_v27, %v2610_v45  ;;  %v2639_v55 = vcombine.low %v2611_v33, %v2612_v29  ;;  %v3319_v38 = vsel %vm3311_vm13, %v11205_v26, 0  ;;  %v11187_v46 = vcombine.low %v2888_v12, %v2896_v0  ;;  %v2864_v30 = vld [vmem:[%s16870_s8 + $0x40] sm:$0xff]  ;;  %v2857_v27 = vld [vmem:[%s16870_s8 + $0x8] sm:$0xff] }
 0x699   :  { %v2605_v34 = vmul.f32 %v14268_v28, %v14268_v28  ;;  %v2606_v32 = vmul.f32 %v14270_v40, %v14270_v40  ;;  %v2607_v59 = vmul.f32 %v14272_v48, %v14272_v48  ;;  %v2608_v56 = vmul.f32 %v14274_v58, %v14274_v58  ;;  %3412 = vmatpush1.bf16.msra.mxu0 %v3319_v38  ;;  %v2865_v45 = vld [vmem:[%s16870_s8 + $0x48] sm:$0xff] }
 0x69a   :  { %v2646_v42 = vrot.slane %v2638_v44, %v13546_v22  ;;  %v2653_v14 = vrot.slane %v2639_v55, %v13546_v22  ;;  %v11189_v24 = vcombine.low %v2889_v5, %v2897_v39  ;;  %v11172_v54 = vcombine.high %v2872_v3, %v2880_v19  ;;  %3413 = vmatprep.subr.bf16.mxu0 %v11190_v23 }
 0x69b   :  { %v2621_v52 = vcombine.low %v2605_v34, %v2606_v32  ;;  %v2622_v11 = vcombine.low %v2607_v59, %v2608_v56  ;;  %v11174_v20 = vcombine.high %v2873_v10, %v2881_v21  ;;  %3371 = vmatpush1.bf16.msra.mxu1 %v11187_v46  ;;  %v11171_v33 = vcombine.low %v2872_v3, %v2880_v19  ;;  %v14347_v34 = vld [vmem:[%s16870_s8 + $0x190] sm:$0xff]  ;;  %v14357_v59 = vld [vmem:[%s16870_s8 + $0x198] sm:$0xff] }
 0x69c   :  { %v2654_v2 = vcombine.low %v2646_v42, %v2653_v14  ;;  %3372 = vmatprep.subr.bf16.mxu1 %v11172_v54  ;;  %v11173_v29 = vcombine.low %v2873_v10, %v2881_v21  ;;  %v11156_v44 = vcombine.high %v2856_v36, %v2864_v30  ;;  %v11158_v55 = vcombine.high %v2857_v27, %v2865_v45  ;;  %v14352_v32 = vld [vmem:[%s16870_s8 + $0x1d0] sm:$0x33]  ;;  %v14362_v56 = vld [vmem:[%s16870_s8 + $0x1d8] sm:$0x33] }
 0x69d   :  { %v2629_v9 = vrot.slane %v2621_v52, %v13546_v22  ;;  %v2636_v61 = vrot.slane %v2622_v11, %v13546_v22  ;;  %3414 = vmatpush1.bf16.msra.mxu0 %v11189_v24  ;;  %v11155_v52 = vcombine.low %v2856_v36, %v2864_v30  ;;  %v11157_v11 = vcombine.low %v2857_v27, %v2865_v45 }
 0x69e   :  { %v2660_v63 = vsel %vm129_vm1, %v2654_v2, 0.0  ;;  %3415 = vmatprep.subr.bf16.mxu0 %v11174_v20  ;;  %v11207_v42 = vcombine.low %v14347_v34, %v14352_v32  ;;  %v11209_v14 = vcombine.low %v14357_v59, %v14362_v56  ;;  %v2755_v12 = vrot.slane %v11153_v37, %v13546_v22 }
 0x69f   :  { %v2637_v17 = vcombine.low %v2629_v9, %v2636_v61  ;;  %3373 = vmatpush1.bf16.msra.mxu1 %v11171_v33  ;;  %v11208_v9 = vcombine.high %v14347_v34, %v14352_v32  ;;  %v11210_v61 = vcombine.high %v14357_v59, %v14362_v56  ;;  %v2762_v0 = vrot.slane %v2748_v15, %v13546_v22  ;;  %v2875_v34 = vld [vmem:[%s16870_s8 + $0x98] sm:$0xff] }
 0x6a0   :  { %3374 = vmatprep.subr.bf16.mxu1 %v11156_v44  ;;  %v2789_v26 = vrot.slane %v11154_v62, %v13546_v22  ;;  %v2763_v23 = vcombine.high %v2755_v12, %v2755_v12  ;;  %v2798_v20 = vcombine.high %v2796_v18, %v2796_v18  ;;  %v2883_v32 = vld [vmem:[%s16870_s8 + $0xd8] sm:$0xff] }
 0x6a1   :  { %v2657_v1 = vsel %vm129_vm1, %v2637_v17, 0.0  ;;  %3416 = vmatpush1.bf16.msra.mxu0 %v11173_v29  ;;  %v2764_v19 = vcombine.high %v2762_v0, %v2762_v0 }
 0x6a2   :  { %2658 = vadd.xlane.f32.xlu0 %v2657_v1  ;;  %3417 = vmatprep.subr.bf16.mxu0 %v11158_v55  ;;  %v2797_v54 = vcombine.high %v2789_v26, %v2789_v26 }
 0x6a3   :  { %3375 = vmatpush1.bf16.msra.mxu1 %v11155_v52 }
 0x6a4   :  { %11223 = vmatprep.subr.msk.bf16.mxu1 %vm3311_vm13, %v11208_v9 }
 0x6a5   :  { %3418 = vmatpush1.bf16.msra.mxu0 %v11157_v11 }
 0x6a6   :  { %2661 = vadd.xlane.f32.xlu0 %v2660_v63  ;;  %11225 = vmatprep.subr.msk.bf16.mxu0 %vm3311_vm13, %v11210_v61 }
 0x72b   :  { %v2659_v17 = vpop.xlane.xlu0 %2658 }
 0x72c   :  { %v2663_v1 = vmul.f32 0.016666668, %v2659_v17 }
 0x72e   :  { %v2665_v2 = vadd.f32 1e-05, %v2663_v1 }
 0x72f   :  { %v2662_v63 = vpop.xlane.xlu0 %2661 }
 0x730   :  { %13215 = vrsqrt.f32 %v2665_v2  ;;  %v2664_v4 = vmul.f32 0.016666668, %v2662_v63 }
 0x732   :  { %v2666_v8 = vadd.f32 1e-05, %v2664_v4 }
 0x734   :  { %13217 = vrsqrt.f32 %v2666_v8 }
 0x73d   :  { %v13216_v13 = vpop.eup %13215 }
 0x73e   :  { %v2677_v5 = vrot.slane %v13216_v13, %v14233_v35  ;;  %v2684_v39 = vrot.slane %v13216_v13, %v14236_v60  ;;  %v2691_v3 = vrot.slane %v13216_v13, %v14239_v31  ;;  %v2698_v43 = vrot.slane %v13216_v13, %v14242_v51  ;;  %v2890_v13 = vld [vmem:[%s16870_s8 + $0x110] sm:$0xff] }
 0x740   :  { %v2735_v10 = vmul.f32 %v2677_v5, %v14268_v28  ;;  %v2736_v21 = vmul.f32 %v2684_v39, %v14270_v40  ;;  %v2737_v38 = vmul.f32 %v2691_v3, %v14272_v48  ;;  %v2738_v46 = vmul.f32 %v2698_v43, %v14274_v58  ;;  %v2899_v5 = vld [vmem:[%s16870_s8 + $0x158] sm:$0xff] }
 0x741   :  { %v13218_v24 = vpop.eup %13217  ;;  %v3325_v43 = vsel %vm3311_vm13, %v11207_v42, 0 }
 0x742   :  { %v2705_v36 = vrot.slane %v13218_v24, %v14233_v35  ;;  %v2712_v30 = vrot.slane %v13218_v24, %v14236_v60  ;;  %v2719_v27 = vrot.slane %v13218_v24, %v14239_v31  ;;  %v2726_v45 = vrot.slane %v13218_v24, %v14242_v51  ;;  %v2858_v24 = vld [vmem:[%s16870_s8 + $0x10] sm:$0xff] }
 0x743   :  { %v2769_v33 = vmul.f32 %v2755_v12, %v2735_v10  ;;  %v2770_v29 = vmul.f32 %v2763_v23, %v2736_v21  ;;  %v2771_v28 = vmul.f32 %v2762_v0, %v2737_v38  ;;  %v2772_v44 = vmul.f32 %v2764_v19, %v2738_v46  ;;  %v2874_v38 = vld [vmem:[%s16870_s8 + $0x90] sm:$0xff] }
 0x744   :  { %v2739_v40 = vmul.f32 %v2705_v36, %v14248_v53  ;;  %v2740_v48 = vmul.f32 %v2712_v30, %v14250_v25  ;;  %v2741_v58 = vmul.f32 %v2719_v27, %v14252_v47  ;;  %v2742_v55 = vmul.f32 %v2726_v45, %v14254_v50  ;;  %v2882_v46 = vld [vmem:[%s16870_s8 + $0xd0] sm:$0xff]  ;;  %v2867_v36 = vld [vmem:[%s16870_s8 + $0x58] sm:$0xff] }
 0x745   :  { %v14400_v52 = vadd.f32 %v2789_v26, %v2769_v33  ;;  %v14402_v11 = vadd.f32 %v2797_v54, %v2770_v29  ;;  %v14404_v9 = vadd.f32 %v2796_v18, %v2771_v28  ;;  %v14406_v61 = vadd.f32 %v2798_v20, %v2772_v44  ;;  %v2908_v29 = vld [vmem:[%s16870_s8 + $0x1a0] sm:$0xff]  ;;  %v2909_v44 = vld [vmem:[%s16870_s8 + $0x1a8] sm:$0xff] }
 0x746   :  { %v2773_v17 = vmul.f32 %v2755_v12, %v2739_v40  ;;  %v2774_v1 = vmul.f32 %v2763_v23, %v2740_v48  ;;  %v2775_v2 = vmul.f32 %v2762_v0, %v2741_v58  ;;  %v2776_v63 = vmul.f32 %v2764_v19, %v2742_v55  ;;  %v2916_v28 = vld [vmem:[%s16870_s8 + $0x1e0] sm:$0x33]  ;;  %v2917_v40 = vld [vmem:[%s16870_s8 + $0x1e8] sm:$0x33] }
 0x747   :  { %v2819_v53 = vcombine.low %v14400_v52, %v14402_v11  ;;  %v2820_v25 = vcombine.low %v14404_v9, %v14406_v61  ;;  %v3331_v19 = vsel %vm3311_vm13, %v11209_v14, 0  ;;  %v11176_v42 = vcombine.high %v2874_v38, %v2882_v46 }
 0x748   :  { %v14412_v47 = vadd.f32 %v2789_v26, %v2773_v17  ;;  %v14414_v50 = vadd.f32 %v2797_v54, %v2774_v1  ;;  %v14416_v4 = vadd.f32 %v2796_v18, %v2775_v2  ;;  %v14418_v8 = vadd.f32 %v2798_v20, %v2776_v63  ;;  %v2898_v26 = vld [vmem:[%s16870_s8 + $0x150] sm:$0xff]  ;;  %v2891_v18 = vld [vmem:[%s16870_s8 + $0x118] sm:$0xff]  ;;  %v2892_v63 = vld [vmem:[%s16870_s8 + $0x120] sm:$0xff] }
 0x749   :  { %v2827_v37 = vrot.slane %v2819_v53, %v13546_v22  ;;  %v2834_v62 = vrot.slane %v2820_v25, %v13546_v22  ;;  %v11192_v10 = vcombine.high %v2890_v13, %v2898_v26  ;;  %v11194_v21 = vcombine.high %v2891_v18, %v2899_v5  ;;  %v2866_v54 = vld [vmem:[%s16870_s8 + $0x50] sm:$0xff]  ;;  %v2859_v20 = vld [vmem:[%s16870_s8 + $0x18] sm:$0xff]  ;;  %v2900_v53 = vld [vmem:[%s16870_s8 + $0x160] sm:$0xff] }
 0x74a   :  { %v2836_v15 = vcombine.low %v14412_v47, %v14414_v50  ;;  %v2837_v57 = vcombine.low %v14416_v4, %v14418_v8  ;;  %v11191_v59 = vcombine.low %v2890_v13, %v2898_v26  ;;  %v11193_v56 = vcombine.low %v2891_v18, %v2899_v5  ;;  %v2893_v25 = vld [vmem:[%s16870_s8 + $0x128] sm:$0xff]  ;;  %v2884_v13 = vld [vmem:[%s16870_s8 + $0xe0] sm:$0xff] }
 0x74b   :  { %v2835_v39 = vcombine.low %v2827_v37, %v2834_v62  ;;  %v11178_v14 = vcombine.high %v2875_v34, %v2883_v32  ;;  %v11175_v30 = vcombine.low %v2874_v38, %v2882_v46  ;;  %v11177_v27 = vcombine.low %v2875_v34, %v2883_v32  ;;  %v2901_v37 = vld [vmem:[%s16870_s8 + $0x168] sm:$0xff] }
 0x74c   :  { %v2844_v12 = vrot.slane %v2836_v15, %v13546_v22  ;;  %v2851_v0 = vrot.slane %v2837_v57, %v13546_v22  ;;  %v11160_v45 = vcombine.high %v2858_v24, %v2866_v54  ;;  %v11162_v33 = vcombine.high %v2859_v20, %v2867_v36  ;;  %v2877_v26 = vld [vmem:[%s16870_s8 + $0xa8] sm:$0xff] }
 0x74d   :  { %v11159_v48 = vcombine.low %v2858_v24, %v2866_v54  ;;  %v11161_v58 = vcombine.low %v2859_v20, %v2867_v36  ;;  %v11212_v55 = vcombine.high %v2908_v29, %v2916_v28  ;;  %v11214_v17 = vcombine.high %v2909_v44, %v2917_v40  ;;  %v2885_v18 = vld [vmem:[%s16870_s8 + $0xe8] sm:$0xff]  ;;  %v2919_v24 = vld [vmem:[%s16870_s8 + $0x1f8] sm:$0x33] }
 0x74e   :  { %v2852_v3 = vcombine.low %v2844_v12, %v2851_v0  ;;  %v11211_v1 = vcombine.low %v2908_v29, %v2916_v28  ;;  %v11213_v2 = vcombine.low %v2909_v44, %v2917_v40  ;;  %v11196_v57 = vcombine.high %v2892_v63, %v2900_v53  ;;  %v2876_v0 = vld [vmem:[%s16870_s8 + $0xa0] sm:$0xff]  ;;  %v2869_v38 = vld [vmem:[%s16870_s8 + $0x68] sm:$0xff]  ;;  %v2902_v29 = vld [vmem:[%s16870_s8 + $0x170] sm:$0xff] }
 0x74f   :  { %v11198_v12 = vcombine.high %v2893_v25, %v2901_v37  ;;  %v11195_v5 = vcombine.low %v2892_v63, %v2900_v53  ;;  %v11179_v46 = vcombine.low %v2876_v0, %v2884_v13  ;;  %v11181_v34 = vcombine.low %v2877_v26, %v2885_v18  ;;  %v2895_v28 = vld [vmem:[%s16870_s8 + $0x138] sm:$0xff] }
 0x750   :  { %v14444_v23 = vpack.c.bf16 %v2852_v3, %v2835_v39  ;;  %v3337_v62 = vsel %vm3311_vm13, %v11211_v1, 0  ;;  %v3343_v15 = vsel %vm3311_vm13, %v11213_v2, 0  ;;  %v11197_v39 = vcombine.low %v2893_v25, %v2901_v37  ;;  %v2903_v44 = vld [vmem:[%s16870_s8 + $0x178] sm:$0xff]  ;;  %v2886_v1 = vld [vmem:[%s16870_s8 + $0xf0] sm:$0xff] }
 0x751   :  { %v11180_v3 = vcombine.high %v2876_v0, %v2884_v13  ;;  %v2879_v2 = vld [vmem:[%s16870_s8 + $0xb8] sm:$0xff]  ;;  %v11201_v25 = vcombine.low %v2895_v28, %v2903_v44 }
 0x752   :  { %11220 = vmatmul.mubr.msk.bf16.vlgmr.msra.gmra.mxu1 %vm129_vm1, %v14444_v23  ;;  %11222 = vmatmul.mubr.msk.bf16.vlgmr.msra.gmra.mxu0 %vm129_vm1, %v14444_v23  ;;  %v2887_v63 = vld [vmem:[%s16870_s8 + $0xf8] sm:$0xff] }
 0x753   :  { %3455 = vmatpush1.bf16.msra.mxu1 %v3325_v43  ;;  %3498 = vmatpush1.bf16.msra.mxu0 %v3331_v19  ;;  %v11182_v43 = vcombine.high %v2877_v26, %v2885_v18  ;;  %v2860_v19 = vld [vmem:[%s16870_s8 + $0x20] sm:$0xff]  ;;  %v2871_v0 = vld [vmem:[%s16870_s8 + $0x78] sm:$0xff]  ;;  %v11185_v26 = vcombine.low %v2879_v2, %v2887_v63 }
 0x754   :  { %3456 = vmatprep.subr.bf16.mxu1 %v11192_v10  ;;  %3499 = vmatprep.subr.bf16.mxu0 %v11194_v21  ;;  %v2868_v10 = vld [vmem:[%s16870_s8 + $0x60] sm:$0xff]  ;;  %v2861_v21 = vld [vmem:[%s16870_s8 + $0x28] sm:$0xff] }
 0x755   :  { %3478 = vmatprep.mubr.bf16.mxu1 %v16903_v16  ;;  %3521 = vmatprep.mubr.bf16.mxu0 %v16903_v16  ;;  %v11164_v32 = vcombine.high %v2860_v19, %v2868_v10  ;;  %v11163_v54 = vcombine.low %v2860_v19, %v2868_v10  ;;  %v11165_v20 = vcombine.low %v2861_v21, %v2869_v38  ;;  %v12880_v19 = vld [vmem:[%s16872_s10 + $0xf8] sm:$0xff]  }
 0x756   :  { %v12881_v10 = vld [vmem:[%s16872_s10 + $0x38] sm:$0xff]  }
 0x757   :  { %3457 = vmatpush1.bf16.msra.mxu1 %v11191_v59  ;;  %3500 = vmatpush1.bf16.msra.mxu0 %v11193_v56  ;;  %v11166_v59 = vcombine.high %v2861_v21, %v2869_v38  ;;  %v2910_v56 = vld [vmem:[%s16870_s8 + $0x1b0] sm:$0xff]  ;;  %v12882_v21 = vld [vmem:[%s16872_s10 + $0xb8] sm:$0xff]  }
 0x758   :  { %3458 = vmatprep.subr.bf16.mxu1 %v11176_v42  ;;  %3501 = vmatprep.subr.bf16.mxu0 %v11178_v14  ;;  %v2918_v42 = vld [vmem:[%s16870_s8 + $0x1f0] sm:$0x33]  ;;  %v2911_v14 = vld [vmem:[%s16870_s8 + $0x1b8] sm:$0xff] }
 0x759   :  { %v11216_v36 = vcombine.high %v2910_v56, %v2918_v42  ;;  %v12883_v38 = vld [vmem:[%s16872_s10 + $0x70] sm:$0xff]  }
 0x75b   :  { %3459 = vmatpush1.bf16.msra.mxu1 %v11175_v30  ;;  %3502 = vmatpush1.bf16.msra.mxu0 %v11177_v27  ;;  %v11218_v30 = vcombine.high %v2911_v14, %v2919_v24  ;;  %v11215_v27 = vcombine.low %v2910_v56, %v2918_v42  ;;  %v12889_v56 = vld [vmem:[%s16872_s10 + $0x28] sm:$0xff]  }
 0x75c   :  { %3460 = vmatprep.subr.bf16.mxu1 %v11160_v45  ;;  %3503 = vmatprep.subr.bf16.mxu0 %v11162_v33  ;;  %v11217_v45 = vcombine.low %v2911_v14, %v2919_v24  ;;  %v2894_v33 = vld [vmem:[%s16870_s8 + $0x130] sm:$0xff]  ;;  %v12890_v42 = vld [vmem:[%s16872_s10 + $0xa8] sm:$0xff]   ;;  %v12891_v14 = vld [vmem:[%s16872_s10 + $0x60] sm:$0xff]  }
 0x75d   :  { %v3349_v40 = vsel %vm3311_vm13, %v11215_v27, 0  ;;  %v11199_v53 = vcombine.low %v2894_v33, %v2902_v29  ;;  %v12892_v24 = vld [vmem:[%s16872_s10 + $0xe0] sm:$0xff]   ;;  %v12897_v27 = vld [vmem:[%s16872_s10 + $0x18] sm:$0xff]  }
 0x75f   :  { %3461 = vmatpush1.bf16.msra.mxu1 %v11159_v48  ;;  %3504 = vmatpush1.bf16.msra.mxu0 %v11161_v58  ;;  %v3355_v48 = vsel %vm3311_vm13, %v11217_v45, 0  ;;  %v11200_v58 = vcombine.high %v2894_v33, %v2902_v29  ;;  %v12898_v45 = vld [vmem:[%s16872_s10 + $0x98] sm:$0xff]   ;;  %v12899_v33 = vld [vmem:[%s16872_s10 + $0x50] sm:$0xff]  }
 0x760   :  { %11227 = vmatprep.subr.msk.bf16.mxu1 %vm3311_vm13, %v11212_v55  ;;  %11229 = vmatprep.subr.msk.bf16.mxu0 %vm3311_vm13, %v11214_v17  ;;  %v11202_v55 = vcombine.high %v2895_v28, %v2903_v44  ;;  %v2878_v17 = vld [vmem:[%s16870_s8 + $0xb0] sm:$0xff] }
 0x761   :  { %v11184_v37 = vcombine.high %v2878_v17, %v2886_v1  ;;  %v11183_v13 = vcombine.low %v2878_v17, %v2886_v1  ;;  %v12900_v29 = vld [vmem:[%s16872_s10 + $0xd0] sm:$0xff]   ;;  %v12907_v17 = vld [vmem:[%s16872_s10 + $0x40] sm:$0xff]  }
 0x762   :  { %11224 = vmatmul.mubr.msk.bf16.vlgmr.msra.gmra.mxu1 %vm129_vm1, %v14444_v23  ;;  %11226 = vmatmul.mubr.msk.bf16.vlgmr.msra.gmra.mxu0 %vm129_vm1, %v14444_v23  ;;  %v12901_v28 = vld [vmem:[%s16872_s10 + $0x10] sm:$0xff]   ;;  %v12908_v1 = vld [vmem:[%s16872_s10 + $0xc0] sm:$0xff]  }
 0x763   :  { %3541 = vmatpush1.bf16.msra.mxu1 %v3337_v62  ;;  %3584 = vmatpush1.bf16.msra.mxu0 %v3343_v15  ;;  %v11186_v62 = vcombine.high %v2879_v2, %v2887_v63  ;;  %v2862_v15 = vld [vmem:[%s16870_s8 + $0x30] sm:$0xff]  ;;  %v12909_v2 = vld [vmem:[%s16872_s10] sm:$0xff]  }
 0x764   :  { %3542 = vmatprep.subr.bf16.mxu1 %v11196_v57  ;;  %3585 = vmatprep.subr.bf16.mxu0 %v11198_v12  ;;  %v2870_v57 = vld [vmem:[%s16870_s8 + $0x70] sm:$0xff]  ;;  %v2863_v12 = vld [vmem:[%s16870_s8 + $0x38] sm:$0xff]  ;;  %v12910_v63 = vld [vmem:[%s16872_s10 + $0x80] sm:$0xff]  }
 0x765   :  { %3564 = vmatprep.mubr.bf16.mxu1 %v16903_v16  ;;  %3607 = vmatprep.mubr.bf16.mxu0 %v16903_v16  ;;  %v11168_v18 = vcombine.high %v2862_v15, %v2870_v57  ;;  %v12902_v44 = vld [vmem:[%s16872_s10 + $0x90] sm:$0xff]  }
 0x767   :  { %3543 = vmatpush1.bf16.msra.mxu1 %v11195_v5  ;;  %3586 = vmatpush1.bf16.msra.mxu0 %v11197_v39  ;;  %v11170_v5 = vcombine.high %v2863_v12, %v2871_v0  ;;  %v11167_v39 = vcombine.low %v2862_v15, %v2870_v57  ;;  %v14711_v15 = vld [vmem:[%s16871_s9] sm:$0xff] }
 0x768   :  { %3544 = vmatprep.subr.bf16.mxu1 %v11180_v3  ;;  %3587 = vmatprep.subr.bf16.mxu0 %v11182_v43  ;;  %v11169_v3 = vcombine.low %v2863_v12, %v2871_v0  ;;  %v12879_v43 = vld [vmem:[%s16872_s10 + $0x78] sm:$0xff]   ;;  %v2931_v0 = vrot.slane %v14711_v15, %v13612_v49 }
 0x76b   :  { %3545 = vmatpush1.bf16.msra.mxu1 %v11179_v46  ;;  %3588 = vmatpush1.bf16.msra.mxu0 %v11181_v34  ;;  %v12884_v46 = vld [vmem:[%s16872_s10 + $0xf0] sm:$0xff]  }
 0x76c   :  { %3546 = vmatprep.subr.bf16.mxu1 %v11164_v32  ;;  %3589 = vmatprep.subr.bf16.mxu0 %v11166_v59  ;;  %v12885_v34 = vld [vmem:[%s16872_s10 + $0x30] sm:$0xff]   ;;  %v12887_v59 = vld [vmem:[%s16872_s10 + $0x68] sm:$0xff]  }
 0x76d   :  { %v12886_v32 = vld [vmem:[%s16872_s10 + $0xb0] sm:$0xff]  }
 0x76f   :  { %3547 = vmatpush1.bf16.msra.mxu1 %v11163_v54  ;;  %3590 = vmatpush1.bf16.msra.mxu0 %v11165_v20  ;;  %v12893_v54 = vld [vmem:[%s16872_s10 + $0x20] sm:$0xff]  }
 0x770   :  { %11231 = vmatprep.subr.msk.bf16.mxu1 %vm3311_vm13, %v11216_v36  ;;  %11233 = vmatprep.subr.msk.bf16.mxu0 %vm3311_vm13, %v11218_v30  ;;  %v12894_v20 = vld [vmem:[%s16872_s10 + $0xa0] sm:$0xff]   ;;  %v12895_v36 = vld [vmem:[%s16872_s10 + $0x58] sm:$0xff]  }
 0x771   :  { %v12896_v30 = vld [vmem:[%s16872_s10 + $0xd8] sm:$0xff]  }
 0x772   :  { %11228 = vmatmul.mubr.msk.bf16.vlgmr.msra.gmra.mxu1 %vm129_vm1, %v14444_v23  ;;  %11230 = vmatmul.mubr.msk.bf16.vlgmr.msra.gmra.mxu0 %vm129_vm1, %v14444_v23 }
 0x773   :  { %3627 = vmatpush1.bf16.msra.mxu1 %v3349_v40  ;;  %3670 = vmatpush1.bf16.msra.mxu0 %v3355_v48  ;;  %v12903_v40 = vld [vmem:[%s16872_s10 + $0x48] sm:$0xff]  }
 0x774   :  { %3628 = vmatprep.subr.bf16.mxu1 %v11200_v58  ;;  %3671 = vmatprep.subr.bf16.mxu0 %v11202_v55  ;;  %v12904_v48 = vld [vmem:[%s16872_s10 + $0xc8] sm:$0xff]  }
 0x775   :  { %3650 = vmatprep.mubr.bf16.mxu1 %v16903_v16  ;;  %3693 = vmatprep.mubr.bf16.mxu0 %v16903_v16  ;;  %v12905_v58 = vld [vmem:[%s16872_s10 + $0x8] sm:$0xff]  }
 0x776   :  { %v12906_v55 = vld [vmem:[%s16872_s10 + $0x88] sm:$0xff]  }
 0x777   :  { %3629 = vmatpush1.bf16.msra.mxu1 %v11199_v53  ;;  %3672 = vmatpush1.bf16.msra.mxu0 %v11201_v25  ;;  %v12911_v53 = vld [vmem:[%s16872_s10 + $0x178] sm:$0xff]  }
 0x778   :  { %3630 = vmatprep.subr.bf16.mxu1 %v11184_v37  ;;  %3673 = vmatprep.subr.bf16.mxu0 %v11186_v62  ;;  %v12912_v25 = vld [vmem:[%s16872_s10 + $0x1f8] sm:$0xff]   ;;  %v14703_v37 = vsub.s32 3, %v13513_v7  ;;  %v14706_v62 = vsub.s32 2, %v13513_v7 }
 0x77a   :  { %16918 = vst [vmem:[#allocation6_spill] sm:$0xff] %v14706_v62 }
 0x77b   :  { %3631 = vmatpush1.bf16.msra.mxu1 %v11183_v13  ;;  %3674 = vmatpush1.bf16.msra.mxu0 %v11185_v26  ;;  %v2939_v13 = vrot.slane %v14711_v15, %v14703_v37  ;;  %v2927_v26 = vrot.slane %v14711_v15, %v13583_v41 }
 0x77c   :  { %3632 = vmatprep.subr.bf16.mxu1 %v11168_v18  ;;  %3675 = vmatprep.subr.bf16.mxu0 %v11170_v5  ;;  %v2935_v18 = vrot.slane %v14711_v15, %v14706_v62 }
 0x77f   :  { %3633 = vmatpush1.bf16.msra.mxu1 %v11167_v39  ;;  %3676 = vmatpush1.bf16.msra.mxu0 %v11169_v3 }
 0x780   :  { %12090 = vmatprep.subr.bf16.mxu1 %v12879_v43  ;;  %12112 = vmatprep.subr.bf16.mxu0 %v12880_v19 }
 0x782   :  { %11232 = vmatmul.mubr.msk.bf16.vlgmr.msra.gmra.mxu1 %vm129_vm1, %v14444_v23  ;;  %11234 = vmatmul.mubr.msk.bf16.vlgmr.msra.gmra.mxu0 %vm129_vm1, %v14444_v23  ;;  %v12888_v23 = vld [vmem:[%s16872_s10 + $0xe8] sm:$0xff]  }
 0x783   :  { %12091 = vmatpush3.bf16.msra.mxu1 %v12881_v10  ;;  %12113 = vmatpush3.bf16.msra.mxu0 %v12882_v21 }
 0x784   :  { %12092 = vmatprep.subr.bf16.mxu1 %v12883_v38  ;;  %12114 = vmatprep.subr.bf16.mxu0 %v12884_v46 }
 0x787   :  { %12093 = vmatpush3.bf16.msra.mxu1 %v12885_v34  ;;  %12115 = vmatpush3.bf16.msra.mxu0 %v12886_v32 }
 0x788   :  { %12094 = vmatprep.subr.bf16.mxu1 %v12887_v59  ;;  %12116 = vmatprep.subr.bf16.mxu0 %v12888_v23 }
 0x78b   :  { %12095 = vmatpush3.bf16.msra.mxu1 %v12889_v56  ;;  %12117 = vmatpush3.bf16.msra.mxu0 %v12890_v42 }
 0x78c   :  { %12096 = vmatprep.subr.bf16.mxu1 %v12891_v14  ;;  %12118 = vmatprep.subr.bf16.mxu0 %v12892_v24 }
 0x78f   :  { %12097 = vmatpush3.bf16.msra.mxu1 %v12893_v54  ;;  %12119 = vmatpush3.bf16.msra.mxu0 %v12894_v20 }
 0x790   :  { %12098 = vmatprep.subr.bf16.mxu1 %v12895_v36  ;;  %12120 = vmatprep.subr.bf16.mxu0 %v12896_v30 }
 0x793   :  { %12099 = vmatpush3.bf16.msra.mxu1 %v12897_v27  ;;  %12121 = vmatpush3.bf16.msra.mxu0 %v12898_v45 }
 0x794   :  { %12100 = vmatprep.subr.bf16.mxu1 %v12899_v33  ;;  %12122 = vmatprep.subr.bf16.mxu0 %v12900_v29  ;;  %v12913_v29 = vld [vmem:[%s16872_s10 + $0x138] sm:$0xff]  }
 0x797   :  { %12101 = vmatpush3.bf16.msra.mxu1 %v12901_v28  ;;  %12123 = vmatpush3.bf16.msra.mxu0 %v12902_v44  ;;  %v12914_v28 = vld [vmem:[%s16872_s10 + $0x1b8] sm:$0xff]  }
 0x798   :  { %12102 = vmatprep.subr.bf16.mxu1 %v12903_v40  ;;  %12124 = vmatprep.subr.bf16.mxu0 %v12904_v48  ;;  %v12915_v48 = vld [vmem:[%s16872_s10 + $0x170] sm:$0xff]  }
 0x79b   :  { %12103 = vmatpush3.bf16.msra.mxu1 %v12905_v58  ;;  %12125 = vmatpush3.bf16.msra.mxu0 %v12906_v55  ;;  %v12916_v58 = vld [vmem:[%s16872_s10 + $0x1f0] sm:$0xff]   ;;  %v14734_v55 = vsub.s32 5, %v13513_v7 }
 0x79c   :  { %12104 = vmatprep.subr.bf16.mxu1 %v12907_v17  ;;  %12126 = vmatprep.subr.bf16.mxu0 %v12908_v1  ;;  %v14737_v17 = vsub.s32 7, %v13513_v7  ;;  %v12917_v1 = vld [vmem:[%s16872_s10 + $0x130] sm:$0xff]  }
 0x79d   :  { %16919 = vst [vmem:[#allocation7_spill] sm:$0xff] %v14734_v55 }
 0x79e   :  { %16920 = vst [vmem:[#allocation8_spill] sm:$0xff] %v14737_v17 }
 0x79f   :  { %12105 = vmatpush3.bf16.msra.mxu1 %v12909_v2  ;;  %12127 = vmatpush3.bf16.msra.mxu0 %v12910_v63  ;;  %v12918_v2 = vld [vmem:[%s16872_s10 + $0x1b0] sm:$0xff]  }
 0x7a0   :  { %12134 = vmatprep.subr.bf16.mxu1 %v12911_v53  ;;  %12156 = vmatprep.subr.bf16.mxu0 %v12912_v25  ;;  %v12919_v25 = vld [vmem:[%s16872_s10 + $0x168] sm:$0xff]  }
 0x812   :  { %v3394_v57 = vpop.f32.mrf.mxu1  ;;  %v3437_v12 = vpop.f32.mrf.mxu0 }
 0x813   :  { %v3395_v46 = vadd.f32 %v3394_v57, %v2927_v26  ;;  %v3438_v34 = vadd.f32 %v3437_v12, %v2935_v18  ;;  %v12920_v57 = vld [vmem:[%s16872_s10 + $0x1e8] sm:$0xff]   ;;  %v2947_v12 = vrot.slane %v14711_v15, %v14734_v55 }
 0x814   :  { %v3396_v5 = vpop.f32.mrf.mxu1  ;;  %v3439_v39 = vpop.f32.mrf.mxu0 }
 0x815   :  { %v3397_v19 = vadd.f32 %v3396_v5, %v2931_v0  ;;  %v3440_v10 = vadd.f32 %v3439_v39, %v2939_v13  ;;  %v3704_v30 = vmax.f32 %v3395_v46, 0.0  ;;  %v3706_v27 = vmax.f32 %v3438_v34, 0.0  ;;  %v12922_v5 = vld [vmem:[%s16872_s10 + $0x1a8] sm:$0xff]  }
 0x816   :  { %v3398_v3 = vpop.f32.mrf.mxu1  ;;  %v3441_v43 = vpop.f32.mrf.mxu0 }
 0x817   :  { %v3399_v21 = vadd.f32 %v3398_v3, %v2927_v26  ;;  %v3442_v38 = vadd.f32 %v3441_v43, %v2935_v18  ;;  %v3705_v24 = vmax.f32 %v3397_v19, 0.0  ;;  %v3707_v54 = vmax.f32 %v3440_v10, 0.0  ;;  %v12921_v18 = vld [vmem:[%s16872_s10 + $0x128] sm:$0xff]   ;;  %v12923_v43 = vld [vmem:[%s16872_s10 + $0x160] sm:$0xff]  }
 0x818   :  { %v3400_v32 = vpop.f32.mrf.mxu1  ;;  %v3443_v59 = vpop.f32.mrf.mxu0  ;;  %v12924_v19 = vld [vmem:[%s16872_s10 + $0x1e0] sm:$0xff]  }
 0x819   :  { %v3401_v23 = vadd.f32 %v3400_v32, %v2931_v0  ;;  %v3444_v56 = vadd.f32 %v3443_v59, %v2939_v13  ;;  %v3720_v42 = vmax.f32 %v3399_v21, 0.0  ;;  %v3722_v14 = vmax.f32 %v3442_v38, 0.0  ;;  %v12925_v59 = vld [vmem:[%s16872_s10 + $0x120] sm:$0xff]  }
 0x81a   :  { %v2955_v0 = vrot.slane %v14711_v15, %v14737_v17 }
 0x81b   :  { %v3721_v20 = vmax.f32 %v3401_v23, 0.0  ;;  %v3723_v36 = vmax.f32 %v3444_v56, 0.0  ;;  %v3736_v44 = vpack.c.bf16 %v3720_v42, %v3704_v30  ;;  %v3738_v40 = vpack.c.bf16 %v3722_v14, %v3706_v27  ;;  %v12926_v23 = vld [vmem:[%s16872_s10 + $0x1a0] sm:$0xff]   ;;  %v12927_v56 = vld [vmem:[%s16872_s10 + $0x158] sm:$0xff]  }
 0x81c   :  { %v12928_v42 = vld [vmem:[%s16872_s10 + $0x1d8] sm:$0xff]  }
 0x81d   :  { %v3737_v45 = vpack.c.bf16 %v3721_v20, %v3705_v24  ;;  %v3739_v33 = vpack.c.bf16 %v3723_v36, %v3707_v54  ;;  %v12929_v27 = vld [vmem:[%s16872_s10 + $0x118] sm:$0xff]  }
 0x81f   :  { %4815 = vmatprep.mubr.bf16.mxu1 %v3737_v45  ;;  %4856 = vmatprep.mubr.bf16.mxu0 %v3739_v33  ;;  %v12930_v45 = vld [vmem:[%s16872_s10 + $0x198] sm:$0xff]   ;;  %v12931_v33 = vld [vmem:[%s16872_s10 + $0x150] sm:$0xff]  }
 0x820   :  { %4816 = vmatmul.mubr.bf16.vlgmr.msra.gmra.mxu1 %v3736_v44  ;;  %4857 = vmatmul.mubr.bf16.vlgmr.msra.gmra.mxu0 %v3738_v40  ;;  %v14799_v44 = vsub.s32 6, %v13513_v7  ;;  %v12933_v40 = vld [vmem:[%s16872_s10 + $0x110] sm:$0xff]  }
 0x821   :  { %12135 = vmatpush3.bf16.msra.mxu1 %v12913_v29  ;;  %12157 = vmatpush3.bf16.msra.mxu0 %v12914_v28  ;;  %v12932_v29 = vld [vmem:[%s16872_s10 + $0x1d0] sm:$0xff]   ;;  %v14796_v28 = vsub.s32 4, %v13513_v7  ;;  %v12935_v7 = vld [vmem:[%s16872_s10 + $0x148] sm:$0xff]  }
 0x822   :  { %v14745_v63 = vpop.f32.mrf.mxu1  ;;  %v14747_v53 = vpop.f32.mrf.mxu0  ;;  %12136 = vmatprep.subr.bf16.mxu1 %v12915_v48  ;;  %12158 = vmatprep.subr.bf16.mxu0 %v12916_v58  ;;  %16922 = vst [vmem:[#allocation10_spill] sm:$0xff] %v14799_v44  ;;  %v12934_v48 = vld [vmem:[%s16872_s10 + $0x190] sm:$0xff]  }
 0x823   :  { %16921 = vst [vmem:[#allocation9_spill] sm:$0xff] %v14796_v28 }
 0x824   :  { %v3482_v13 = vpop.f32.mrf.mxu1  ;;  %v3525_v26 = vpop.f32.mrf.mxu0 }
 0x825   :  { %12137 = vmatpush3.bf16.msra.mxu1 %v12917_v1  ;;  %12159 = vmatpush3.bf16.msra.mxu0 %v12918_v2  ;;  %v3483_v10 = vadd.f32 %v3482_v13, %v2947_v12  ;;  %v3526_v21 = vadd.f32 %v3525_v26, %v2955_v0  ;;  %v12936_v2 = vld [vmem:[%s16872_s10 + $0x1c8] sm:$0xff]  }
 0x826   :  { %v3484_v39 = vpop.f32.mrf.mxu1  ;;  %v3527_v3 = vpop.f32.mrf.mxu0  ;;  %12138 = vmatprep.subr.bf16.mxu1 %v12919_v25  ;;  %12160 = vmatprep.subr.bf16.mxu0 %v12920_v57  ;;  %v2943_v25 = vrot.slane %v14711_v15, %v14796_v28  ;;  %v2951_v57 = vrot.slane %v14711_v15, %v14799_v44  ;;  %v12938_v15 = vld [vmem:[%s16872_s10 + $0x188] sm:$0xff]  }
 0x827   :  { %v3709_v14 = vmax.f32 %v3483_v10, 0.0  ;;  %v3711_v24 = vmax.f32 %v3526_v21, 0.0 }
 0x828   :  { %v3486_v38 = vpop.f32.mrf.mxu1  ;;  %v3529_v46 = vpop.f32.mrf.mxu0 }
 0x829   :  { %v3487_v34 = vadd.f32 %v3486_v38, %v2947_v12  ;;  %v3530_v32 = vadd.f32 %v3529_v46, %v2955_v0  ;;  %12139 = vmatpush3.bf16.msra.mxu1 %v12921_v18  ;;  %12161 = vmatpush3.bf16.msra.mxu0 %v12922_v5  ;;  %v14824_v12 = vld [vmem:[%s16871_s9 + $0x8] sm:$0xff]  ;;  %v3485_v5 = vadd.f32 %v3484_v39, %v2943_v25  ;;  %v12939_v38 = vld [vmem:[%s16872_s10 + $0x140] sm:$0xff]  }
 0x82a   :  { %12140 = vmatprep.subr.bf16.mxu1 %v12923_v43  ;;  %12162 = vmatprep.subr.bf16.mxu0 %v12924_v19  ;;  %v2963_v26 = vrot.slane %v14824_v12, %v13612_v49  ;;  %v12937_v18 = vld [vmem:[%s16872_s10 + $0x108] sm:$0xff]   ;;  %v3528_v43 = vadd.f32 %v3527_v3, %v2951_v57  ;;  %v2971_v19 = vrot.slane %v14824_v12, %v14703_v37  ;;  %v12940_v46 = vld [vmem:[%s16872_s10 + $0x1c0] sm:$0xff]  }
 0x82b   :  { %v3725_v54 = vmax.f32 %v3487_v34, 0.0  ;;  %v3727_v20 = vmax.f32 %v3530_v32, 0.0  ;;  %v3481_v39 = vadd.f32 %v14745_v63, %v2943_v25  ;;  %v3524_v3 = vadd.f32 %v14747_v53, %v2951_v57  ;;  %v12943_v53 = vld [vmem:[%s16872_s10 + $0x278] sm:$0xff]   ;;  %v12947_v57 = vld [vmem:[%s16872_s10 + $0x270] sm:$0xff]  }
 0x82d   :  { %v3741_v36 = vpack.c.bf16 %v3725_v54, %v3709_v14  ;;  %v3743_v30 = vpack.c.bf16 %v3727_v20, %v3711_v24  ;;  %12141 = vmatpush3.bf16.msra.mxu1 %v12925_v59  ;;  %12163 = vmatpush3.bf16.msra.mxu0 %v12926_v23  ;;  %v12942_v14 = vld [vmem:[%s16872_s10 + $0x180] sm:$0xff]   ;;  %v3724_v24 = vmax.f32 %v3485_v5, 0.0  ;;  %v3726_v54 = vmax.f32 %v3528_v43, 0.0  ;;  %v12944_v20 = vld [vmem:[%s16872_s10 + $0x2f8] sm:$0xff]   ;;  %v12952_v5 = vld [vmem:[%s16872_s10 + $0x2e8] sm:$0xff]  }
 0x82e   :  { %12142 = vmatprep.subr.bf16.mxu1 %v12927_v56  ;;  %12164 = vmatprep.subr.bf16.mxu0 %v12928_v42  ;;  %v12941_v42 = vld [vmem:[%s16872_s10 + $0x100] sm:$0xff]   ;;  %v12953_v43 = vld [vmem:[%s16872_s10 + $0x228] sm:$0xff]  }
 0x82f   :  { %4897 = vmatprep.mubr.bf16.mxu1 %v3741_v36  ;;  %4938 = vmatprep.mubr.bf16.mxu0 %v3743_v30  ;;  %v3708_v30 = vmax.f32 %v3481_v39, 0.0 }
 0x831   :  { %12143 = vmatpush3.bf16.msra.mxu1 %v12929_v27  ;;  %12165 = vmatpush3.bf16.msra.mxu0 %v12930_v45  ;;  %v3710_v27 = vmax.f32 %v3524_v3, 0.0  ;;  %v12957_v3 = vld [vmem:[%s16872_s10 + $0x220] sm:$0xff]  }
 0x832   :  { %v14807_v58 = vpop.f32.mrf.mxu1  ;;  %v14809_v1 = vpop.f32.mrf.mxu0  ;;  %12144 = vmatprep.subr.bf16.mxu1 %v12931_v33  ;;  %12166 = vmatprep.subr.bf16.mxu0 %v12932_v29  ;;  %v12945_v29 = vld [vmem:[%s16872_s10 + $0x238] sm:$0xff]  }
 0x834   :  { %v3568_v0 = vpop.f32.mrf.mxu1  ;;  %v3611_v13 = vpop.f32.mrf.mxu0 }
 0x835   :  { %12145 = vmatpush3.bf16.msra.mxu1 %v12933_v40  ;;  %12167 = vmatpush3.bf16.msra.mxu0 %v12934_v48  ;;  %v3569_v59 = vadd.f32 %v3568_v0, %v2963_v26  ;;  %v3612_v63 = vadd.f32 %v3611_v13, %v2971_v19  ;;  %v3740_v40 = vpack.c.bf16 %v3724_v24, %v3708_v30  ;;  %v12948_v0 = vld [vmem:[%s16872_s10 + $0x2f0] sm:$0xff]   ;;  %v12962_v24 = vld [vmem:[%s16872_s10 + $0x298] sm:$0xff]  }
 0x836   :  { %v14836_v10 = vpop.f32.mrf.mxu1  ;;  %v14838_v21 = vpop.f32.mrf.mxu0  ;;  %12146 = vmatprep.subr.bf16.mxu1 %v12935_v7  ;;  %12168 = vmatprep.subr.bf16.mxu0 %v12936_v2  ;;  %v3742_v48 = vpack.c.bf16 %v3726_v54, %v3710_v27  ;;  %v12946_v2 = vld [vmem:[%s16872_s10 + $0x2b8] sm:$0xff]   ;;  %v12963_v54 = vld [vmem:[%s16872_s10 + $0x250] sm:$0xff]   ;;  %v12967_v27 = vld [vmem:[%s16872_s10 + $0x248] sm:$0xff]  }
 0x837   :  { %v3713_v33 = vmax.f32 %v3569_v59, 0.0  ;;  %v3715_v7 = vmax.f32 %v3612_v63, 0.0  ;;  %v12959_v59 = vld [vmem:[%s16872_s10 + $0x258] sm:$0xff]   ;;  %v12964_v63 = vld [vmem:[%s16872_s10 + $0x2d0] sm:$0xff]  }
 0x838   :  { %v3572_v34 = vpop.f32.mrf.mxu1  ;;  %v3615_v32 = vpop.f32.mrf.mxu0  ;;  %v12966_v30 = vld [vmem:[%s16872_s10 + $0x290] sm:$0xff]  }
 0x839   :  { %v3573_v23 = vadd.f32 %v3572_v34, %v2963_v26  ;;  %v3616_v56 = vadd.f32 %v3615_v32, %v2971_v19  ;;  %12147 = vmatpush3.bf16.msra.mxu1 %v12937_v18  ;;  %12169 = vmatpush3.bf16.msra.mxu0 %v12938_v15  ;;  %v12949_v26 = vld [vmem:[%s16872_s10 + $0x230] sm:$0xff]   ;;  %v12951_v15 = vld [vmem:[%s16872_s10 + $0x268] sm:$0xff]   ;;  %v12958_v32 = vld [vmem:[%s16872_s10 + $0x2a0] sm:$0xff]  }
 0x83a   :  { %12148 = vmatprep.subr.bf16.mxu1 %v12939_v38  ;;  %12170 = vmatprep.subr.bf16.mxu0 %v12940_v46  ;;  %v12950_v18 = vld [vmem:[%s16872_s10 + $0x2b0] sm:$0xff]   ;;  %v12954_v19 = vld [vmem:[%s16872_s10 + $0x2a8] sm:$0xff]   ;;  %v12955_v38 = vld [vmem:[%s16872_s10 + $0x260] sm:$0xff]  }
 0x83b   :  { %v3729_v36 = vmax.f32 %v3573_v23, 0.0  ;;  %v3731_v45 = vmax.f32 %v3616_v56, 0.0  ;;  %v12956_v46 = vld [vmem:[%s16872_s10 + $0x2e0] sm:$0xff]   ;;  %v12960_v23 = vld [vmem:[%s16872_s10 + $0x2d8] sm:$0xff]  }
 0x83d   :  { %12149 = vmatpush3.bf16.msra.mxu1 %v12941_v42  ;;  %12171 = vmatpush3.bf16.msra.mxu0 %v12942_v14  ;;  %v3745_v25 = vpack.c.bf16 %v3729_v36, %v3713_v33  ;;  %v3747_v13 = vpack.c.bf16 %v3731_v45, %v3715_v7  ;;  %v12961_v42 = vld [vmem:[%s16872_s10 + $0x218] sm:$0xff]   ;;  %v12968_v45 = vld [vmem:[%s16872_s10 + $0x2c8] sm:$0xff]   ;;  %v2959_v33 = vrot.slane %v14824_v12, %v13583_v41 }
 0x83e   :  { %12178 = vmatprep.subr.bf16.mxu1 %v12943_v53  ;;  %12200 = vmatprep.subr.bf16.mxu0 %v12944_v20  ;;  %v12965_v20 = vld [vmem:[%s16872_s10 + $0x210] sm:$0xff]  }
 0x83f   :  { %v3571_v7 = vadd.f32 %v14836_v10, %v2959_v33  ;;  %v12972_v10 = vld [vmem:[%s16872_s10 + $0x2c0] sm:$0xff]  }
 0x840   :  { %4898 = vmatmul.mubr.bf16.vlgmr.msra.gmra.mxu1 %v3740_v40  ;;  %4939 = vmatmul.mubr.bf16.vlgmr.msra.gmra.mxu0 %v3742_v48  ;;  %v12969_v48 = vld [vmem:[%s16872_s10 + $0x208] sm:$0xff]  }
 0x841   :  { %12179 = vmatpush3.bf16.msra.mxu1 %v12945_v29  ;;  %4979 = vmatprep.mubr.bf16.mxu1 %v3745_v25  ;;  %v2967_v29 = vrot.slane %v14824_v12, %v14706_v62 }
 0x842   :  { %12201 = vmatpush3.bf16.msra.mxu0 %v12946_v2  ;;  %5020 = vmatprep.mubr.bf16.mxu0 %v3747_v13  ;;  %v14896_v39 = vpop.f32.mrf.mxu1  ;;  %v14901_v34 = vpop.f32.mrf.mxu0  ;;  %v2979_v2 = vrot.slane %v14824_v12, %v14734_v55 }
 0x843   :  { %12180 = vmatprep.subr.bf16.mxu1 %v12947_v57  ;;  %12202 = vmatprep.subr.bf16.mxu0 %v12948_v0  ;;  %v12970_v57 = vld [vmem:[%s16872_s10 + $0x288] sm:$0xff]   ;;  %v12971_v0 = vld [vmem:[%s16872_s10 + $0x240] sm:$0xff]   ;;  %v3614_v13 = vadd.f32 %v14838_v21, %v2967_v29  ;;  %v3728_v21 = vmax.f32 %v3571_v7, 0.0 }
 0x844   :  { %v3654_v56 = vpop.f32.mrf.mxu1  ;;  %v3697_v14 = vpop.f32.mrf.mxu0  ;;  %v12983_v7 = vld [vmem:[%s16872_s10 + $0x368] sm:$0xff]  }
 0x845   :  { %12181 = vmatpush3.bf16.msra.mxu1 %v12949_v26  ;;  %v2987_v26 = vrot.slane %v14824_v12, %v14737_v17 }
 0x846   :  { %12203 = vmatpush3.bf16.msra.mxu0 %v12950_v18  ;;  %12182 = vmatprep.subr.bf16.mxu1 %v12951_v15  ;;  %v14924_v53 = vpop.f32.mrf.mxu1  ;;  %v14929_v36 = vpop.f32.mrf.mxu0  ;;  %v3567_v18 = vadd.f32 %v14807_v58, %v2959_v33  ;;  %v12975_v58 = vld [vmem:[%s16872_s10 + $0x378] sm:$0xff]   ;;  %v12980_v33 = vld [vmem:[%s16872_s10 + $0x3f0] sm:$0xff]  }
 0x847   :  { %12204 = vmatprep.subr.bf16.mxu0 %v12952_v5  ;;  %v3610_v5 = vadd.f32 %v14809_v1, %v2967_v29  ;;  %v3698_v1 = vadd.f32 %v3697_v14, %v2987_v26  ;;  %v12978_v14 = vld [vmem:[%s16872_s10 + $0x3b8] sm:$0xff]  }
 0x848   :  { %v3658_v40 = vpop.f32.mrf.mxu1  ;;  %v3701_v25 = vpop.f32.mrf.mxu0 }
 0x849   :  { %12183 = vmatpush3.bf16.msra.mxu1 %v12953_v43  ;;  %v3659_v15 = vadd.f32 %v3658_v40, %v2979_v2  ;;  %v3702_v43 = vadd.f32 %v3701_v25, %v2987_v26  ;;  %v12981_v40 = vld [vmem:[%s16872_s10 + $0x330] sm:$0xff]   ;;  %v12985_v25 = vld [vmem:[%s16872_s10 + $0x328] sm:$0xff]   ;;  %v12989_v26 = vld [vmem:[%s16872_s10 + $0x320] sm:$0xff]  }
 0x84a   :  { %12205 = vmatpush3.bf16.msra.mxu0 %v12954_v19  ;;  %12184 = vmatprep.subr.bf16.mxu1 %v12955_v38  ;;  %v12973_v19 = vld [vmem:[%s16872_s10 + $0x200] sm:$0xff]   ;;  %v3655_v38 = vadd.f32 %v3654_v56, %v2979_v2  ;;  %v3714_v56 = vmax.f32 %v3610_v5, 0.0  ;;  %v12984_v2 = vld [vmem:[%s16872_s10 + $0x3e8] sm:$0xff]   ;;  %v12993_v5 = vld [vmem:[%s16872_s10 + $0x318] sm:$0xff]  }
 0x84b   :  { %12206 = vmatprep.subr.bf16.mxu0 %v12956_v46  ;;  %v12974_v46 = vld [vmem:[%s16872_s10 + $0x280] sm:$0xff]  }
 0x84d   :  { %12185 = vmatpush3.bf16.msra.mxu1 %v12957_v3  ;;  %v3730_v3 = vmax.f32 %v3614_v13, 0.0  ;;  %v12988_v13 = vld [vmem:[%s16872_s10 + $0x3e0] sm:$0xff]  }
 0x84e   :  { %12207 = vmatpush3.bf16.msra.mxu0 %v12958_v32  ;;  %12186 = vmatprep.subr.bf16.mxu1 %v12959_v59  ;;  %v12976_v32 = vld [vmem:[%s16872_s10 + $0x3f8] sm:$0xff]   ;;  %v3712_v59 = vmax.f32 %v3567_v18, 0.0 }
 0x84f   :  { %12208 = vmatprep.subr.bf16.mxu0 %v12960_v23  ;;  %v3733_v23 = vmax.f32 %v3659_v15, 0.0  ;;  %v12991_v18 = vld [vmem:[%s16872_s10 + $0x358] sm:$0xff]  }
 0x850   :  { %v12992_v15 = vld [vmem:[%s16872_s10 + $0x3d8] sm:$0xff]  }
 0x851   :  { %12187 = vmatpush3.bf16.msra.mxu1 %v12961_v42  ;;  %v3735_v42 = vmax.f32 %v3702_v43, 0.0  ;;  %v12994_v43 = vld [vmem:[%s16872_s10 + $0x398] sm:$0xff]  }
 0x852   :  { %12209 = vmatpush3.bf16.msra.mxu0 %v12962_v24  ;;  %12188 = vmatprep.subr.bf16.mxu1 %v12963_v54  ;;  %v12977_v24 = vld [vmem:[%s16872_s10 + $0x338] sm:$0xff]   ;;  %v3744_v54 = vpack.c.bf16 %v3728_v21, %v3712_v59  ;;  %v12996_v21 = vld [vmem:[%s16872_s10 + $0x3d0] sm:$0xff]   ;;  %v13001_v59 = vld [vmem:[%s16872_s10 + $0x308] sm:$0xff]  }
 0x853   :  { %12210 = vmatprep.subr.bf16.mxu0 %v12964_v63  ;;  %v3717_v63 = vmax.f32 %v3655_v38, 0.0  ;;  %v12997_v38 = vld [vmem:[%s16872_s10 + $0x310] sm:$0xff]  }
 0x855   :  { %12189 = vmatpush3.bf16.msra.mxu1 %v12965_v20  ;;  %v3746_v20 = vpack.c.bf16 %v3730_v3, %v3714_v56  ;;  %v13000_v3 = vld [vmem:[%s16872_s10 + $0x3c8] sm:$0xff]  }
 0x856   :  { %12211 = vmatpush3.bf16.msra.mxu0 %v12966_v30  ;;  %12190 = vmatprep.subr.bf16.mxu1 %v12967_v27  ;;  %v3719_v30 = vmax.f32 %v3698_v1, 0.0  ;;  %v12979_v27 = vld [vmem:[%s16872_s10 + $0x370] sm:$0xff]   ;;  %v2975_v1 = vrot.slane %v14824_v12, %v14796_v28  ;;  %v13002_v56 = vld [vmem:[%s16872_s10 + $0x388] sm:$0xff]  }
 0x857   :  { %12212 = vmatprep.subr.bf16.mxu0 %v12968_v45  ;;  %v3749_v45 = vpack.c.bf16 %v3733_v23, %v3717_v63  ;;  %v13005_v63 = vld [vmem:[%s16872_s10 + $0x300] sm:$0xff]  }
 0x858   :  { %v3751_v29 = vpack.c.bf16 %v3735_v42, %v3719_v30  ;;  %v3657_v23 = vadd.f32 %v14924_v53, %v2975_v1  ;;  %v13003_v42 = vld [vmem:[%s16872_s10 + $0x340] sm:$0xff]  }
 0x859   :  { %12191 = vmatpush3.bf16.msra.mxu1 %v12969_v48  ;;  %v12982_v48 = vld [vmem:[%s16872_s10 + $0x3b0] sm:$0xff]  }
 0x85a   :  { %12213 = vmatpush3.bf16.msra.mxu0 %v12970_v57  ;;  %12192 = vmatprep.subr.bf16.mxu1 %v12971_v0  ;;  %v12986_v57 = vld [vmem:[%s16872_s10 + $0x3a8] sm:$0xff]   ;;  %v12987_v0 = vld [vmem:[%s16872_s10 + $0x360] sm:$0xff]  }
 0x85b   :  { %12214 = vmatprep.subr.bf16.mxu0 %v12972_v10  ;;  %v12990_v10 = vld [vmem:[%s16872_s10 + $0x3a0] sm:$0xff]  }
 0x85d   :  { %12193 = vmatpush3.bf16.msra.mxu1 %v12973_v19  ;;  %v12995_v19 = vld [vmem:[%s16872_s10 + $0x350] sm:$0xff]  }
 0x85e   :  { %12215 = vmatpush3.bf16.msra.mxu0 %v12974_v46  ;;  %12222 = vmatprep.subr.bf16.mxu1 %v12975_v58  ;;  %v12998_v46 = vld [vmem:[%s16872_s10 + $0x390] sm:$0xff]   ;;  %v12999_v58 = vld [vmem:[%s16872_s10 + $0x348] sm:$0xff]  }
 0x85f   :  { %12244 = vmatprep.subr.bf16.mxu0 %v12976_v32  ;;  %v2983_v32 = vrot.slane %v14824_v12, %v14799_v44  ;;  %v13004_v12 = vld [vmem:[%s16872_s10 + $0x3c0] sm:$0xff]  }
 0x860   :  { %4980 = vmatmul.mubr.bf16.vlgmr.msra.gmra.mxu1 %v3744_v54  ;;  %v3653_v54 = vadd.f32 %v14896_v39, %v2975_v1 }
 0x861   :  { %5021 = vmatmul.mubr.bf16.vlgmr.msra.gmra.mxu0 %v3746_v20  ;;  %12223 = vmatpush3.bf16.msra.mxu1 %v12977_v24  ;;  %v3700_v24 = vadd.f32 %v14929_v36, %v2983_v32  ;;  %v3696_v53 = vadd.f32 %v14901_v34, %v2983_v32  ;;  %v13006_v36 = vld [vmem:[%s16872_s10 + $0x380] sm:$0xff]  }
 0x862   :  { %5061 = vmatprep.mubr.bf16.mxu1 %v3749_v45  ;;  %12245 = vmatpush3.bf16.msra.mxu0 %v12978_v14  ;;  %v3732_v14 = vmax.f32 %v3657_v23, 0.0  ;;  %v3716_v30 = vmax.f32 %v3653_v54, 0.0 }
 0x863   :  { %5102 = vmatprep.mubr.bf16.mxu0 %v3751_v29  ;;  %12224 = vmatprep.subr.bf16.mxu1 %v12979_v27  ;;  %v3734_v20 = vmax.f32 %v3700_v24, 0.0  ;;  %v3718_v27 = vmax.f32 %v3696_v53, 0.0 }
 0x864   :  { %12246 = vmatprep.subr.bf16.mxu0 %v12980_v33  ;;  %v3748_v39 = vpack.c.bf16 %v3732_v14, %v3716_v30 }
 0x865   :  { %12225 = vmatpush3.bf16.msra.mxu1 %v12981_v40  ;;  %v3750_v34 = vpack.c.bf16 %v3734_v20, %v3718_v27 }
 0x866   :  { %12247 = vmatpush3.bf16.msra.mxu0 %v12982_v48  ;;  %12226 = vmatprep.subr.bf16.mxu1 %v12983_v7 }
 0x867   :  { %12248 = vmatprep.subr.bf16.mxu0 %v12984_v2 }
 0x869   :  { %12227 = vmatpush3.bf16.msra.mxu1 %v12985_v25 }
 0x86a   :  { %12249 = vmatpush3.bf16.msra.mxu0 %v12986_v57  ;;  %12228 = vmatprep.subr.bf16.mxu1 %v12987_v0 }
 0x86b   :  { %12250 = vmatprep.subr.bf16.mxu0 %v12988_v13 }
 0x86d   :  { %12229 = vmatpush3.bf16.msra.mxu1 %v12989_v26 }
 0x86e   :  { %12251 = vmatpush3.bf16.msra.mxu0 %v12990_v10  ;;  %12230 = vmatprep.subr.bf16.mxu1 %v12991_v18 }
 0x86f   :  { %12252 = vmatprep.subr.bf16.mxu0 %v12992_v15 }
 0x871   :  { %12231 = vmatpush3.bf16.msra.mxu1 %v12993_v5 }
 0x872   :  { %12253 = vmatpush3.bf16.msra.mxu0 %v12994_v43  ;;  %12232 = vmatprep.subr.bf16.mxu1 %v12995_v19  ;;  %v11235_v43 = vld [vmem:[%s16873_s11] ss:$0 sm:$0xff] }
 0x873   :  { %12254 = vmatprep.subr.bf16.mxu0 %v12996_v21 }
 0x875   :  { %12233 = vmatpush3.bf16.msra.mxu1 %v12997_v38 }
 0x876   :  { %12255 = vmatpush3.bf16.msra.mxu0 %v12998_v46  ;;  %12234 = vmatprep.subr.bf16.mxu1 %v12999_v58 }
 0x877   :  { %12256 = vmatprep.subr.bf16.mxu0 %v13000_v3 }
 0x879   :  { %12235 = vmatpush3.bf16.msra.mxu1 %v13001_v59 }
 0x87a   :  { %12257 = vmatpush3.bf16.msra.mxu0 %v13002_v56  ;;  %12236 = vmatprep.subr.bf16.mxu1 %v13003_v42 }
 0x87b   :  { %12258 = vmatprep.subr.bf16.mxu0 %v13004_v12 }
 0x87d   :  { %12237 = vmatpush3.bf16.msra.mxu1 %v13005_v63 }
 0x87e   :  { %12259 = vmatpush3.bf16.msra.mxu0 %v13006_v36 }
 0x880   :  { %5062 = vmatmul.mubr.bf16.vlgmr.msra.gmra.mxu1 %v3748_v39 }
 0x881   :  { %5103 = vmatmul.mubr.bf16.vlgmr.msra.gmra.mxu0 %v3750_v34  ;;  %5643 = vmatprep.mubr.f32.mxu1 %v13391_v6 }
 0x8e0   :  { %v12106_v45 = vpop.f32.mrf.mxu1  ;;  %v12128_v33 = vpop.f32.mrf.mxu0 }
 0x8e2   :  { %v12107_v29 = vpop.f32.mrf.mxu1  ;;  %v12129_v40 = vpop.f32.mrf.mxu0 }
 0x8e3   :  { %v12108_v5 = vadd.f32 %v12107_v29, %v12106_v45  ;;  %v12130_v1 = vadd.f32 %v12129_v40, %v12128_v33 }
 0x8e4   :  { %v12109_v48 = vpop.f32.mrf.mxu1  ;;  %v12131_v7 = vpop.f32.mrf.mxu0 }
 0x8e5   :  { %v4818_v38 = vadd.f32 %v12108_v5, %v11235_v43 }
 0x8e6   :  { %v12110_v2 = vpop.f32.mrf.mxu1  ;;  %v12132_v57 = vpop.f32.mrf.mxu0 }
 0x8e7   :  { %v12111_v46 = vadd.f32 %v12110_v2, %v12109_v48  ;;  %v4859_v59 = vadd.f32 %v12130_v1, %v4818_v38  ;;  %v12133_v24 = vadd.f32 %v12132_v57, %v12131_v7 }
 0x8e9   :  { %v4821_v23 = vadd.f32 %v12111_v46, %v11235_v43 }
 0x8eb   :  { %v4862_v53 = vadd.f32 %v12133_v24, %v4821_v23 }
 0x900   :  { %v12150_v25 = vpop.f32.mrf.mxu1  ;;  %v12172_v0 = vpop.f32.mrf.mxu0 }
 0x902   :  { %v12151_v13 = vpop.f32.mrf.mxu1  ;;  %v12173_v26 = vpop.f32.mrf.mxu0 }
 0x903   :  { %v12152_v32 = vadd.f32 %v12151_v13, %v12150_v25  ;;  %v12174_v63 = vadd.f32 %v12173_v26, %v12172_v0 }
 0x904   :  { %v12153_v10 = vpop.f32.mrf.mxu1  ;;  %v12175_v18 = vpop.f32.mrf.mxu0 }
 0x905   :  { %v4900_v12 = vadd.f32 %v12152_v32, %v4859_v59 }
 0x906   :  { %v12154_v15 = vpop.f32.mrf.mxu1  ;;  %v12176_v21 = vpop.f32.mrf.mxu0 }
 0x907   :  { %v12155_v54 = vadd.f32 %v12154_v15, %v12153_v10  ;;  %v4941_v30 = vadd.f32 %v12174_v63, %v4900_v12  ;;  %v12177_v39 = vadd.f32 %v12176_v21, %v12175_v18 }
 0x909   :  { %v4903_v27 = vadd.f32 %v12155_v54, %v4862_v53 }
 0x90b   :  { %v4944_v40 = vadd.f32 %v12177_v39, %v4903_v27 }
 0x920   :  { %v12194_v19 = vpop.f32.mrf.mxu1 }
 0x921   :  { %v12216_v58 = vpop.f32.mrf.mxu0 }
 0x922   :  { %v12195_v3 = vpop.f32.mrf.mxu1 }
 0x923   :  { %v12217_v56 = vpop.f32.mrf.mxu0  ;;  %v12196_v14 = vadd.f32 %v12195_v3, %v12194_v19 }
 0x924   :  { %v12197_v42 = vpop.f32.mrf.mxu1  ;;  %v12218_v48 = vadd.f32 %v12217_v56, %v12216_v58 }
 0x925   :  { %v12219_v36 = vpop.f32.mrf.mxu0  ;;  %v4982_v34 = vadd.f32 %v12196_v14, %v4941_v30 }
 0x926   :  { %v12198_v20 = vpop.f32.mrf.mxu1 }
 0x927   :  { %v12199_v45 = vadd.f32 %v12198_v20, %v12197_v42  ;;  %v12220_v29 = vpop.f32.mrf.mxu0  ;;  %v5023_v13 = vadd.f32 %v12218_v48, %v4982_v34 }
 0x928   :  { %v12221_v0 = vadd.f32 %v12220_v29, %v12219_v36 }
 0x929   :  { %v4985_v7 = vadd.f32 %v12199_v45, %v4944_v40 }
 0x92b   :  { %v5026_v38 = vadd.f32 %v12221_v0, %v4985_v7 }
 0x940   :  { %v12238_v33 = vpop.f32.mrf.mxu1 }
 0x941   :  { %v12260_v2 = vpop.f32.mrf.mxu0 }
 0x942   :  { %v12239_v25 = vpop.f32.mrf.mxu1 }
 0x943   :  { %v12240_v57 = vadd.f32 %v12239_v25, %v12238_v33  ;;  %v12261_v10 = vpop.f32.mrf.mxu0 }
 0x944   :  { %v12241_v15 = vpop.f32.mrf.mxu1  ;;  %v12262_v5 = vadd.f32 %v12261_v10, %v12260_v2 }
 0x945   :  { %v5064_v26 = vadd.f32 %v12240_v57, %v5023_v13  ;;  %v12263_v43 = vpop.f32.mrf.mxu0 }
 0x946   :  { %v12242_v19 = vpop.f32.mrf.mxu1 }
 0x947   :  { %v5105_v18 = vadd.f32 %v12262_v5, %v5064_v26  ;;  %v12243_v21 = vadd.f32 %v12242_v19, %v12241_v15  ;;  %v12264_v46 = vpop.f32.mrf.mxu0 }
 0x948   :  { %v12265_v32 = vadd.f32 %v12264_v46, %v12263_v43 }
 0x949   :  { %v5113_v3 = vcombine.high %v5105_v18, %v5105_v18  ;;  %v5120_v1 = vrot.slane %v5105_v18, %v13546_v22  ;;  %v5067_v58 = vadd.f32 %v12243_v21, %v5026_v38 }
 0x94b   :  { %v5127_v59 = vrot.slane %v5113_v3, %v13546_v22  ;;  %v5128_v23 = vcombine.high %v5120_v1, %v5120_v1  ;;  %v5108_v56 = vadd.f32 %v12265_v32, %v5067_v58  ;;  %v5155_v24 = vadd.f32 %v5120_v1, %v14400_v52 }
 0x94d   :  { %v5129_v42 = vcombine.high %v5127_v59, %v5127_v59  ;;  %v5156_v12 = vadd.f32 %v5128_v23, %v14402_v11  ;;  %v5130_v54 = vcombine.high %v5108_v56, %v5108_v56  ;;  %v5137_v53 = vrot.slane %v5108_v56, %v13546_v22 }
 0x94e   :  { %v5157_v63 = vadd.f32 %v5127_v59, %v14404_v9 }
 0x94f   :  { %v5144_v14 = vrot.slane %v5130_v54, %v13546_v22  ;;  %v5158_v36 = vadd.f32 %v5129_v42, %v14406_v61  ;;  %v5173_v20 = vcombine.low %v5155_v24, %v5156_v12  ;;  %v5145_v30 = vcombine.high %v5137_v53, %v5137_v53 }
 0x950   :  { %v5159_v34 = vadd.f32 %v5137_v53, %v14412_v47 }
 0x951   :  { %v5146_v27 = vcombine.high %v5144_v14, %v5144_v14  ;;  %v5174_v39 = vcombine.low %v5157_v63, %v5158_v36  ;;  %v5160_v45 = vadd.f32 %v5145_v30, %v14414_v50  ;;  %v5161_v52 = vadd.f32 %v5144_v14, %v14416_v4 }
 0x952   :  { %v5181_v11 = vrot.slane %v5173_v20, %v13546_v22 }
 0x953   :  { %v5188_v29 = vrot.slane %v5174_v39, %v13546_v22  ;;  %v5162_v9 = vadd.f32 %v5146_v27, %v14418_v8  ;;  %v5190_v33 = vcombine.low %v5159_v34, %v5160_v45 }
 0x955   :  { %v5189_v40 = vcombine.low %v5181_v11, %v5188_v29  ;;  %v5191_v48 = vcombine.low %v5161_v52, %v5162_v9  ;;  %v5198_v2 = vrot.slane %v5190_v33, %v13546_v22  ;;  %v11380_v33 = vld [vmem:[%s16864_s2 + $0xf0] sm:$0xf] }
 0x957   :  { %v5209_v61 = vsel %vm129_vm1, %v5189_v40, 0.0  ;;  %v5205_v25 = vrot.slane %v5191_v48, %v13546_v22  ;;  %v11379_v40 = vld [vmem:[%s16864_s2 + $0xe8] sm:$0xff]  ;;  %v11378_v48 = vld [vmem:[%s16864_s2 + $0xe0] sm:$0xff] }
 0x958   :  { %5210 = vadd.xlane.f32.xlu1 %v5209_v61  ;;  %v11377_v61 = vld [vmem:[%s16864_s2 + $0xd8] sm:$0xff] }
 0x959   :  { %v5206_v47 = vcombine.low %v5198_v2, %v5205_v25  ;;  %v11376_v2 = vld [vmem:[%s16864_s2 + $0xd0] sm:$0xff]  ;;  %v11375_v25 = vld [vmem:[%s16864_s2 + $0xc8] sm:$0xff] }
 0x95b   :  { %v5212_v50 = vsel %vm129_vm1, %v5206_v47, 0.0  ;;  %v11374_v47 = vld [vmem:[%s16864_s2 + $0xc0] sm:$0xff] }
 0x95c   :  { %5213 = vadd.xlane.f32.xlu0 %v5212_v50  ;;  %v11373_v50 = vld [vmem:[%s16864_s2 + $0xb8] sm:$0xff] }
 0x9e1   :  { %v5211_v4 = vpop.xlane.xlu1 %5210 }
 0x9e2   :  { %v5215_v13 = vmul.f32 0.016666668, %v5211_v4  ;;  %v11372_v4 = vld [vmem:[%s16864_s2 + $0xb0] sm:$0xff] }
 0x9e4   :  { %v5225_v7 = vrot.slane %v5215_v13, %v14233_v35  ;;  %v5232_v8 = vrot.slane %v5215_v13, %v14236_v60  ;;  %v5239_v57 = vrot.slane %v5215_v13, %v14239_v31  ;;  %v5246_v10 = vrot.slane %v5215_v13, %v14242_v51  ;;  %v11371_v13 = vld [vmem:[%s16864_s2 + $0xa8] sm:$0xff] }
 0x9e5   :  { %v5214_v15 = vpop.xlane.xlu0 %5213 }
 0x9e6   :  { %v5216_v0 = vmul.f32 0.016666668, %v5214_v15  ;;  %v15100_v26 = vsub.f32 %v5155_v24, %v5225_v7  ;;  %v15102_v5 = vsub.f32 %v5156_v12, %v5232_v8  ;;  %v15104_v43 = vsub.f32 %v5157_v63, %v5239_v57  ;;  %v11370_v7 = vld [vmem:[%s16864_s2 + $0xa0] sm:$0xff]  ;;  %v11369_v8 = vld [vmem:[%s16864_s2 + $0x98] sm:$0xff]  ;;  %v11368_v57 = vld [vmem:[%s16864_s2 + $0x90] sm:$0xff] }
 0x9e7   :  { %v15106_v19 = vsub.f32 %v5158_v36, %v5246_v10  ;;  %v11367_v10 = vld [vmem:[%s16864_s2 + $0x88] sm:$0xff]  ;;  %v11366_v15 = vld [vmem:[%s16864_s2 + $0x80] sm:$0xff] }
 0x9e8   :  { %v5253_v38 = vrot.slane %v5216_v0, %v14233_v35  ;;  %v5260_v18 = vrot.slane %v5216_v0, %v14236_v60  ;;  %v5267_v21 = vrot.slane %v5216_v0, %v14239_v31  ;;  %v5274_v46 = vrot.slane %v5216_v0, %v14242_v51 }
 0x9e9   :  { %v5291_v3 = vmul.f32 %v15100_v26, %v15100_v26  ;;  %v5292_v1 = vmul.f32 %v15102_v5, %v15102_v5  ;;  %v5293_v58 = vmul.f32 %v15104_v43, %v15104_v43  ;;  %v5294_v32 = vmul.f32 %v15106_v19, %v15106_v19 }
 0x9ea   :  { %v15120_v59 = vsub.f32 %v5159_v34, %v5253_v38  ;;  %v15122_v23 = vsub.f32 %v5160_v45, %v5260_v18  ;;  %v15124_v56 = vsub.f32 %v5161_v52, %v5267_v21  ;;  %v15126_v42 = vsub.f32 %v5162_v9, %v5274_v46  ;;  %v11381_v9 = vld [vmem:[%s16864_s2 + $0xf8] sm:$0xf]  ;;  %s16931_s2 = smov 24  }
 0x9eb   :  { %v5307_v24 = vcombine.low %v5291_v3, %v5292_v1  ;;  %v5308_v12 = vcombine.low %v5293_v58, %v5294_v32  ;;  %11383 = vmatprep.subr.msk.mxu1 %vm134_vm0, %v11381_v9  ;;  %v11364_v1 = vld [vmem:[%s16874_s12] ss:$0 sm:$0xff] }
 0x9ec   :  { %v5295_v54 = vmul.f32 %v15120_v59, %v15120_v59  ;;  %v5296_v53 = vmul.f32 %v15122_v23, %v15122_v23  ;;  %v5297_v63 = vmul.f32 %v15124_v56, %v15124_v56  ;;  %v5298_v14 = vmul.f32 %v15126_v42, %v15126_v42  ;;  %11384 = vmatpush1.msk.msra.mxu1 %vm134_vm0, %v11380_v33  ;;  %v11365_v58 = vld [vmem:[%s16875_s13] ss:$0 sm:$0xff] }
 0x9ed   :  { %v5315_v36 = vrot.slane %v5307_v24, %v13546_v22  ;;  %v5322_v20 = vrot.slane %v5308_v12, %v13546_v22  ;;  %5597 = vmatprep.subr.mxu1 %v11379_v40  ;;  %v5434_v32 = vcombine.high %v11364_v1, %v11364_v1  ;;  %v5468_v24 = vcombine.high %v11365_v58, %v11365_v58 }
 0x9ee   :  { %v5324_v30 = vcombine.low %v5295_v54, %v5296_v53  ;;  %v5325_v27 = vcombine.low %v5297_v63, %v5298_v14  ;;  %5598 = vmatpush1.msra.mxu1 %v11378_v48  ;;  %v5441_v12 = vrot.slane %v11364_v1, %v13546_v22  ;;  %v5475_v53 = vrot.slane %v11365_v58, %v13546_v22 }
 0x9ef   :  { %v5323_v39 = vcombine.low %v5315_v36, %v5322_v20  ;;  %5599 = vmatprep.subr.mxu1 %v11377_v61  ;;  %v5448_v54 = vrot.slane %v5434_v32, %v13546_v22  ;;  %v5482_v63 = vrot.slane %v5468_v24, %v13546_v22 }
 0x9f0   :  { %v5332_v34 = vrot.slane %v5324_v30, %v13546_v22  ;;  %v5339_v45 = vrot.slane %v5325_v27, %v13546_v22  ;;  %5600 = vmatpush1.msra.mxu1 %v11376_v2  ;;  %v5449_v36 = vcombine.high %v5441_v12, %v5441_v12 }
 0x9f1   :  { %v5343_v52 = vsel %vm129_vm1, %v5323_v39, 0.0  ;;  %5601 = vmatprep.subr.mxu1 %v11375_v25  ;;  %v5450_v20 = vcombine.high %v5448_v54, %v5448_v54 }
 0x9f2   :  { %5344 = vadd.xlane.f32.xlu1 %v5343_v52  ;;  %v5340_v11 = vcombine.low %v5332_v34, %v5339_v45  ;;  %5602 = vmatpush1.msra.mxu1 %v11374_v47  ;;  %v5483_v45 = vcombine.high %v5475_v53, %v5475_v53  ;;  %v5484_v52 = vcombine.high %v5482_v63, %v5482_v63 }
 0x9f3   :  { %5603 = vmatprep.subr.mxu1 %v11373_v50 }
 0x9f4   :  { %v5346_v29 = vsel %vm129_vm1, %v5340_v11, 0.0  ;;  %5604 = vmatpush1.msra.mxu1 %v11372_v4 }
 0x9f5   :  { %5347 = vadd.xlane.f32.xlu0 %v5346_v29  ;;  %5605 = vmatprep.subr.mxu1 %v11371_v13 }
 0x9f6   :  { %5606 = vmatpush1.msra.mxu1 %v11370_v7 }
 0x9f7   :  { %5607 = vmatprep.subr.mxu1 %v11369_v8 }
 0x9f8   :  { %5608 = vmatpush1.msra.mxu1 %v11368_v57 }
 0x9f9   :  { %5609 = vmatprep.subr.mxu1 %v11367_v10 }
 0x9fa   :  { %5610 = vmatpush1.msra.mxu1 %v11366_v15 }
 0xa7b   :  { %v5345_v0 = vpop.xlane.xlu1 %5344 }
 0xa7c   :  { %v5349_v38 = vmul.f32 0.016666668, %v5345_v0 }
 0xa7e   :  { %v5351_v18 = vadd.f32 1e-05, %v5349_v38  ;;  %v5348_v21 = vpop.xlane.xlu0 %5347 }
 0xa7f   :  { %v5350_v46 = vmul.f32 0.016666668, %v5348_v21 }
 0xa80   :  { %13219 = vrsqrt.f32 %v5351_v18 }
 0xa81   :  { %v5352_v3 = vadd.f32 1e-05, %v5350_v46 }
 0xa83   :  { %13221 = vrsqrt.f32 %v5352_v3 }
 0xa8d   :  { %v13220_v14 = vpop.eup %13219 }
 0xa8e   :  { %v5363_v30 = vrot.slane %v13220_v14, %v14233_v35  ;;  %v5370_v27 = vrot.slane %v13220_v14, %v14236_v60  ;;  %v5377_v39 = vrot.slane %v13220_v14, %v14239_v31  ;;  %v5384_v34 = vrot.slane %v13220_v14, %v14242_v51 }
 0xa90   :  { %v13222_v11 = vpop.eup %13221  ;;  %v5421_v29 = vmul.f32 %v5363_v30, %v15100_v26  ;;  %v5422_v9 = vmul.f32 %v5370_v27, %v15102_v5  ;;  %v5423_v33 = vmul.f32 %v5377_v39, %v15104_v43  ;;  %v5424_v40 = vmul.f32 %v5384_v34, %v15106_v19 }
 0xa91   :  { %v5391_v48 = vrot.slane %v13222_v11, %v14233_v35  ;;  %v5398_v61 = vrot.slane %v13222_v11, %v14236_v60  ;;  %v5405_v2 = vrot.slane %v13222_v11, %v14239_v31  ;;  %v5412_v25 = vrot.slane %v13222_v11, %v14242_v51 }
 0xa92   :  { %v5455_v47 = vmul.f32 %v5441_v12, %v5421_v29  ;;  %v5456_v50 = vmul.f32 %v5449_v36, %v5422_v9  ;;  %v5457_v4 = vmul.f32 %v5448_v54, %v5423_v33  ;;  %v5458_v13 = vmul.f32 %v5450_v20, %v5424_v40 }
 0xa93   :  { %v5425_v26 = vmul.f32 %v5391_v48, %v15120_v59  ;;  %v5426_v5 = vmul.f32 %v5398_v61, %v15122_v23  ;;  %v5427_v43 = vmul.f32 %v5405_v2, %v15124_v56  ;;  %v5428_v19 = vmul.f32 %v5412_v25, %v15126_v42 }
 0xa94   :  { %v15218_v7 = vadd.f32 %v5475_v53, %v5455_v47  ;;  %v15220_v8 = vadd.f32 %v5483_v45, %v5456_v50  ;;  %v15222_v57 = vadd.f32 %v5482_v63, %v5457_v4  ;;  %v15224_v10 = vadd.f32 %v5484_v52, %v5458_v13 }
 0xa95   :  { %v5459_v15 = vmul.f32 %v5441_v12, %v5425_v26  ;;  %v5460_v0 = vmul.f32 %v5449_v36, %v5426_v5  ;;  %v5461_v38 = vmul.f32 %v5448_v54, %v5427_v43  ;;  %v5462_v18 = vmul.f32 %v5450_v20, %v5428_v19 }
 0xa96   :  { %v5535_v59 = vcombine.low %v15218_v7, %v15220_v8  ;;  %v5536_v23 = vcombine.low %v15222_v57, %v15224_v10 }
 0xa97   :  { %v15230_v56 = vadd.f32 %v5475_v53, %v5459_v15  ;;  %v15232_v42 = vadd.f32 %v5483_v45, %v5460_v0  ;;  %v15234_v21 = vadd.f32 %v5482_v63, %v5461_v38  ;;  %v15236_v46 = vadd.f32 %v5484_v52, %v5462_v18  ;;  %v11382_v63 = vld [vmem:[%s16865_s3 + $0x2] sm:$0x3]  ;;  %s16923_s3 = smov 112  }
 0xa98   :  { %v5543_v3 = vrot.slane %v5535_v59, %v13546_v22  ;;  %v5550_v1 = vrot.slane %v5536_v23, %v13546_v22  ;;  %v5520_v14 = vrot.slane %v11382_v63, %v13583_v41  ;;  %v5524_v34 = vrot.slane %v11382_v63, %v13612_v49 }
 0xa99   :  { %v5552_v58 = vcombine.low %v15230_v56, %v15232_v42  ;;  %v5553_v32 = vcombine.low %v15234_v21, %v15236_v46 }
 0xa9a   :  { %v5551_v24 = vcombine.low %v5543_v3, %v5550_v1 }
 0xa9b   :  { %v5560_v12 = vrot.slane %v5552_v58, %v13546_v22  ;;  %v5567_v54 = vrot.slane %v5553_v32, %v13546_v22 }
 0xa9c   :  { %11385 = vmatmul.mubr.msk.f32.vlgmr.msra.gmra.mxu1 %vm129_vm1, %v5551_v24 }
 0xa9d   :  { %5649 = vmatprep.mubr.f32.mxu1 %v13391_v6  ;;  %v5568_v53 = vcombine.low %v5560_v12, %v5567_v54 }
 0xaa0   :  { %11386 = vmatmul.mubr.msk.f32.gmra.mxu1 %vm129_vm1, %v5568_v53 }
 0xb5c   :  { %v5645_v36 = vpop.f32.mrf.mxu1 }
 0xb5d   :  { %v15253_v20 = vadd.f32 %v5645_v36, %v5520_v14 }
 0xb5e   :  { %v5647_v30 = vpop.f32.mrf.mxu1 }
 0xb5f   :  { %5666 = vrot.lane.b32.xlu1 %v15253_v20, %s13395_s17  ;;  %5658 = vrot.lane.b32.xlu0 %v15253_v20, %s13394_s16  ;;  %v5648_v52 = vadd.f32 %v5647_v30, %v5524_v34 }
 0xb60   :  { %12695 = vmatprep.mubr.msk.f32.mxu0 %vm269_vm2, %v15253_v20  ;;  %v5651_v6 = vpop.f32.mrf.mxu1 }
 0xb61   :  { %v15261_v27 = vadd.f32 %v5651_v6, %v5520_v14 }
 0xb62   :  { %v5653_v39 = vpop.f32.mrf.mxu1 }
 0xb63   :  { %5660 = vrot.lane.b32.xlu1 %v15261_v27, %s13394_s16  ;;  %5662 = vrot.lane.b32.xlu0 %v15253_v20, %s13393_s15  ;;  %v5654_v45 = vadd.f32 %v5653_v39, %v5524_v34  ;;  %s16925_s16 = smov 122  }
 0xb67   :  { %5664 = vrot.lane.b32.xlu1 %v15261_v27, %s13393_s15  ;;  %5670 = vrot.lane.b32.xlu0 %v15253_v20, %s13397_s19  ;;  %s16924_s15 = smov 94  }
 0xb6b   :  { %5668 = vrot.lane.b32.xlu1 %v15261_v27, %s13395_s17  ;;  %5672 = vrot.lane.b32.xlu0 %v15261_v27, %s13397_s19  ;;  %s16926_s17 = smov 116  }
 0xb6f   :  { %5674 = vrot.lane.b32.xlu1 %v15253_v20, %s13396_s18  ;;  %5680 = vrot.lane.b32.xlu0 %v15261_v27, %s13398_s20 }
 0xb73   :  { %5676 = vrot.lane.b32.xlu1 %v15261_v27, %s13396_s18  ;;  %5690 = vrot.lane.b32.xlu0 %v5654_v45, %s13399_s21 }
 0xb77   :  { %5678 = vrot.lane.b32.xlu1 %v15253_v20, %s13398_s20  ;;  %5684 = vrot.lane.b32.xlu0 %v15253_v20, %s13399_s21 }
 0xb7b   :  { %5688 = vrot.lane.b32.xlu1 %v15261_v27, %s13399_s21  ;;  %5696 = vrot.lane.b32.xlu0 %v5654_v45, %s16923_s3 }
 0xb7f   :  { %5686 = vrot.lane.b32.xlu1 %v5648_v52, %s13399_s21  ;;  %5694 = vrot.lane.b32.xlu0 %v5648_v52, %s16923_s3 }
 0xb83   :  { %5700 = vrot.lane.b32.xlu1 %v5654_v45, %s16924_s15  ;;  %5704 = vrot.lane.b32.xlu0 %v15261_v27, %s16925_s16 }
 0xb87   :  { %5698 = vrot.lane.b32.xlu1 %v5648_v52, %s16924_s15  ;;  %5702 = vrot.lane.b32.xlu0 %v15253_v20, %s16925_s16 }
 0xbd1   :  { %v15298_v11 = vpop.permute.xlu1 %5666  ;;  %v5659_v29 = vpop.permute.xlu0 %5658 }
 0xbd2   :  { %12702 = vmatprep.mubr.msk.f32.mxu1 %vm269_vm2, %v5659_v29 }
 0xbd5   :  { %v15301_v9 = vpop.permute.xlu1 %5660  ;;  %v5663_v33 = vpop.permute.xlu0 %5662 }
 0xbd6   :  { %5791 = vrot.lane.b32.xlu1 %v15301_v9, %s16925_s16 }
 0xbd9   :  { %v15305_v40 = vpop.permute.xlu1 %5664  ;;  %v15307_v48 = vpop.permute.xlu0 %5670 }
 0xbda   :  { %5878 = vrot.lane.b32.xlu0 %v15305_v40, %s16925_s16  ;;  %5789 = vrot.lane.b32.xlu1 %v5659_v29, %s16925_s16 }
 0xbdd   :  { %v15312_v61 = vpop.permute.xlu1 %5668  ;;  %v15314_v2 = vpop.permute.xlu0 %5672 }
 0xbde   :  { %5965 = vrot.lane.b32.xlu1 %v15312_v61, %s16925_s16  ;;  %5876 = vrot.lane.b32.xlu0 %v5663_v33, %s16925_s16 }
 0xbe1   :  { %v15319_v25 = vpop.permute.xlu1 %5674  ;;  %v15321_v47 = vpop.permute.xlu0 %5680 }
 0xbe2   :  { %5963 = vrot.lane.b32.xlu1 %v15298_v11, %s16925_s16  ;;  %6052 = vrot.lane.b32.xlu0 %v15314_v2, %s16925_s16 }
 0xbe5   :  { %v15327_v50 = vpop.permute.xlu1 %5676  ;;  %v5691_v4 = vpop.permute.xlu0 %5690 }
 0xbe6   :  { %6139 = vrot.lane.b32.xlu1 %v15327_v50, %s16925_s16  ;;  %6050 = vrot.lane.b32.xlu0 %v15307_v48, %s16925_s16 }
 0xbe9   :  { %v15333_v13 = vpop.permute.xlu1 %5678  ;;  %v5685_v26 = vpop.permute.xlu0 %5684 }
 0xbea   :  { %6137 = vrot.lane.b32.xlu1 %v15319_v25, %s16925_s16  ;;  %6226 = vrot.lane.b32.xlu0 %v15321_v47, %s16925_s16 }
 0xbed   :  { %v5689_v5 = vpop.permute.xlu1 %5688  ;;  %v15339_v43 = vpop.permute.xlu0 %5696 }
 0xbee   :  { %v15342_v19 = vsel %vm254_vm3, %v5689_v5, %v5691_v4  ;;  %6224 = vrot.lane.b32.xlu0 %v15333_v13, %s16925_s16 }
 0xbef   :  { %6313 = vrot.lane.b32.xlu1 %v15342_v19, %s16925_s16 }
 0xbf1   :  { %v5687_v15 = vpop.permute.xlu1 %5686  ;;  %v15348_v0 = vpop.permute.xlu0 %5694 }
 0xbf2   :  { %v15351_v38 = vsel %vm254_vm3, %v5685_v26, %v5687_v15  ;;  %6400 = vrot.lane.b32.xlu0 %v15339_v43, %s16925_s16 }
 0xbf3   :  { %6311 = vrot.lane.b32.xlu1 %v15351_v38, %s16925_s16 }
 0xbf5   :  { %v15357_v18 = vpop.permute.xlu1 %5700  ;;  %v5705_v59 = vpop.permute.xlu0 %5704 }
 0xbf6   :  { %6398 = vrot.lane.b32.xlu0 %v15348_v0, %s16925_s16  ;;  %12691 = vmatprep.subr.msk.mxu0 %vm269_vm2, %v5705_v59 }
 0xbf7   :  { %6487 = vrot.lane.b32.xlu1 %v15357_v18, %s16925_s16  ;;  %12692 = vmatpush3.xpose.msk.msra.mxu0 %vm269_vm2, %v5705_v59 }
 0xbf9   :  { %v15365_v23 = vpop.permute.xlu1 %5698  ;;  %v5703_v3 = vpop.permute.xlu0 %5702 }
 0xbfa   :  { %6881 = vrot.lane.b32.xlu0 %v15301_v9, %s16926_s17  ;;  %12693 = vmatprep.subr.msk.mxu0 %vm269_vm2, %v5703_v3 }
 0xbfb   :  { %6485 = vrot.lane.b32.xlu1 %v15365_v23, %s16925_s16  ;;  %12694 = vmatpush3.xpose.msk.msra.mxu0 %vm269_vm2, %v5703_v3 }
 0xbfe   :  { %6968 = vrot.lane.b32.xlu0 %v15305_v40, %s16926_s17  ;;  %12696 = vmatmul.mubr.msk.f32.vlgmr.msra.gmra.mxu0 %vm269_vm2, %v15261_v27 }
 0xbff   :  { %6794 = vrot.lane.b32.xlu1 %v15261_v27, %s16926_s17  ;;  %12709 = vmatprep.mubr.msk.f32.mxu0 %vm269_vm2, %v5663_v33 }
 0xc02   :  { %6966 = vrot.lane.b32.xlu0 %v5663_v33, %s16926_s17 }
 0xc03   :  { %6792 = vrot.lane.b32.xlu1 %v15253_v20, %s16926_s17 }
 0xc06   :  { %7142 = vrot.lane.b32.xlu0 %v15314_v2, %s16926_s17 }
 0xc07   :  { %6879 = vrot.lane.b32.xlu1 %v5659_v29, %s16926_s17 }
 0xc0a   :  { %7140 = vrot.lane.b32.xlu0 %v15307_v48, %s16926_s17 }
 0xc0b   :  { %7055 = vrot.lane.b32.xlu1 %v15312_v61, %s16926_s17 }
 0xc0e   :  { %7316 = vrot.lane.b32.xlu0 %v15321_v47, %s16926_s17 }
 0xc0f   :  { %7053 = vrot.lane.b32.xlu1 %v15298_v11, %s16926_s17 }
 0xc12   :  { %7314 = vrot.lane.b32.xlu0 %v15333_v13, %s16926_s17 }
 0xc13   :  { %7229 = vrot.lane.b32.xlu1 %v15327_v50, %s16926_s17 }
 0xc17   :  { %7227 = vrot.lane.b32.xlu1 %v15319_v25, %s16926_s17 }
 0xc1b   :  { %7401 = vrot.lane.b32.xlu1 %v15351_v38, %s16926_s17 }
 0xc1f   :  { %7403 = vrot.lane.b32.xlu1 %v15342_v19, %s16926_s17 }
 0xc48   :  { %v5792_v1 = vpop.permute.xlu1 %5791 }
 0xc49   :  { %12698 = vmatprep.subr.msk.mxu1 %vm269_vm2, %v5792_v1 }
 0xc4a   :  { %12699 = vmatpush3.xpose.msk.msra.mxu1 %vm269_vm2, %v5792_v1 }
 0xc4c   :  { %v5790_v58 = vpop.permute.xlu1 %5789  ;;  %v5879_v32 = vpop.permute.xlu0 %5878 }
 0xc4d   :  { %12700 = vmatprep.subr.msk.mxu1 %vm269_vm2, %v5790_v58  ;;  %12705 = vmatprep.subr.msk.mxu0 %vm269_vm2, %v5879_v32 }
 0xc4e   :  { %12701 = vmatpush3.xpose.msk.msra.mxu1 %vm269_vm2, %v5790_v58  ;;  %12706 = vmatpush3.xpose.msk.msra.mxu0 %vm269_vm2, %v5879_v32 }
 0xc50   :  { %v5966_v24 = vpop.permute.xlu1 %5965  ;;  %v5877_v12 = vpop.permute.xlu0 %5876 }
 0xc51   :  { %12703 = vmatmul.mubr.msk.f32.vlgmr.msra.gmra.mxu1 %vm269_vm2, %v15301_v9  ;;  %12707 = vmatprep.subr.msk.mxu0 %vm269_vm2, %v5877_v12 }
 0xc52   :  { %12712 = vmatprep.subr.msk.mxu1 %vm269_vm2, %v5966_v24  ;;  %12708 = vmatpush3.xpose.msk.msra.mxu0 %vm269_vm2, %v5877_v12 }
 0xc53   :  { %12713 = vmatpush3.xpose.msk.msra.mxu1 %vm269_vm2, %v5966_v24  ;;  %12716 = vmatprep.mubr.msk.f32.mxu1 %vm269_vm2, %v15298_v11 }
 0xc54   :  { %v5964_v54 = vpop.permute.xlu1 %5963  ;;  %v6053_v53 = vpop.permute.xlu0 %6052 }
 0xc55   :  { %12710 = vmatmul.mubr.msk.f32.vlgmr.msra.gmra.mxu0 %vm269_vm2, %v15305_v40  ;;  %12714 = vmatprep.subr.msk.mxu1 %vm269_vm2, %v5964_v54 }
 0xc56   :  { %12719 = vmatprep.subr.msk.mxu0 %vm269_vm2, %v6053_v53  ;;  %12723 = vmatprep.mubr.msk.f32.mxu0 %vm269_vm2, %v15307_v48 }
 0xc57   :  { %12715 = vmatpush3.xpose.msk.msra.mxu1 %vm269_vm2, %v5964_v54  ;;  %12720 = vmatpush3.xpose.msk.msra.mxu0 %vm269_vm2, %v6053_v53 }
 0xc58   :  { %v6140_v63 = vpop.permute.xlu1 %6139  ;;  %v6051_v14 = vpop.permute.xlu0 %6050 }
 0xc59   :  { %12721 = vmatprep.subr.msk.mxu0 %vm269_vm2, %v6051_v14  ;;  %12726 = vmatprep.subr.msk.mxu1 %vm269_vm2, %v6140_v63 }
 0xc5a   :  { %12717 = vmatmul.mubr.msk.f32.vlgmr.msra.gmra.mxu1 %vm269_vm2, %v15312_v61 }
 0xc5b   :  { %12722 = vmatpush3.xpose.msk.msra.mxu0 %vm269_vm2, %v6051_v14  ;;  %12727 = vmatpush3.xpose.msk.msra.mxu1 %vm269_vm2, %v6140_v63 }
 0xc5c   :  { %12730 = vmatprep.mubr.msk.f32.mxu1 %vm269_vm2, %v15319_v25  ;;  %v6138_v36 = vpop.permute.xlu1 %6137  ;;  %v6227_v20 = vpop.permute.xlu0 %6226 }
 0xc5d   :  { %12728 = vmatprep.subr.msk.mxu1 %vm269_vm2, %v6138_v36  ;;  %12733 = vmatprep.subr.msk.mxu0 %vm269_vm2, %v6227_v20 }
 0xc5e   :  { %12724 = vmatmul.mubr.msk.f32.vlgmr.msra.gmra.mxu0 %vm269_vm2, %v15314_v2  ;;  %v15481_v2 = vld [vmem:[%s16863_s1 + $0x8] sm:$0xff] }
 0xc5f   :  { %12729 = vmatpush3.xpose.msk.msra.mxu1 %vm269_vm2, %v6138_v36  ;;  %12734 = vmatpush3.xpose.msk.msra.mxu0 %vm269_vm2, %v6227_v20 }
 0xc60   :  { %12737 = vmatprep.mubr.msk.f32.mxu0 %vm269_vm2, %v15333_v13  ;;  %v6225_v30 = vpop.permute.xlu0 %6224 }
 0xc61   :  { %v6314_v6 = vpop.permute.xlu1 %6313  ;;  %12735 = vmatprep.subr.msk.mxu0 %vm269_vm2, %v6225_v30 }
 0xc62   :  { %12731 = vmatmul.mubr.msk.f32.vlgmr.msra.gmra.mxu1 %vm269_vm2, %v15327_v50  ;;  %12740 = vmatprep.subr.msk.mxu1 %vm269_vm2, %v6314_v6  ;;  %v15489_v50 = vld [vmem:[%s16863_s1] sm:$0xff]  ;;  %s16928_s1 = smov 6  }
 0xc63   :  { %12736 = vmatpush3.xpose.msk.msra.mxu0 %vm269_vm2, %v6225_v30  ;;  %12744 = vmatprep.mubr.msk.f32.mxu1 %vm269_vm2, %v15351_v38 }
 0xc64   :  { %12741 = vmatpush3.xpose.msk.msra.mxu1 %vm269_vm2, %v6314_v6  ;;  %v6401_v27 = vpop.permute.xlu0 %6400 }
 0xc65   :  { %v6312_v39 = vpop.permute.xlu1 %6311  ;;  %12747 = vmatprep.subr.msk.mxu0 %vm269_vm2, %v6401_v27 }
 0xc66   :  { %12738 = vmatmul.mubr.msk.f32.vlgmr.msra.gmra.mxu0 %vm269_vm2, %v15321_v47  ;;  %12742 = vmatprep.subr.msk.mxu1 %vm269_vm2, %v6312_v39 }
 0xc67   :  { %12748 = vmatpush3.xpose.msk.msra.mxu0 %vm269_vm2, %v6401_v27  ;;  %12751 = vmatprep.mubr.msk.f32.mxu0 %vm269_vm2, %v15348_v0 }
 0xc68   :  { %12743 = vmatpush3.xpose.msk.msra.mxu1 %vm269_vm2, %v6312_v39  ;;  %v6399_v34 = vpop.permute.xlu0 %6398 }
 0xc69   :  { %v6488_v45 = vpop.permute.xlu1 %6487  ;;  %12749 = vmatprep.subr.msk.mxu0 %vm269_vm2, %v6399_v34 }
 0xc6a   :  { %12754 = vmatprep.subr.msk.mxu1 %vm269_vm2, %v6488_v45 }
 0xc6b   :  { %12745 = vmatmul.mubr.msk.f32.vlgmr.msra.gmra.mxu1 %vm269_vm2, %v15342_v19  ;;  %12750 = vmatpush3.xpose.msk.msra.mxu0 %vm269_vm2, %v6399_v34 }
 0xc6c   :  { %12755 = vmatpush3.xpose.msk.msra.mxu1 %vm269_vm2, %v6488_v45  ;;  %12758 = vmatprep.mubr.msk.f32.mxu1 %vm269_vm2, %v15365_v23  ;;  %v6882_v11 = vpop.permute.xlu0 %6881 }
 0xc6d   :  { %v6486_v52 = vpop.permute.xlu1 %6485 }
 0xc6e   :  { %12752 = vmatmul.mubr.msk.f32.vlgmr.msra.gmra.mxu0 %vm269_vm2, %v15339_v43  ;;  %12756 = vmatprep.subr.msk.mxu1 %vm269_vm2, %v6486_v52 }
 0xc70   :  { %12757 = vmatpush3.xpose.msk.msra.mxu1 %vm269_vm2, %v6486_v52  ;;  %v15472_v33 = vpop.permute.xlu0 %6968 }
 0xc71   :  { %12768 = vmatprep.subr.mxu1 %v6882_v11  ;;  %v6795_v29 = vpop.permute.xlu1 %6794 }
 0xc72   :  { %12761 = vmatprep.subr.mxu0 %v6795_v29 }
 0xc73   :  { %12759 = vmatmul.mubr.msk.f32.vlgmr.msra.gmra.mxu1 %vm269_vm2, %v15357_v18  ;;  %12762 = vmatpush3.msra.mxu0 %v6795_v29 }
 0xc74   :  { %12769 = vmatpush3.msra.mxu1 %v6882_v11 }
 0xc75   :  { %v6793_v9 = vpop.permute.xlu1 %6792 }
 0xc76   :  { %12763 = vmatprep.subr.mxu0 %v6793_v9 }
 0xc77   :  { %12764 = vmatpush3.msra.mxu0 %v6793_v9 }
 0xc78   :  { %12775 = vmatprep.subr.mxu0 %v15472_v33 }
 0xc79   :  { %v6880_v40 = vpop.permute.xlu1 %6879 }
 0xc7a   :  { %12770 = vmatprep.subr.mxu1 %v6880_v40 }
 0xc7b   :  { %12771 = vmatpush3.msra.mxu1 %v6880_v40 }
 0xc7d   :  { %v15475_v48 = vpop.permute.xlu1 %7055 }
 0xc7e   :  { %12782 = vmatprep.subr.mxu1 %v15475_v48 }
 0xcbe   :  { %v12697_v61 = vpop.f32.mrf.mxu0 }
 0xcbf   :  { %v15484_v25 = vadd.f32 %v15481_v2, %v12697_v61 }
 0xcc0   :  { %v5780_v47 = vpop.f32.mrf.mxu0 }
 0xcc1   :  { %v15492_v4 = vadd.f32 %v15489_v50, %v5780_v47  ;;  %v6575_v13 = vsel %vm1136_vm4, %v15484_v25, -inf }
 0xcc2   :  { %6576 = vmax.xlane.f32.xlu1 %v6575_v13 }
 0xcc3   :  { %v6572_v26 = vsel %vm1136_vm4, %v15492_v4, -inf }
 0xcc4   :  { %6573 = vmax.xlane.f32.xlu0 %v6572_v26 }
 0xd11   :  { %v12704_v5 = vpop.f32.mrf.mxu1 }
 0xd12   :  { %v15499_v19 = vadd.f32 %v15481_v2, %v12704_v5 }
 0xd13   :  { %v5867_v38 = vpop.f32.mrf.mxu1 }
 0xd14   :  { %v6581_v15 = vsel %vm1136_vm4, %v15499_v19, -inf  ;;  %v15507_v58 = vadd.f32 %v15489_v50, %v5867_v38 }
 0xd15   :  { %v12711_v59 = vpop.f32.mrf.mxu0  ;;  %6582 = vmax.xlane.f32.xlu0 %v6581_v15 }
 0xd16   :  { %v15504_v3 = vadd.f32 %v15481_v2, %v12711_v59  ;;  %v6578_v14 = vsel %vm1136_vm4, %v15507_v58, -inf }
 0xd17   :  { %v5954_v1 = vpop.f32.mrf.mxu0 }
 0xd18   :  { %v15510_v32 = vadd.f32 %v15489_v50, %v5954_v1  ;;  %v6587_v24 = vsel %vm1136_vm4, %v15504_v3, -inf }
 0xd19   :  { %6588 = vmax.xlane.f32.xlu0 %v6587_v24 }
 0xd1a   :  { %v12718_v12 = vpop.f32.mrf.mxu1  ;;  %v6584_v54 = vsel %vm1136_vm4, %v15510_v32, -inf }
 0xd1b   :  { %6585 = vmax.xlane.f32.xlu1 %v6584_v54  ;;  %v15517_v53 = vadd.f32 %v15481_v2, %v12718_v12 }
 0xd1c   :  { %v6041_v63 = vpop.f32.mrf.mxu1 }
 0xd1d   :  { %v15522_v36 = vadd.f32 %v15489_v50, %v6041_v63  ;;  %6579 = vmax.xlane.f32.xlu0 %v6578_v14  ;;  %v6593_v39 = vsel %vm1136_vm4, %v15517_v53, -inf }
 0xd1e   :  { %v12725_v20 = vpop.f32.mrf.mxu0 }
 0xd1f   :  { %v6590_v30 = vsel %vm1136_vm4, %v15522_v36, -inf  ;;  %v15527_v6 = vadd.f32 %v15481_v2, %v12725_v20 }
 0xd20   :  { %v6128_v27 = vpop.f32.mrf.mxu0  ;;  %6591 = vmax.xlane.f32.xlu1 %v6590_v30 }
 0xd21   :  { %v15532_v34 = vadd.f32 %v15489_v50, %v6128_v27  ;;  %6594 = vmax.xlane.f32.xlu0 %v6593_v39  ;;  %v6599_v9 = vsel %vm1136_vm4, %v15527_v6, -inf }
 0xd22   :  { %v12732_v45 = vpop.f32.mrf.mxu1 }
 0xd23   :  { %v6596_v52 = vsel %vm1136_vm4, %v15532_v34, -inf  ;;  %v15537_v11 = vadd.f32 %v15481_v2, %v12732_v45 }
 0xd24   :  { %v6215_v29 = vpop.f32.mrf.mxu1  ;;  %6597 = vmax.xlane.f32.xlu1 %v6596_v52 }
 0xd25   :  { %v15542_v40 = vadd.f32 %v15489_v50, %v6215_v29  ;;  %6600 = vmax.xlane.f32.xlu0 %v6599_v9  ;;  %v6605_v5 = vsel %vm1136_vm4, %v15537_v11, -inf }
 0xd26   :  { %v12739_v61 = vpop.f32.mrf.mxu0 }
 0xd27   :  { %v6602_v47 = vsel %vm1136_vm4, %v15542_v40, -inf  ;;  %v15547_v13 = vadd.f32 %v15481_v2, %v12739_v61  ;;  %v15581_v61 = vpop.permute.xlu1 %7053 }
 0xd28   :  { %v6302_v26 = vpop.f32.mrf.mxu0  ;;  %6603 = vmax.xlane.f32.xlu1 %v6602_v47 }
 0xd29   :  { %v15552_v15 = vadd.f32 %v15489_v50, %v6302_v26  ;;  %6606 = vmax.xlane.f32.xlu0 %v6605_v5  ;;  %v6611_v24 = vsel %vm1136_vm4, %v15547_v13, -inf  ;;  %v15583_v26 = vpop.permute.xlu0 %6966 }
 0xd2b   :  { %v12746_v38 = vpop.f32.mrf.mxu1  ;;  %v6608_v59 = vsel %vm1136_vm4, %v15552_v15, -inf }
 0xd2c   :  { %v15557_v1 = vadd.f32 %v15481_v2, %v12746_v38  ;;  %6609 = vmax.xlane.f32.xlu1 %v6608_v59  ;;  %v15592_v59 = vpop.permute.xlu1 %7229 }
 0xd2d   :  { %v6389_v12 = vpop.f32.mrf.mxu1  ;;  %6612 = vmax.xlane.f32.xlu0 %v6611_v24  ;;  %v15594_v24 = vpop.permute.xlu0 %7142 }
 0xd2e   :  { %v15562_v54 = vadd.f32 %v15489_v50, %v6389_v12  ;;  %v12753_v63 = vpop.f32.mrf.mxu0  ;;  %v6617_v27 = vsel %vm1136_vm4, %v15557_v1, -inf }
 0xd2f   :  { %v15565_v14 = vadd.f32 %v15481_v2, %v12753_v63 }
 0xd30   :  { %v6476_v20 = vpop.f32.mrf.mxu0  ;;  %v6614_v30 = vsel %vm1136_vm4, %v15562_v54, -inf  ;;  %v15596_v12 = vpop.permute.xlu1 %7227 }
 0xd31   :  { %v15572_v39 = vadd.f32 %v15489_v50, %v6476_v20  ;;  %6615 = vmax.xlane.f32.xlu1 %v6614_v30  ;;  %6618 = vmax.xlane.f32.xlu0 %v6617_v27  ;;  %v6623_v9 = vsel %vm1136_vm4, %v15565_v14, -inf  ;;  %v15598_v63 = vpop.permute.xlu0 %7140 }
 0xd33   :  { %v12760_v45 = vpop.f32.mrf.mxu1  ;;  %v6620_v52 = vsel %vm1136_vm4, %v15572_v39, -inf }
 0xd34   :  { %v15577_v29 = vadd.f32 %v15481_v2, %v12760_v45  ;;  %v15600_v20 = vpop.permute.xlu1 %7401 }
 0xd35   :  { %v6563_v47 = vpop.f32.mrf.mxu1  ;;  %6621 = vmax.xlane.f32.xlu1 %v6620_v52  ;;  %6624 = vmax.xlane.f32.xlu0 %v6623_v9 }
 0xd36   :  { %v15586_v5 = vadd.f32 %v15489_v50, %v6563_v47  ;;  %v6629_v2 = vsel %vm1136_vm4, %v15577_v29, -inf  ;;  %v15602_v50 = vpop.permute.xlu0 %7316 }
 0xd38   :  { %v6626_v38 = vsel %vm1136_vm4, %v15586_v5, -inf  ;;  %v15606_v30 = vpop.permute.xlu1 %7403 }
 0xd39   :  { %6627 = vmax.xlane.f32.xlu1 %v6626_v38  ;;  %6630 = vmax.xlane.f32.xlu0 %v6629_v2 }
 0xd3a   :  { %v15608_v27 = vpop.permute.xlu0 %7314 }
 0xd4a   :  { %7577 = vrot.lane.b32.xlu1 %v15357_v18, %s16926_s17 }
 0xd4b   :  { %v6577_v45 = vpop.xlane.xlu1 %6576 }
 0xd4c   :  { %v6633_v9 = vsub.f32 %v15484_v25, %v6577_v45 }
 0xd4d   :  { %v6574_v52 = vpop.xlane.xlu0 %6573 }
 0xd4e   :  { %v6632_v47 = vsub.f32 %v15492_v4, %v6574_v52  ;;  %v6654_v38 = vmul.f32 1.442695, %v6633_v9 }
 0xd4f   :  { %7490 = vrot.lane.b32.xlu0 %v15339_v43, %s16926_s17 }
 0xd50   :  { %v6652_v2 = vmul.f32 1.442695, %v6632_v47  ;;  %13223 = vpow2.f32 %v6654_v38 }
 0xd52   :  { %13225 = vpow2.f32 %v6652_v2 }
 0xd5d   :  { %v15614_v16 = vpop.eup %13223 }
 0xd5e   :  { %v6695_v43 = vsel %vm1136_vm4, %v15614_v16, 0.0 }
 0xd5f   :  { %v15616_v18 = vpop.eup %13225 }
 0xd60   :  { %v6692_v44 = vsel %vm1136_vm4, %v15616_v18, 0.0 }
 0xd6e   :  { %6693 = vadd.xlane.f32.xlu1 %v6692_v44  ;;  %6696 = vadd.xlane.f32.xlu0 %v6695_v43 }
 0xd9e   :  { %v6583_v28 = vpop.xlane.xlu0 %6582 }
 0xd9f   :  { %v6635_v25 = vsub.f32 %v15499_v19, %v6583_v28 }
 0xda1   :  { %v6658_v4 = vmul.f32 1.442695, %v6635_v25 }
 0xda2   :  { %v6589_v45 = vpop.xlane.xlu0 %6588 }
 0xda3   :  { %13227 = vpow2.f32 %v6658_v4  ;;  %v6637_v52 = vsub.f32 %v15504_v3, %v6589_v45 }
 0xda4   :  { %v6586_v9 = vpop.xlane.xlu1 %6585 }
 0xda5   :  { %v6662_v47 = vmul.f32 1.442695, %v6637_v52  ;;  %v6636_v38 = vsub.f32 %v15510_v32, %v6586_v9 }
 0xda6   :  { %v6580_v2 = vpop.xlane.xlu0 %6579 }
 0xda7   :  { %13229 = vpow2.f32 %v6662_v47  ;;  %v6634_v17 = vsub.f32 %v15507_v58, %v6580_v2  ;;  %v6660_v55 = vmul.f32 1.442695, %v6636_v38 }
 0xda9   :  { %v6656_v62 = vmul.f32 1.442695, %v6634_v17  ;;  %v6592_v44 = vpop.xlane.xlu1 %6591 }
 0xdaa   :  { %v6638_v43 = vsub.f32 %v15522_v36, %v6592_v44  ;;  %v6595_v41 = vpop.xlane.xlu0 %6594 }
 0xdab   :  { %13231 = vpow2.f32 %v6656_v62  ;;  %v6639_v28 = vsub.f32 %v15517_v53, %v6595_v41 }
 0xdac   :  { %13233 = vpow2.f32 %v6660_v55  ;;  %v6664_v19 = vmul.f32 1.442695, %v6638_v43 }
 0xdad   :  { %v6666_v3 = vmul.f32 1.442695, %v6639_v28  ;;  %v6598_v25 = vpop.xlane.xlu1 %6597 }
 0xdae   :  { %v6640_v4 = vsub.f32 %v15532_v34, %v6598_v25  ;;  %v6601_v32 = vpop.xlane.xlu0 %6600 }
 0xdaf   :  { %13235 = vpow2.f32 %v6666_v3  ;;  %v6641_v45 = vsub.f32 %v15527_v6, %v6601_v32 }
 0xdb0   :  { %v15630_v58 = vpop.eup %13227  ;;  %13237 = vpow2.f32 %v6664_v19  ;;  %v6668_v17 = vmul.f32 1.442695, %v6640_v4 }
 0xdb1   :  { %v6670_v52 = vmul.f32 1.442695, %v6641_v45  ;;  %v6604_v36 = vpop.xlane.xlu1 %6603  ;;  %v6701_v62 = vsel %vm1136_vm4, %v15630_v58, 0.0 }
 0xdb2   :  { %v6642_v41 = vsub.f32 %v15542_v40, %v6604_v36  ;;  %6702 = vadd.xlane.f32.xlu0 %v6701_v62  ;;  %v6607_v55 = vpop.xlane.xlu0 %6606 }
 0xdb3   :  { %13239 = vpow2.f32 %v6670_v52  ;;  %v6643_v53 = vsub.f32 %v15537_v11, %v6607_v55 }
 0xdb4   :  { %v15636_v34 = vpop.eup %13229  ;;  %13241 = vpow2.f32 %v6668_v17  ;;  %v6672_v6 = vmul.f32 1.442695, %v6642_v41 }
 0xdb5   :  { %v6674_v9 = vmul.f32 1.442695, %v6643_v53  ;;  %v6610_v47 = vpop.xlane.xlu1 %6609  ;;  %v6707_v38 = vsel %vm1136_vm4, %v15636_v34, 0.0 }
 0xdb6   :  { %v6644_v2 = vsub.f32 %v15552_v15, %v6610_v47  ;;  %6708 = vadd.xlane.f32.xlu0 %v6707_v38  ;;  %v6613_v44 = vpop.xlane.xlu0 %6612 }
 0xdb7   :  { %13243 = vpow2.f32 %v6674_v9  ;;  %v6645_v40 = vsub.f32 %v15547_v13, %v6613_v44 }
 0xdb8   :  { %v15642_v43 = vpop.eup %13231  ;;  %13245 = vpow2.f32 %v6672_v6  ;;  %v6676_v11 = vmul.f32 1.442695, %v6644_v2 }
 0xdb9   :  { %v15644_v28 = vpop.eup %13233  ;;  %v6678_v19 = vmul.f32 1.442695, %v6645_v40  ;;  %v6698_v3 = vsel %vm1136_vm4, %v15642_v43, 0.0 }
 0xdba   :  { %v6616_v25 = vpop.xlane.xlu1 %6615  ;;  %6699 = vadd.xlane.f32.xlu1 %v6698_v3  ;;  %v6619_v4 = vpop.xlane.xlu0 %6618  ;;  %v6704_v13 = vsel %vm1136_vm4, %v15644_v28, 0.0 }
 0xdbb   :  { %13247 = vpow2.f32 %v6678_v19  ;;  %v6646_v15 = vsub.f32 %v15562_v54, %v6616_v25  ;;  %v6647_v32 = vsub.f32 %v15557_v1, %v6619_v4 }
 0xdbc   :  { %v15650_v45 = vpop.eup %13235  ;;  %13249 = vpow2.f32 %v6676_v11 }
 0xdbd   :  { %v15654_v17 = vpop.eup %13237  ;;  %v6680_v52 = vmul.f32 1.442695, %v6646_v15  ;;  %v6682_v36 = vmul.f32 1.442695, %v6647_v32  ;;  %v6713_v62 = vsel %vm1136_vm4, %v15650_v45, 0.0 }
 0xdbe   :  { %v6622_v41 = vpop.xlane.xlu1 %6621  ;;  %6705 = vadd.xlane.f32.xlu1 %v6704_v13  ;;  %6714 = vadd.xlane.f32.xlu0 %v6713_v62  ;;  %v6625_v55 = vpop.xlane.xlu0 %6624  ;;  %v6710_v6 = vsel %vm1136_vm4, %v15654_v17, 0.0 }
 0xdbf   :  { %v6648_v54 = vsub.f32 %v15572_v39, %v6622_v41  ;;  %v6649_v1 = vsub.f32 %v15565_v14, %v6625_v55  ;;  %13251 = vpow2.f32 %v6682_v36 }
 0xdc0   :  { %v15660_v53 = vpop.eup %13239  ;;  %13253 = vpow2.f32 %v6680_v52 }
 0xdc1   :  { %v15664_v9 = vpop.eup %13241  ;;  %v6684_v47 = vmul.f32 1.442695, %v6648_v54  ;;  %v6686_v38 = vmul.f32 1.442695, %v6649_v1  ;;  %v6719_v2 = vsel %vm1136_vm4, %v15660_v53, 0.0 }
 0xdc2   :  { %v6628_v44 = vpop.xlane.xlu1 %6627  ;;  %6711 = vadd.xlane.f32.xlu1 %v6710_v6  ;;  %6720 = vadd.xlane.f32.xlu0 %v6719_v2  ;;  %v6631_v39 = vpop.xlane.xlu0 %6630  ;;  %v6716_v19 = vsel %vm1136_vm4, %v15664_v9, 0.0 }
 0xdc3   :  { %v6650_v14 = vsub.f32 %v15586_v5, %v6628_v44  ;;  %v6651_v40 = vsub.f32 %v15577_v29, %v6631_v39  ;;  %13255 = vpow2.f32 %v6686_v38 }
 0xdc4   :  { %v15670_v11 = vpop.eup %13243  ;;  %13257 = vpow2.f32 %v6684_v47 }
 0xdc5   :  { %v6688_v3 = vmul.f32 1.442695, %v6650_v14  ;;  %v6690_v25 = vmul.f32 1.442695, %v6651_v40  ;;  %v6725_v4 = vsel %vm1136_vm4, %v15670_v11, 0.0  ;;  %v15676_v15 = vpop.eup %13245 }
 0xdc6   :  { %6717 = vadd.xlane.f32.xlu1 %v6716_v19  ;;  %6726 = vadd.xlane.f32.xlu0 %v6725_v4  ;;  %v6722_v29 = vsel %vm1136_vm4, %v15676_v15, 0.0  ;;  %v15716_v14 = vpop.permute.xlu1 %7577  ;;  %v15718_v40 = vpop.permute.xlu0 %7490 }
 0xdc7   :  { %13259 = vpow2.f32 %v6690_v25 }
 0xdc8   :  { %v15678_v32 = vpop.eup %13247  ;;  %13261 = vpow2.f32 %v6688_v3 }
 0xdc9   :  { %v6731_v5 = vsel %vm1136_vm4, %v15678_v32, 0.0  ;;  %v15684_v13 = vpop.eup %13249 }
 0xdca   :  { %6723 = vadd.xlane.f32.xlu1 %v6722_v29  ;;  %6732 = vadd.xlane.f32.xlu0 %v6731_v5  ;;  %v6728_v36 = vsel %vm1136_vm4, %v15684_v13, 0.0 }
 0xdcc   :  { %v15686_v52 = vpop.eup %13251 }
 0xdcd   :  { %v15690_v62 = vpop.eup %13253  ;;  %v6737_v41 = vsel %vm1136_vm4, %v15686_v52, 0.0 }
 0xdce   :  { %6729 = vadd.xlane.f32.xlu1 %v6728_v36  ;;  %6738 = vadd.xlane.f32.xlu0 %v6737_v41  ;;  %v6734_v54 = vsel %vm1136_vm4, %v15690_v62, 0.0 }
 0xdd0   :  { %v15694_v55 = vpop.eup %13255 }
 0xdd1   :  { %v15698_v1 = vpop.eup %13257  ;;  %v6743_v6 = vsel %vm1136_vm4, %v15694_v55, 0.0 }
 0xdd2   :  { %6735 = vadd.xlane.f32.xlu1 %v6734_v54  ;;  %6744 = vadd.xlane.f32.xlu0 %v6743_v6  ;;  %v6740_v38 = vsel %vm1136_vm4, %v15698_v1, 0.0 }
 0xdd4   :  { %v15702_v47 = vpop.eup %13259 }
 0xdd5   :  { %v15706_v2 = vpop.eup %13261  ;;  %v6749_v44 = vsel %vm1136_vm4, %v15702_v47, 0.0 }
 0xdd6   :  { %6741 = vadd.xlane.f32.xlu1 %v6740_v38  ;;  %6750 = vadd.xlane.f32.xlu0 %v6749_v44  ;;  %v6746_v39 = vsel %vm1136_vm4, %v15706_v2, 0.0 }
 0xdda   :  { %6747 = vadd.xlane.f32.xlu1 %v6746_v39 }
 0xdeb   :  { %7575 = vrot.lane.b32.xlu1 %v15365_v23, %s16926_s17 }
 0xdec   :  { %7488 = vrot.lane.b32.xlu0 %v15348_v0, %s16926_s17  ;;  %s16932_s17 = smov 30  }
 0xdf7   :  { %v6694_v19 = vpop.xlane.xlu1 %6693  ;;  %v6697_v3 = vpop.xlane.xlu0 %6696 }
 0xdf8   :  { %13263 = vrcp.f32 %v6694_v19 }
 0xdf9   :  { %13265 = vrcp.f32 %v6697_v3 }
 0xe05   :  { %v13264_v25 = vpop.eup %13263 }
 0xe06   :  { %v13266_v4 = vpop.eup %13265  ;;  %v6772_v29 = vmul.f32 %v13264_v25, %v15616_v18 }
 0xe07   :  { %v6773_v5 = vmul.f32 %v13266_v4, %v15614_v16 }
 0xe08   :  { %12765 = vmatprep.mubr.msk.f32.mxu0 %vm1136_vm4, %v6772_v29 }
 0xe09   :  { %12766 = vmatmul.mubr.msk.f32.vlgmr.msra.gmra.mxu0 %vm1136_vm4, %v6773_v5 }
 0xe0a   :  { %12776 = vmatpush3.msra.mxu0 %v15472_v33 }
 0xe0b   :  { %12777 = vmatprep.subr.mxu0 %v15583_v26 }
 0xe0c   :  { %12778 = vmatpush3.msra.mxu0 %v15583_v26 }
 0xe0d   :  { %12789 = vmatprep.subr.mxu0 %v15594_v24 }
 0xe3b   :  { %v6703_v0 = vpop.xlane.xlu0 %6702 }
 0xe3c   :  { %13267 = vrcp.f32 %v6703_v0 }
 0xe3f   :  { %v6709_v23 = vpop.xlane.xlu0 %6708 }
 0xe43   :  { %v6700_v36 = vpop.xlane.xlu1 %6699 }
 0xe44   :  { %13269 = vrcp.f32 %v6700_v36 }
 0xe45   :  { %13271 = vrcp.f32 %v6709_v23 }
 0xe47   :  { %v6706_v18 = vpop.xlane.xlu1 %6705  ;;  %v6715_v16 = vpop.xlane.xlu0 %6714 }
 0xe48   :  { %13273 = vrcp.f32 %v6706_v18 }
 0xe49   :  { %13275 = vrcp.f32 %v6715_v16  ;;  %v13268_v38 = vpop.eup %13267 }
 0xe4a   :  { %v6775_v3 = vmul.f32 %v13268_v38, %v15630_v58 }
 0xe4b   :  { %v6712_v41 = vpop.xlane.xlu1 %6711  ;;  %v6721_v54 = vpop.xlane.xlu0 %6720 }
 0xe4c   :  { %13277 = vrcp.f32 %v6712_v41 }
 0xe4d   :  { %13279 = vrcp.f32 %v6721_v54 }
 0xe4f   :  { %v6718_v33 = vpop.xlane.xlu1 %6717  ;;  %v6727_v6 = vpop.xlane.xlu0 %6726 }
 0xe50   :  { %13281 = vrcp.f32 %v6718_v33 }
 0xe51   :  { %v13270_v26 = vpop.eup %13269  ;;  %13283 = vrcp.f32 %v6727_v6 }
 0xe52   :  { %v6774_v44 = vmul.f32 %v13270_v26, %v15642_v43  ;;  %v13272_v25 = vpop.eup %13271 }
 0xe53   :  { %v6724_v39 = vpop.xlane.xlu1 %6723  ;;  %v6733_v19 = vpop.xlane.xlu0 %6732  ;;  %v6777_v5 = vmul.f32 %v13272_v25, %v15636_v34  ;;  %v11454_v25 = vld [vmem:[%s16866_s4 + $0x78] sm:$0xf] }
 0xe54   :  { %13285 = vrcp.f32 %v6724_v39  ;;  %12772 = vmatprep.mubr.msk.f32.mxu1 %vm1136_vm4, %v6774_v44 }
 0xe55   :  { %v13274_v4 = vpop.eup %13273  ;;  %12773 = vmatmul.mubr.msk.f32.vlgmr.msra.gmra.mxu1 %vm1136_vm4, %v6775_v3  ;;  %13287 = vrcp.f32 %v6733_v19 }
 0xe56   :  { %12783 = vmatpush3.msra.mxu1 %v15475_v48  ;;  %v6776_v29 = vmul.f32 %v13274_v4, %v15644_v28  ;;  %v13276_v0 = vpop.eup %13275 }
 0xe57   :  { %12784 = vmatprep.subr.mxu1 %v15581_v61  ;;  %v6730_v43 = vpop.xlane.xlu1 %6729  ;;  %v6739_v58 = vpop.xlane.xlu0 %6738  ;;  %v6779_v28 = vmul.f32 %v13276_v0, %v15650_v45 }
 0xe58   :  { %13289 = vrcp.f32 %v6730_v43  ;;  %12785 = vmatpush3.msra.mxu1 %v15581_v61  ;;  %12779 = vmatprep.mubr.msk.f32.mxu0 %vm1136_vm4, %v6776_v29  ;;  %v11453_v29 = vld [vmem:[%s16866_s4 + $0x70] sm:$0xff] }
 0xe59   :  { %v13278_v23 = vpop.eup %13277  ;;  %12796 = vmatprep.subr.mxu1 %v15592_v59  ;;  %12780 = vmatmul.mubr.msk.f32.vlgmr.msra.gmra.mxu0 %vm1136_vm4, %v6777_v5  ;;  %13291 = vrcp.f32 %v6739_v58  ;;  %v11452_v5 = vld [vmem:[%s16866_s4 + $0x68] sm:$0xff]  ;;  %v11451_v58 = vld [vmem:[%s16866_s4 + $0x60] sm:$0xff] }
 0xe5a   :  { %12790 = vmatpush3.msra.mxu0 %v15594_v24  ;;  %v6778_v48 = vmul.f32 %v13278_v23, %v15654_v17  ;;  %v13280_v36 = vpop.eup %13279 }
 0xe5b   :  { %12791 = vmatprep.subr.mxu0 %v15598_v63  ;;  %v6736_v34 = vpop.xlane.xlu1 %6735  ;;  %v6745_v61 = vpop.xlane.xlu0 %6744  ;;  %v6781_v17 = vmul.f32 %v13280_v36, %v15660_v53 }
 0xe5c   :  { %13293 = vrcp.f32 %v6736_v34  ;;  %12792 = vmatpush3.msra.mxu0 %v15598_v63  ;;  %12786 = vmatprep.mubr.msk.f32.mxu1 %vm1136_vm4, %v6778_v48  ;;  %v11450_v48 = vld [vmem:[%s16866_s4 + $0x58] sm:$0xff] }
 0xe5d   :  { %v13282_v18 = vpop.eup %13281  ;;  %12803 = vmatprep.subr.mxu0 %v15602_v50  ;;  %12787 = vmatmul.mubr.msk.f32.vlgmr.msra.gmra.mxu1 %vm1136_vm4, %v6779_v28  ;;  %13295 = vrcp.f32 %v6745_v61  ;;  %v11449_v28 = vld [vmem:[%s16866_s4 + $0x50] sm:$0xff]  ;;  %v11448_v61 = vld [vmem:[%s16866_s4 + $0x48] sm:$0xff] }
 0xe5e   :  { %12797 = vmatpush3.msra.mxu1 %v15592_v59  ;;  %v6780_v24 = vmul.f32 %v13282_v18, %v15664_v9  ;;  %v13284_v16 = vpop.eup %13283 }
 0xe5f   :  { %12798 = vmatprep.subr.mxu1 %v15596_v12  ;;  %v6742_v45 = vpop.xlane.xlu1 %6741  ;;  %v6751_v63 = vpop.xlane.xlu0 %6750  ;;  %v6783_v9 = vmul.f32 %v13284_v16, %v15670_v11 }
 0xe60   :  { %13297 = vrcp.f32 %v6742_v45  ;;  %12799 = vmatpush3.msra.mxu1 %v15596_v12  ;;  %12793 = vmatprep.mubr.msk.f32.mxu0 %vm1136_vm4, %v6780_v24  ;;  %v11447_v24 = vld [vmem:[%s16866_s4 + $0x40] sm:$0xff] }
 0xe61   :  { %v13286_v41 = vpop.eup %13285  ;;  %12810 = vmatprep.subr.mxu1 %v15606_v30  ;;  %12794 = vmatmul.mubr.msk.f32.vlgmr.msra.gmra.mxu0 %vm1136_vm4, %v6781_v17  ;;  %13299 = vrcp.f32 %v6751_v63 }
 0xe62   :  { %12804 = vmatpush3.msra.mxu0 %v15602_v50  ;;  %v6782_v59 = vmul.f32 %v13286_v41, %v15676_v15  ;;  %v13288_v54 = vpop.eup %13287 }
 0xe63   :  { %12805 = vmatprep.subr.mxu0 %v15608_v27  ;;  %v6748_v53 = vpop.xlane.xlu1 %6747  ;;  %v6785_v15 = vmul.f32 %v13288_v54, %v15678_v32  ;;  %v7489_v33 = vpop.permute.xlu0 %7488 }
 0xe64   :  { %13301 = vrcp.f32 %v6748_v53  ;;  %12806 = vmatpush3.msra.mxu0 %v15608_v27  ;;  %12800 = vmatprep.mubr.msk.f32.mxu1 %vm1136_vm4, %v6782_v59 }
 0xe65   :  { %v13290_v12 = vpop.eup %13289  ;;  %12817 = vmatprep.subr.mxu0 %v15718_v40  ;;  %12801 = vmatmul.mubr.msk.f32.vlgmr.msra.gmra.mxu1 %vm1136_vm4, %v6783_v9 }
 0xe66   :  { %12811 = vmatpush3.msra.mxu1 %v15606_v30  ;;  %v6784_v50 = vmul.f32 %v13290_v12, %v15684_v13  ;;  %v13292_v11 = vpop.eup %13291 }
 0xe67   :  { %12812 = vmatprep.subr.mxu1 %v15600_v20  ;;  %v6787_v13 = vmul.f32 %v13292_v11, %v15686_v52  ;;  %v7576_v32 = vpop.permute.xlu1 %7575 }
 0xe68   :  { %12813 = vmatpush3.msra.mxu1 %v15600_v20  ;;  %12807 = vmatprep.mubr.msk.f32.mxu0 %vm1136_vm4, %v6784_v50 }
 0xe69   :  { %v13294_v27 = vpop.eup %13293  ;;  %12824 = vmatprep.subr.mxu1 %v15716_v14  ;;  %12808 = vmatmul.mubr.msk.f32.vlgmr.msra.gmra.mxu0 %vm1136_vm4, %v6785_v15 }
 0xe6a   :  { %12818 = vmatpush3.msra.mxu0 %v15718_v40  ;;  %v6786_v30 = vmul.f32 %v13294_v27, %v15690_v62  ;;  %v13296_v6 = vpop.eup %13295 }
 0xe6b   :  { %12819 = vmatprep.subr.mxu0 %v7489_v33  ;;  %v6789_v40 = vmul.f32 %v13296_v6, %v15694_v55 }
 0xe6c   :  { %12820 = vmatpush3.msra.mxu0 %v7489_v33  ;;  %12814 = vmatprep.mubr.msk.f32.mxu1 %vm1136_vm4, %v6786_v30 }
 0xe6d   :  { %v13298_v20 = vpop.eup %13297  ;;  %12815 = vmatmul.mubr.msk.f32.vlgmr.msra.gmra.mxu1 %vm1136_vm4, %v6787_v13  ;;  %12831 = vmatprep.subr.msk.mxu0 %vm134_vm0, %v11454_v25 }
 0xe6e   :  { %12825 = vmatpush3.msra.mxu1 %v15716_v14  ;;  %v6788_v38 = vmul.f32 %v13298_v20, %v15698_v1  ;;  %v13300_v26 = vpop.eup %13299  ;;  %v16927_v14 = vmov 0  }
 0xe6f   :  { %12826 = vmatprep.subr.mxu1 %v7576_v32  ;;  %v6791_v44 = vmul.f32 %v13300_v26, %v15702_v47 }
 0xe70   :  { %12827 = vmatpush3.msra.mxu1 %v7576_v32  ;;  %12821 = vmatprep.mubr.msk.f32.mxu0 %vm1136_vm4, %v6788_v38 }
 0xe71   :  { %v13302_v52 = vpop.eup %13301  ;;  %12822 = vmatmul.mubr.msk.f32.vlgmr.msra.gmra.mxu0 %vm1136_vm4, %v6789_v40 }
 0xe72   :  { %v6790_v62 = vmul.f32 %v13302_v52, %v15706_v2  ;;  %12832 = vmatpush3.msk.msra.mxu0 %vm134_vm0, %v11454_v25 }
 0xe73   :  { %12833 = vmatprep.subr.mxu0 %v11453_v29 }
 0xe74   :  { %12828 = vmatprep.mubr.msk.f32.mxu1 %vm1136_vm4, %v6790_v62  ;;  %12834 = vmatpush3.msra.mxu0 %v11453_v29 }
 0xe75   :  { %12829 = vmatmul.mubr.msk.f32.vlgmr.msra.gmra.mxu1 %vm1136_vm4, %v6791_v44  ;;  %12835 = vmatprep.subr.mxu0 %v11452_v5 }
 0xe76   :  { %8823 = vmatprep.mubr.bf16.mxu1 %v16927_v14  ;;  %12836 = vmatpush3.msra.mxu0 %v11452_v5 }
 0xe77   :  { %12837 = vmatprep.subr.mxu0 %v11451_v58 }
 0xe78   :  { %12838 = vmatpush3.msra.mxu0 %v11451_v58 }
 0xe79   :  { %12839 = vmatprep.subr.mxu0 %v11450_v48 }
 0xe7a   :  { %12840 = vmatpush3.msra.mxu0 %v11450_v48 }
 0xe7b   :  { %12841 = vmatprep.subr.mxu0 %v11449_v28 }
 0xe7c   :  { %12842 = vmatpush3.msra.mxu0 %v11449_v28 }
 0xe7d   :  { %12843 = vmatprep.subr.mxu0 %v11448_v61 }
 0xe7e   :  { %12844 = vmatpush3.msra.mxu0 %v11448_v61 }
 0xe7f   :  { %12845 = vmatprep.subr.mxu0 %v11447_v24 }
 0xe80   :  { %12846 = vmatpush3.msra.mxu0 %v11447_v24 }
 0xec9   :  { %v15787_v1 = vpop.f32.mrf.mxu0 }
 0xecb   :  { %v15790_v39 = vpop.f32.mrf.mxu0 }
 0xf15   :  { %v12774_v55 = vpop.f32.mrf.mxu1 }
 0xf16   :  { %7666 = vrot.lane.b32.xlu1 %v12774_v55, %s16928_s1 }
 0xf17   :  { %v6957_v19 = vpop.f32.mrf.mxu1 }
 0xf18   :  { %7664 = vrot.lane.b32.xlu0 %v6957_v19, %s16928_s1  ;;  %s16933_s1 = smov 36  }
 0xf19   :  { %v12781_v3 = vpop.f32.mrf.mxu0 }
 0xf1a   :  { %7674 = vrot.lane.b32.xlu1 %v12781_v3, %s16929_s30 }
 0xf1b   :  { %v7044_v47 = vpop.f32.mrf.mxu0 }
 0xf1c   :  { %7672 = vrot.lane.b32.xlu0 %v7044_v47, %s16929_s30 }
 0xf1d   :  { %v12788_v2 = vpop.f32.mrf.mxu1 }
 0xf1e   :  { %7682 = vrot.lane.b32.xlu1 %v12788_v2, %s16930_s29 }
 0xf1f   :  { %v7131_v4 = vpop.f32.mrf.mxu1 }
 0xf20   :  { %7680 = vrot.lane.b32.xlu0 %v7131_v4, %s16930_s29  ;;  %s16935_s29 = smov 48  }
 0xf21   :  { %v12795_v43 = vpop.f32.mrf.mxu0 }
 0xf22   :  { %7690 = vrot.lane.b32.xlu1 %v12795_v43, %s16931_s2 }
 0xf23   :  { %v7218_v0 = vpop.f32.mrf.mxu0 }
 0xf24   :  { %7688 = vrot.lane.b32.xlu0 %v7218_v0, %s16931_s2 }
 0xf25   :  { %v12802_v23 = vpop.f32.mrf.mxu1 }
 0xf26   :  { %7698 = vrot.lane.b32.xlu1 %v12802_v23, %s16932_s17 }
 0xf27   :  { %v7305_v34 = vpop.f32.mrf.mxu1 }
 0xf28   :  { %7696 = vrot.lane.b32.xlu0 %v7305_v34, %s16932_s17  ;;  %v11456_v34 = vld [vmem:[%s16867_s5 + $0x1] ss:$0 sm:$0xff] }
 0xf29   :  { %v12809_v36 = vpop.f32.mrf.mxu0 }
 0xf2a   :  { %7706 = vrot.lane.b32.xlu1 %v12809_v36, %s16933_s1 }
 0xf2b   :  { %v7392_v18 = vpop.f32.mrf.mxu0 }
 0xf2c   :  { %7704 = vrot.lane.b32.xlu0 %v7392_v18, %s16933_s1 }
 0xf2d   :  { %v12816_v45 = vpop.f32.mrf.mxu1 }
 0xf2e   :  { %7714 = vrot.lane.b32.xlu1 %v12816_v45, %s16934_s25 }
 0xf2f   :  { %v7479_v17 = vpop.f32.mrf.mxu1 }
 0xf30   :  { %7712 = vrot.lane.b32.xlu0 %v7479_v17, %s16934_s25 }
 0xf31   :  { %v12823_v16 = vpop.f32.mrf.mxu0 }
 0xf32   :  { %7722 = vrot.lane.b32.xlu1 %v12823_v16, %s16935_s29 }
 0xf33   :  { %v7566_v63 = vpop.f32.mrf.mxu0 }
 0xf34   :  { %7720 = vrot.lane.b32.xlu0 %v7566_v63, %s16935_s29 }
 0xf35   :  { %v12830_v41 = vpop.f32.mrf.mxu1 }
 0xf36   :  { %7730 = vrot.lane.b32.xlu1 %v12830_v41, %s16936_s23 }
 0xf37   :  { %v7653_v59 = vpop.f32.mrf.mxu1 }
 0xf38   :  { %7728 = vrot.lane.b32.xlu0 %v7653_v59, %s16936_s23 }
 0xf88   :  { %v7667_v53 = vpop.permute.xlu1 %7666 }
 0xf89   :  { %v7735_v40 = vsel %vm269_vm2, %v15787_v1, %v7667_v53 }
 0xf8a   :  { %v7665_v9 = vpop.permute.xlu0 %7664 }
 0xf8b   :  { %v7734_v38 = vsel %vm269_vm2, %v15790_v39, %v7665_v9 }
 0xf8c   :  { %v7675_v54 = vpop.permute.xlu1 %7674 }
 0xf8d   :  { %v7737_v62 = vsel %vm2301_vm5, %v7735_v40, %v7675_v54 }
 0xf8e   :  { %v7673_v12 = vpop.permute.xlu0 %7672 }
 0xf8f   :  { %v7736_v26 = vsel %vm2301_vm5, %v7734_v38, %v7673_v12 }
 0xf90   :  { %v7683_v50 = vpop.permute.xlu1 %7682 }
 0xf91   :  { %v7739_v55 = vsel %vm2304_vm6, %v7737_v62, %v7683_v50 }
 0xf92   :  { %v7681_v15 = vpop.permute.xlu0 %7680 }
 0xf93   :  { %v7738_v44 = vsel %vm2304_vm6, %v7736_v26, %v7681_v15 }
 0xf94   :  { %v7691_v11 = vpop.permute.xlu1 %7690 }
 0xf95   :  { %v7741_v47 = vsel %vm2307_vm7, %v7739_v55, %v7691_v11 }
 0xf96   :  { %v7689_v27 = vpop.permute.xlu0 %7688 }
 0xf97   :  { %v7740_v19 = vsel %vm2307_vm7, %v7738_v44, %v7689_v27 }
 0xf98   :  { %v7699_v33 = vpop.permute.xlu1 %7698 }
 0xf99   :  { %v7743_v39 = vsel %vm2310_vm8, %v7741_v47, %v7699_v33 }
 0xf9a   :  { %v7697_v30 = vpop.permute.xlu0 %7696 }
 0xf9b   :  { %v7742_v2 = vsel %vm2310_vm8, %v7740_v19, %v7697_v30 }
 0xf9c   :  { %v7707_v13 = vpop.permute.xlu1 %7706 }
 0xf9d   :  { %v7745_v25 = vsel %vm2313_vm9, %v7743_v39, %v7707_v13 }
 0xf9e   :  { %v7705_v6 = vpop.permute.xlu0 %7704 }
 0xf9f   :  { %v7744_v1 = vsel %vm2313_vm9, %v7742_v2, %v7705_v6 }
 0xfa0   :  { %v7715_v20 = vpop.permute.xlu1 %7714 }
 0xfa1   :  { %v7747_v43 = vsel %vm2316_vm10, %v7745_v25, %v7715_v20 }
 0xfa2   :  { %v7713_v32 = vpop.permute.xlu0 %7712 }
 0xfa3   :  { %v7746_v4 = vsel %vm2316_vm10, %v7744_v1, %v7713_v32 }
 0xfa4   :  { %v7723_v52 = vpop.permute.xlu1 %7722 }
 0xfa5   :  { %v7749_v58 = vsel %vm2319_vm11, %v7747_v43, %v7723_v52 }
 0xfa6   :  { %v7721_v3 = vpop.permute.xlu0 %7720 }
 0xfa7   :  { %v7748_v5 = vsel %vm2319_vm11, %v7746_v4, %v7721_v3 }
 0xfa8   :  { %v7731_v29 = vpop.permute.xlu1 %7730 }
 0xfa9   :  { %v7751_v48 = vsel %vm2322_vm12, %v7749_v58, %v7731_v29 }
 0xfaa   :  { %v7729_v0 = vpop.permute.xlu0 %7728 }
 0xfab   :  { %v7750_v23 = vsel %vm2322_vm12, %v7748_v5, %v7729_v0 }
 0xfac   :  { %12847 = vmatprep.mubr.msk.f32.mxu0 %vm129_vm1, %v7750_v23 }
 0xfad   :  { %12848 = vmatmul.mubr.msk.f32.vlgmr.msra.gmra.mxu0 %vm129_vm1, %v7751_v48 }
 0xfae   :  { %8866 = vmatprep.mubr.bf16.mxu0 %v16927_v14 }
0x106d   :  { %v12849_v28 = vpop.f32.mrf.mxu0 }
0x106e   :  { %v7850_v36 = vadd.f32 %v12849_v28, %v11456_v34 }
0x106f   :  { %v7844_v61 = vpop.f32.mrf.mxu0 }
0x1070   :  { %v7872_v18 = vcombine.high %v7850_v36, %v7850_v36  ;;  %v7879_v24 = vrot.slane %v7850_v36, %v13546_v22  ;;  %v7845_v45 = vadd.f32 %v11456_v34, %v7844_v61 }
0x1072   :  { %v7886_v17 = vrot.slane %v7872_v18, %v13546_v22  ;;  %v7887_v16 = vcombine.high %v7879_v24, %v7879_v24  ;;  %v7855_v63 = vcombine.high %v7845_v45, %v7845_v45  ;;  %v7862_v41 = vrot.slane %v7845_v45, %v13546_v22 }
0x1073   :  { %v7901_v53 = vadd.f32 %v7879_v24, %v15230_v56 }
0x1074   :  { %v7888_v59 = vcombine.high %v7886_v17, %v7886_v17  ;;  %v7902_v9 = vadd.f32 %v7887_v16, %v15232_v42  ;;  %v7869_v54 = vrot.slane %v7855_v63, %v13546_v22  ;;  %v7870_v12 = vcombine.high %v7862_v41, %v7862_v41 }
0x1075   :  { %v7903_v50 = vadd.f32 %v7886_v17, %v15234_v21  ;;  %v7897_v33 = vadd.f32 %v7862_v41, %v15218_v7 }
0x1076   :  { %v7904_v15 = vadd.f32 %v7888_v59, %v15236_v46  ;;  %v7934_v11 = vcombine.low %v7901_v53, %v7902_v9  ;;  %v7871_v27 = vcombine.high %v7869_v54, %v7869_v54  ;;  %v7898_v30 = vadd.f32 %v7870_v12, %v15220_v8 }
0x1077   :  { %v7899_v13 = vadd.f32 %v7869_v54, %v15222_v57 }
0x1078   :  { %v7900_v6 = vadd.f32 %v7871_v27, %v15224_v10  ;;  %v7935_v56 = vcombine.low %v7903_v50, %v7904_v15  ;;  %v7917_v20 = vcombine.low %v7897_v33, %v7898_v30  ;;  %v7942_v42 = vrot.slane %v7934_v11, %v13546_v22  ;;  %v11512_v27 = vld [vmem:[%s16870_s8 + $0x380] sm:$0xff] }
0x107a   :  { %v7949_v32 = vrot.slane %v7935_v56, %v13546_v22  ;;  %v7918_v38 = vcombine.low %v7899_v13, %v7900_v6  ;;  %v7925_v46 = vrot.slane %v7917_v20, %v13546_v22  ;;  %v11496_v20 = vld [vmem:[%s16870_s8 + $0x300] sm:$0xff] }
0x107c   :  { %v7950_v21 = vcombine.low %v7942_v42, %v7949_v32  ;;  %v7932_v40 = vrot.slane %v7918_v38, %v13546_v22  ;;  %v11504_v42 = vld [vmem:[%s16870_s8 + $0x340] sm:$0xff] }
0x107e   :  { %v7956_v7 = vsel %vm129_vm1, %v7950_v21, 0.0  ;;  %v7933_v26 = vcombine.low %v7925_v46, %v7932_v40  ;;  %v11563_v21 = vcombine.high %v11496_v20, %v11504_v42  ;;  %v11497_v46 = vld [vmem:[%s16870_s8 + $0x308] sm:$0xff] }
0x107f   :  { %7957 = vadd.xlane.f32.xlu1 %v7956_v7  ;;  %v11505_v40 = vld [vmem:[%s16870_s8 + $0x348] sm:$0xff]  ;;  %v11480_v7 = vld [vmem:[%s16870_s8 + $0x280] sm:$0xff] }
0x1080   :  { %v7953_v8 = vsel %vm129_vm1, %v7933_v26, 0.0 }
0x1081   :  { %7954 = vadd.xlane.f32.xlu0 %v7953_v8  ;;  %v11565_v8 = vcombine.high %v11497_v46, %v11505_v40 }
0x1108   :  { %v7958_v57 = vpop.xlane.xlu1 %7957 }
0x1109   :  { %v7960_v10 = vmul.f32 0.016666668, %v7958_v57  ;;  %v11488_v57 = vld [vmem:[%s16870_s8 + $0x2c0] sm:$0xff] }
0x110a   :  { %v7955_v52 = vpop.xlane.xlu0 %7954 }
0x110b   :  { %v7997_v62 = vrot.slane %v7960_v10, %v14233_v35  ;;  %v8004_v44 = vrot.slane %v7960_v10, %v14236_v60  ;;  %v8011_v55 = vrot.slane %v7960_v10, %v14239_v31  ;;  %v8018_v19 = vrot.slane %v7960_v10, %v14242_v51  ;;  %v11481_v10 = vld [vmem:[%s16870_s8 + $0x288] sm:$0xff] }
0x110c   :  { %v7959_v3 = vmul.f32 0.016666668, %v7955_v52  ;;  %v11489_v52 = vld [vmem:[%s16870_s8 + $0x2c8] sm:$0xff] }
0x110d   :  { %v15883_v47 = vsub.f32 %v7901_v53, %v7997_v62  ;;  %v15885_v2 = vsub.f32 %v7902_v9, %v8004_v44  ;;  %v15887_v39 = vsub.f32 %v7903_v50, %v8011_v55  ;;  %v15889_v1 = vsub.f32 %v7904_v15, %v8018_v19 }
0x110e   :  { %v7969_v25 = vrot.slane %v7959_v3, %v14233_v35  ;;  %v7976_v4 = vrot.slane %v7959_v3, %v14236_v60  ;;  %v7983_v29 = vrot.slane %v7959_v3, %v14239_v31  ;;  %v7990_v43 = vrot.slane %v7959_v3, %v14242_v51 }
0x110f   :  { %v8039_v5 = vmul.f32 %v15883_v47, %v15883_v47  ;;  %v8040_v0 = vmul.f32 %v15885_v2, %v15885_v2  ;;  %v8041_v58 = vmul.f32 %v15887_v39, %v15887_v39  ;;  %v8042_v23 = vmul.f32 %v15889_v1, %v15889_v1 }
0x1110   :  { %v15903_v48 = vsub.f32 %v7897_v33, %v7969_v25  ;;  %v15905_v34 = vsub.f32 %v7898_v30, %v7976_v4  ;;  %v15907_v28 = vsub.f32 %v7899_v13, %v7983_v29  ;;  %v15909_v36 = vsub.f32 %v7900_v6, %v7990_v43  ;;  %v11520_v33 = vld [vmem:[%s16870_s8 + $0x3c0] sm:$0x33]  ;;  %v11513_v30 = vld [vmem:[%s16870_s8 + $0x388] sm:$0xff] }
0x1111   :  { %v8068_v61 = vcombine.low %v8039_v5, %v8040_v0  ;;  %v8069_v18 = vcombine.low %v8041_v58, %v8042_v23  ;;  %v11579_v13 = vcombine.high %v11512_v27, %v11520_v33  ;;  %v11521_v6 = vld [vmem:[%s16870_s8 + $0x3c8] sm:$0x33]  ;;  %v11578_v56 = vcombine.low %v11512_v27, %v11520_v33  ;;  %v11464_v25 = vld [vmem:[%s16870_s8 + $0x200] sm:$0xff] }
0x1112   :  { %v8035_v24 = vmul.f32 %v15903_v48, %v15903_v48  ;;  %v8036_v45 = vmul.f32 %v15905_v34, %v15905_v34  ;;  %v8037_v17 = vmul.f32 %v15907_v28, %v15907_v28  ;;  %v8038_v16 = vmul.f32 %v15909_v36, %v15909_v36  ;;  %v11472_v4 = vld [vmem:[%s16870_s8 + $0x240] sm:$0xff]  ;;  %v11465_v29 = vld [vmem:[%s16870_s8 + $0x208] sm:$0xff] }
0x1113   :  { %v8076_v9 = vrot.slane %v8068_v61, %v13546_v22  ;;  %v8083_v54 = vrot.slane %v8069_v18, %v13546_v22  ;;  %v11581_v32 = vcombine.high %v11513_v30, %v11521_v6  ;;  %v11580_v38 = vcombine.low %v11513_v30, %v11521_v6  ;;  %11594 = vmatprep.subr.msk.bf16.mxu1 %vm3311_vm13, %v11579_v13  ;;  %v11473_v43 = vld [vmem:[%s16870_s8 + $0x248] sm:$0xff]  ;;  %v15980_v61 = vld [vmem:[%s16870_s8 + $0x390] sm:$0xff]  ;;  %v11462_v27 = vld [vmem:[%s16868_s6 + $0x1] ss:$0 sm:$0xff] }
0x1114   :  { %v8051_v63 = vcombine.low %v8035_v24, %v8036_v45  ;;  %v8052_v41 = vcombine.low %v8037_v17, %v8038_v16  ;;  %v8744_v26 = vsel %vm3311_vm13, %v11578_v56, 0  ;;  %v11562_v44 = vcombine.low %v11496_v20, %v11504_v42  ;;  %v15985_v18 = vld [vmem:[%s16870_s8 + $0x3d0] sm:$0x33]  ;;  %v15990_v24 = vld [vmem:[%s16870_s8 + $0x398] sm:$0xff]  ;;  %v11463_v33 = vld [vmem:[%s16869_s7 + $0x1] ss:$0 sm:$0xff] }
0x1115   :  { %v8084_v15 = vcombine.low %v8076_v9, %v8083_v54  ;;  %11596 = vmatprep.subr.msk.bf16.mxu0 %vm3311_vm13, %v11581_v32  ;;  %8800 = vmatpush1.bf16.msra.mxu1 %v8744_v26  ;;  %v8750_v62 = vsel %vm3311_vm13, %v11580_v38, 0  ;;  %v11564_v55 = vcombine.low %v11497_v46, %v11505_v40  ;;  %v11547_v19 = vcombine.high %v11480_v7, %v11488_v57  ;;  %v15995_v45 = vld [vmem:[%s16870_s8 + $0x3d8] sm:$0x33] }
0x1116   :  { %v8059_v59 = vrot.slane %v8051_v63, %v13546_v22  ;;  %v8066_v53 = vrot.slane %v8052_v41, %v13546_v22  ;;  %8843 = vmatpush1.bf16.msra.mxu0 %v8750_v62  ;;  %8801 = vmatprep.subr.bf16.mxu1 %v11563_v21  ;;  %v11549_v3 = vcombine.high %v11481_v10, %v11489_v52 }
0x1117   :  { %v8090_v11 = vsel %vm129_vm1, %v8084_v15, 0.0  ;;  %8844 = vmatprep.subr.bf16.mxu0 %v11565_v8  ;;  %v11546_v5 = vcombine.low %v11480_v7, %v11488_v57  ;;  %v11548_v0 = vcombine.low %v11481_v10, %v11489_v52  ;;  %v11531_v58 = vcombine.high %v11464_v25, %v11472_v4 }
0x1118   :  { %v8067_v12 = vcombine.low %v8059_v59, %v8066_v53  ;;  %v11533_v23 = vcombine.high %v11465_v29, %v11473_v43  ;;  %v11530_v17 = vcombine.low %v11464_v25, %v11472_v4  ;;  %v11532_v16 = vcombine.low %v11465_v29, %v11473_v43 }
0x1119   :  { %8802 = vmatpush1.bf16.msra.mxu1 %v11562_v44  ;;  %v11583_v63 = vcombine.high %v15980_v61, %v15985_v18  ;;  %v11585_v41 = vcombine.high %v15990_v24, %v15995_v45  ;;  %v11582_v59 = vcombine.low %v15980_v61, %v15985_v18  ;;  %v11584_v53 = vcombine.low %v15990_v24, %v15995_v45  ;;  %v11483_v61 = vld [vmem:[%s16870_s8 + $0x298] sm:$0xff] }
0x111a   :  { %v8087_v50 = vsel %vm129_vm1, %v8067_v12, 0.0  ;;  %8845 = vmatpush1.bf16.msra.mxu0 %v11564_v55  ;;  %8803 = vmatprep.subr.bf16.mxu1 %v11547_v19  ;;  %v8178_v30 = vcombine.high %v11462_v27, %v11462_v27  ;;  %v8212_v13 = vcombine.high %v11463_v33, %v11463_v33  ;;  %v8185_v6 = vrot.slane %v11462_v27, %v13546_v22  ;;  %v11491_v18 = vld [vmem:[%s16870_s8 + $0x2d8] sm:$0xff] }
0x111b   :  { %8088 = vadd.xlane.f32.xlu0 %v8087_v50  ;;  %8846 = vmatprep.subr.bf16.mxu0 %v11549_v3  ;;  %v8219_v42 = vrot.slane %v11463_v33, %v13546_v22 }
0x111c   :  { %v8192_v56 = vrot.slane %v8178_v30, %v13546_v22  ;;  %v8226_v32 = vrot.slane %v8212_v13, %v13546_v22  ;;  %v8193_v7 = vcombine.high %v8185_v6, %v8185_v6 }
0x111d   :  { %8804 = vmatpush1.bf16.msra.mxu1 %v11546_v5  ;;  %v8227_v44 = vcombine.high %v8219_v42, %v8219_v42 }
0x111e   :  { %8847 = vmatpush1.bf16.msra.mxu0 %v11548_v0  ;;  %8805 = vmatprep.subr.bf16.mxu1 %v11531_v58  ;;  %v8194_v26 = vcombine.high %v8192_v56, %v8192_v56  ;;  %v8228_v55 = vcombine.high %v8226_v32, %v8226_v32 }
0x111f   :  { %8091 = vadd.xlane.f32.xlu0 %v8090_v11  ;;  %8848 = vmatprep.subr.bf16.mxu0 %v11533_v23 }
0x1121   :  { %8806 = vmatpush1.bf16.msra.mxu1 %v11530_v17 }
0x1122   :  { %8849 = vmatpush1.bf16.msra.mxu0 %v11532_v16  ;;  %11598 = vmatprep.subr.msk.bf16.mxu1 %vm3311_vm13, %v11583_v63 }
0x1123   :  { %11600 = vmatprep.subr.msk.bf16.mxu0 %vm3311_vm13, %v11585_v41 }
0x11a4   :  { %v8089_v9 = vpop.xlane.xlu0 %8088 }
0x11a5   :  { %v8093_v54 = vmul.f32 0.016666668, %v8089_v9 }
0x11a7   :  { %v8095_v12 = vadd.f32 1e-05, %v8093_v54 }
0x11a8   :  { %v8092_v50 = vpop.xlane.xlu0 %8091 }
0x11a9   :  { %13303 = vrsqrt.f32 %v8095_v12  ;;  %v8094_v15 = vmul.f32 0.016666668, %v8092_v50 }
0x11ab   :  { %v8096_v11 = vadd.f32 1e-05, %v8094_v15 }
0x11ad   :  { %13305 = vrsqrt.f32 %v8096_v11 }
0x11b6   :  { %v13304_v20 = vpop.eup %13303 }
0x11b7   :  { %v8107_v38 = vrot.slane %v13304_v20, %v14233_v35  ;;  %v8114_v21 = vrot.slane %v13304_v20, %v14236_v60  ;;  %v8121_v46 = vrot.slane %v13304_v20, %v14239_v31  ;;  %v8128_v40 = vrot.slane %v13304_v20, %v14242_v51  ;;  %v11499_v20 = vld [vmem:[%s16870_s8 + $0x318] sm:$0xff] }
0x11b9   :  { %v8165_v8 = vmul.f32 %v8107_v38, %v15903_v48  ;;  %v8166_v57 = vmul.f32 %v8114_v21, %v15905_v34  ;;  %v8167_v10 = vmul.f32 %v8121_v46, %v15907_v28  ;;  %v8168_v52 = vmul.f32 %v8128_v40, %v15909_v36 }
0x11ba   :  { %v13306_v62 = vpop.eup %13305  ;;  %v8756_v21 = vsel %vm3311_vm13, %v11582_v59, 0  ;;  %v8762_v40 = vsel %vm3311_vm13, %v11584_v53, 0  ;;  %v11553_v53 = vcombine.high %v11483_v61, %v11491_v18 }
0x11bb   :  { %v8135_v19 = vrot.slane %v13306_v62, %v14233_v35  ;;  %v8142_v3 = vrot.slane %v13306_v62, %v14236_v60  ;;  %v8149_v25 = vrot.slane %v13306_v62, %v14239_v31  ;;  %v8156_v4 = vrot.slane %v13306_v62, %v14242_v51  ;;  %v11467_v62 = vld [vmem:[%s16870_s8 + $0x218] sm:$0xff] }
0x11bc   :  { %v8199_v29 = vmul.f32 %v8185_v6, %v8165_v8  ;;  %v8200_v43 = vmul.f32 %v8193_v7, %v8166_v57  ;;  %v8201_v48 = vmul.f32 %v8192_v56, %v8167_v10  ;;  %v8202_v5 = vmul.f32 %v8194_v26, %v8168_v52  ;;  %v11482_v8 = vld [vmem:[%s16870_s8 + $0x290] sm:$0xff] }
0x11bd   :  { %v8169_v34 = vmul.f32 %v8135_v19, %v15883_v47  ;;  %v8170_v28 = vmul.f32 %v8142_v3, %v15885_v2  ;;  %v8171_v36 = vmul.f32 %v8149_v25, %v15887_v39  ;;  %v8172_v0 = vmul.f32 %v8156_v4, %v15889_v1  ;;  %v11490_v57 = vld [vmem:[%s16870_s8 + $0x2d0] sm:$0xff]  ;;  %v11516_v4 = vld [vmem:[%s16870_s8 + $0x3a0] sm:$0xff] }
0x11be   :  { %v16033_v58 = vadd.f32 %v8219_v42, %v8199_v29  ;;  %v16035_v23 = vadd.f32 %v8227_v44, %v8200_v43  ;;  %v16037_v17 = vadd.f32 %v8226_v32, %v8201_v48  ;;  %v16039_v16 = vadd.f32 %v8228_v55, %v8202_v5  ;;  %v11466_v10 = vld [vmem:[%s16870_s8 + $0x210] sm:$0xff]  ;;  %v11524_v29 = vld [vmem:[%s16870_s8 + $0x3e0] sm:$0x33]  ;;  %v11517_v43 = vld [vmem:[%s16870_s8 + $0x3a8] sm:$0xff] }
0x11bf   :  { %v8203_v63 = vmul.f32 %v8185_v6, %v8169_v34  ;;  %v8204_v41 = vmul.f32 %v8193_v7, %v8170_v28  ;;  %v8205_v9 = vmul.f32 %v8192_v56, %v8171_v36  ;;  %v8206_v54 = vmul.f32 %v8194_v26, %v8172_v0  ;;  %v11498_v6 = vld [vmem:[%s16870_s8 + $0x310] sm:$0xff]  ;;  %v11525_v48 = vld [vmem:[%s16870_s8 + $0x3e8] sm:$0x33] }
0x11c0   :  { %v8249_v47 = vcombine.low %v16033_v58, %v16035_v23  ;;  %v8250_v2 = vcombine.low %v16037_v17, %v16039_v16  ;;  %v11506_v56 = vld [vmem:[%s16870_s8 + $0x350] sm:$0xff]  ;;  %v11551_v59 = vcombine.high %v11482_v8, %v11490_v57  ;;  %v11552_v19 = vcombine.low %v11483_v61, %v11491_v18 }
0x11c1   :  { %v16045_v39 = vadd.f32 %v8219_v42, %v8203_v63  ;;  %v16047_v1 = vadd.f32 %v8227_v44, %v8204_v41  ;;  %v16049_v12 = vadd.f32 %v8226_v32, %v8205_v9  ;;  %v16051_v50 = vadd.f32 %v8228_v55, %v8206_v54  ;;  %v11507_v42 = vld [vmem:[%s16870_s8 + $0x358] sm:$0xff]  ;;  %v11474_v52 = vld [vmem:[%s16870_s8 + $0x250] sm:$0xff]  ;;  %v11500_v41 = vld [vmem:[%s16870_s8 + $0x320] sm:$0xff] }
0x11c2   :  { %v8257_v15 = vrot.slane %v8249_v47, %v13546_v22  ;;  %v8264_v11 = vrot.slane %v8250_v2, %v13546_v22  ;;  %v11567_v7 = vcombine.high %v11498_v6, %v11506_v56  ;;  %v11569_v26 = vcombine.high %v11499_v20, %v11507_v42  ;;  %v11475_v44 = vld [vmem:[%s16870_s8 + $0x258] sm:$0xff]  ;;  %v11508_v9 = vld [vmem:[%s16870_s8 + $0x360] sm:$0xff]  ;;  %v11501_v54 = vld [vmem:[%s16870_s8 + $0x328] sm:$0xff] }
0x11c3   :  { %v8266_v27 = vcombine.low %v16045_v39, %v16047_v1  ;;  %v8267_v33 = vcombine.low %v16049_v12, %v16051_v50  ;;  %v11566_v24 = vcombine.low %v11498_v6, %v11506_v56  ;;  %v11568_v45 = vcombine.low %v11499_v20, %v11507_v42  ;;  %v11509_v47 = vld [vmem:[%s16870_s8 + $0x368] sm:$0xff]  ;;  %v11518_v18 = vld [vmem:[%s16870_s8 + $0x3b0] sm:$0xff] }
0x11c4   :  { %v8265_v32 = vcombine.low %v8257_v15, %v8264_v11  ;;  %v11550_v55 = vcombine.low %v11482_v8, %v11490_v57  ;;  %v11535_v3 = vcombine.high %v11466_v10, %v11474_v52  ;;  %v11537_v25 = vcombine.high %v11467_v62, %v11475_v44  ;;  %v11493_v6 = vld [vmem:[%s16870_s8 + $0x2e8] sm:$0xff] }
0x11c5   :  { %v8274_v30 = vrot.slane %v8266_v27, %v13546_v22  ;;  %v8281_v13 = vrot.slane %v8267_v33, %v13546_v22  ;;  %v11534_v5 = vcombine.low %v11466_v10, %v11474_v52  ;;  %v11536_v34 = vcombine.low %v11467_v62, %v11475_v44  ;;  %v11484_v33 = vld [vmem:[%s16870_s8 + $0x2a0] sm:$0xff] }
0x11c6   :  { %v11587_v28 = vcombine.high %v11516_v4, %v11524_v29  ;;  %v11589_v36 = vcombine.high %v11517_v43, %v11525_v48  ;;  %v11586_v0 = vcombine.low %v11516_v4, %v11524_v29  ;;  %v11588_v63 = vcombine.low %v11517_v43, %v11525_v48  ;;  %v11511_v4 = vld [vmem:[%s16870_s8 + $0x378] sm:$0xff] }
0x11c7   :  { %v8282_v38 = vcombine.low %v8274_v30, %v8281_v13  ;;  %v11571_v11 = vcombine.high %v11500_v41, %v11508_v9  ;;  %v11573_v27 = vcombine.high %v11501_v54, %v11509_v47  ;;  %v11492_v30 = vld [vmem:[%s16870_s8 + $0x2e0] sm:$0xff]  ;;  %v11485_v13 = vld [vmem:[%s16870_s8 + $0x2a8] sm:$0xff]  ;;  %v11570_v56 = vcombine.low %v11500_v41, %v11508_v9 }
0x11c8   :  { %v8768_v2 = vsel %vm3311_vm13, %v11586_v0, 0  ;;  %v8774_v15 = vsel %vm3311_vm13, %v11588_v63, 0  ;;  %v11572_v20 = vcombine.low %v11501_v54, %v11509_v47  ;;  %v11555_v42 = vcombine.high %v11484_v33, %v11492_v30  ;;  %v11495_v0 = vld [vmem:[%s16870_s8 + $0x2f8] sm:$0xff]  ;;  %v11470_v47 = vld [vmem:[%s16870_s8 + $0x230] sm:$0xff] }
0x11c9   :  { %v16077_v46 = vpack.c.bf16 %v8282_v38, %v8265_v32  ;;  %v11557_v32 = vcombine.high %v11485_v13, %v11493_v6  ;;  %v11468_v38 = vld [vmem:[%s16870_s8 + $0x220] sm:$0xff]  ;;  %v11556_v8 = vcombine.low %v11485_v13, %v11493_v6 }
0x11cb   :  { %11595 = vmatmul.mubr.msk.bf16.vlgmr.msra.gmra.mxu1 %vm129_vm1, %v16077_v46  ;;  %11597 = vmatmul.mubr.msk.bf16.vlgmr.msra.gmra.mxu0 %vm129_vm1, %v16077_v46 }
0x11cc   :  { %8886 = vmatpush1.bf16.msra.mxu1 %v8756_v21  ;;  %8929 = vmatpush1.bf16.msra.mxu0 %v8762_v40  ;;  %v11476_v21 = vld [vmem:[%s16870_s8 + $0x260] sm:$0xff]  ;;  %v11469_v40 = vld [vmem:[%s16870_s8 + $0x228] sm:$0xff] }
0x11cd   :  { %8887 = vmatprep.subr.bf16.mxu1 %v11567_v7  ;;  %8930 = vmatprep.subr.bf16.mxu0 %v11569_v26  ;;  %v11477_v7 = vld [vmem:[%s16870_s8 + $0x268] sm:$0xff]  ;;  %v11554_v26 = vcombine.low %v11484_v33, %v11492_v30  ;;  %v11539_v57 = vcombine.high %v11468_v38, %v11476_v21 }
0x11ce   :  { %8909 = vmatprep.mubr.bf16.mxu1 %v16927_v14  ;;  %8952 = vmatprep.mubr.bf16.mxu0 %v16927_v14  ;;  %v11541_v61 = vcombine.high %v11469_v40, %v11477_v7  ;;  %v11540_v10 = vcombine.low %v11469_v40, %v11477_v7  ;;  %v13013_v40 = vld [vmem:[%s16872_s10 + $0x430] sm:$0xff]  }
0x11cf   :  { %v13014_v7 = vld [vmem:[%s16872_s10 + $0x4b0] sm:$0xff]  }
0x11d0   :  { %8888 = vmatpush1.bf16.msra.mxu1 %v11566_v24  ;;  %8931 = vmatpush1.bf16.msra.mxu0 %v11568_v45  ;;  %v11526_v24 = vld [vmem:[%s16870_s8 + $0x3f0] sm:$0x33]  ;;  %v11519_v45 = vld [vmem:[%s16870_s8 + $0x3b8] sm:$0xff] }
0x11d1   :  { %8889 = vmatprep.subr.bf16.mxu1 %v11551_v59  ;;  %8932 = vmatprep.subr.bf16.mxu0 %v11553_v53  ;;  %v11527_v59 = vld [vmem:[%s16870_s8 + $0x3f8] sm:$0x33]  ;;  %v11538_v53 = vcombine.low %v11468_v38, %v11476_v21  ;;  %v11591_v52 = vcombine.high %v11518_v18, %v11526_v24  ;;  %v11590_v44 = vcombine.low %v11518_v18, %v11526_v24  ;;  %v13011_v38 = vld [vmem:[%s16872_s10 + $0x470] sm:$0xff]   ;;  %v13020_v18 = vld [vmem:[%s16872_s10 + $0x4e0] sm:$0xff]  }
0x11d2   :  { %v11593_v62 = vcombine.high %v11519_v45, %v11527_v59  ;;  %v13012_v21 = vld [vmem:[%s16872_s10 + $0x4f0] sm:$0xff]   ;;  %v13021_v24 = vld [vmem:[%s16872_s10 + $0x420] sm:$0xff]  }
0x11d3   :  { %v8780_v29 = vsel %vm3311_vm13, %v11590_v44, 0  ;;  %v13028_v44 = vld [vmem:[%s16872_s10 + $0x4d0] sm:$0xff]  }
0x11d4   :  { %8890 = vmatpush1.bf16.msra.mxu1 %v11550_v55  ;;  %8933 = vmatpush1.bf16.msra.mxu0 %v11552_v19  ;;  %v11592_v55 = vcombine.low %v11519_v45, %v11527_v59  ;;  %v11502_v19 = vld [vmem:[%s16870_s8 + $0x330] sm:$0xff]  ;;  %v13022_v45 = vld [vmem:[%s16872_s10 + $0x4a0] sm:$0xff]   ;;  %v13023_v59 = vld [vmem:[%s16872_s10 + $0x458] sm:$0xff]  }
0x11d5   :  { %8891 = vmatprep.subr.bf16.mxu1 %v11535_v3  ;;  %8934 = vmatprep.subr.bf16.mxu0 %v11537_v25  ;;  %v11510_v3 = vld [vmem:[%s16870_s8 + $0x370] sm:$0xff]  ;;  %v11503_v25 = vld [vmem:[%s16870_s8 + $0x338] sm:$0xff] }
0x11d6   :  { %v8786_v43 = vsel %vm3311_vm13, %v11592_v55, 0  ;;  %v11575_v48 = vcombine.high %v11502_v19, %v11510_v3  ;;  %v11574_v63 = vcombine.low %v11502_v19, %v11510_v3  ;;  %v11576_v41 = vcombine.low %v11503_v25, %v11511_v4  ;;  %v13029_v55 = vld [vmem:[%s16872_s10 + $0x410] sm:$0xff]   ;;  %v13031_v3 = vld [vmem:[%s16872_s10 + $0x448] sm:$0xff]  }
0x11d7   :  { %v13030_v19 = vld [vmem:[%s16872_s10 + $0x490] sm:$0xff]  }
0x11d8   :  { %8892 = vmatpush1.bf16.msra.mxu1 %v11534_v5  ;;  %8935 = vmatpush1.bf16.msra.mxu0 %v11536_v34  ;;  %v11577_v5 = vcombine.high %v11503_v25, %v11511_v4  ;;  %v11486_v34 = vld [vmem:[%s16870_s8 + $0x2b0] sm:$0xff]  ;;  %v13032_v25 = vld [vmem:[%s16872_s10 + $0x4c8] sm:$0xff]  }
0x11d9   :  { %11602 = vmatprep.subr.msk.bf16.mxu1 %vm3311_vm13, %v11587_v28  ;;  %11604 = vmatprep.subr.msk.bf16.mxu0 %vm3311_vm13, %v11589_v36  ;;  %v11494_v28 = vld [vmem:[%s16870_s8 + $0x2f0] sm:$0xff]  ;;  %v11487_v36 = vld [vmem:[%s16870_s8 + $0x2b8] sm:$0xff]  ;;  %v13033_v4 = vld [vmem:[%s16872_s10 + $0x408] sm:$0xff]  }
0x11da   :  { %v11559_v9 = vcombine.high %v11486_v34, %v11494_v28  ;;  %v11561_v54 = vcombine.high %v11487_v36, %v11495_v0  ;;  %v11560_v33 = vcombine.low %v11487_v36, %v11495_v0  ;;  %v13040_v36 = vld [vmem:[%s16872_s10 + $0x5f8] sm:$0xff]   ;;  %v16338_v0 = vld [vmem:[%s16871_s9 + $0x10] sm:$0xff] }
0x11db   :  { %11599 = vmatmul.mubr.msk.bf16.vlgmr.msra.gmra.mxu1 %vm129_vm1, %v16077_v46  ;;  %11601 = vmatmul.mubr.msk.bf16.vlgmr.msra.gmra.mxu0 %vm129_vm1, %v16077_v46 }
0x11dc   :  { %8972 = vmatpush1.bf16.msra.mxu1 %v8768_v2  ;;  %9015 = vmatpush1.bf16.msra.mxu0 %v8774_v15  ;;  %v11478_v2 = vld [vmem:[%s16870_s8 + $0x270] sm:$0xff]  ;;  %v11471_v15 = vld [vmem:[%s16870_s8 + $0x238] sm:$0xff] }
0x11dd   :  { %8973 = vmatprep.subr.bf16.mxu1 %v11571_v11  ;;  %9016 = vmatprep.subr.bf16.mxu0 %v11573_v27  ;;  %v11479_v11 = vld [vmem:[%s16870_s8 + $0x278] sm:$0xff]  ;;  %v11558_v27 = vcombine.low %v11486_v34, %v11494_v28  ;;  %v11543_v30 = vcombine.high %v11470_v47, %v11478_v2  ;;  %v11542_v6 = vcombine.low %v11470_v47, %v11478_v2  ;;  %v13038_v34 = vld [vmem:[%s16872_s10 + $0x480] sm:$0xff]   ;;  %v16937_v47 = vld [vmem:[#allocation5_spill] sm:$0xff] }
0x11de   :  { %8995 = vmatprep.mubr.bf16.mxu1 %v16927_v14  ;;  %9038 = vmatprep.mubr.bf16.mxu0 %v16927_v14  ;;  %v11545_v13 = vcombine.high %v11471_v15, %v11479_v11  ;;  %v13039_v28 = vld [vmem:[%s16872_s10 + $0x578] sm:$0xff]   ;;  %v8359_v2 = vrot.slane %v16338_v0, %v16937_v47 }
0x11e0   :  { %8974 = vmatpush1.bf16.msra.mxu1 %v11570_v56  ;;  %9017 = vmatpush1.bf16.msra.mxu0 %v11572_v20  ;;  %v11544_v56 = vcombine.low %v11471_v15, %v11479_v11  ;;  %v13007_v20 = vld [vmem:[%s16872_s10 + $0x478] sm:$0xff]  }
0x11e1   :  { %8975 = vmatprep.subr.bf16.mxu1 %v11555_v42  ;;  %9018 = vmatprep.subr.bf16.mxu0 %v11557_v32  ;;  %v13009_v42 = vld [vmem:[%s16872_s10 + $0x438] sm:$0xff]  }
0x11e2   :  { %v13010_v32 = vld [vmem:[%s16872_s10 + $0x4b8] sm:$0xff]  }
0x11e3   :  { %v16938_v15 = vld [vmem:[#allocation6_spill] sm:$0xff] }
0x11e4   :  { %8976 = vmatpush1.bf16.msra.mxu1 %v11554_v26  ;;  %9019 = vmatpush1.bf16.msra.mxu0 %v11556_v8  ;;  %v13015_v26 = vld [vmem:[%s16872_s10 + $0x468] sm:$0xff]   ;;  %v8367_v11 = vrot.slane %v16338_v0, %v16938_v15 }
0x11e5   :  { %8977 = vmatprep.subr.bf16.mxu1 %v11539_v57  ;;  %9020 = vmatprep.subr.bf16.mxu0 %v11541_v61  ;;  %v13017_v8 = vld [vmem:[%s16872_s10 + $0x428] sm:$0xff]   ;;  %v13019_v61 = vld [vmem:[%s16872_s10 + $0x460] sm:$0xff]  }
0x11e6   :  { %v13018_v57 = vld [vmem:[%s16872_s10 + $0x4a8] sm:$0xff]  }
0x11e8   :  { %8978 = vmatpush1.bf16.msra.mxu1 %v11538_v53  ;;  %9021 = vmatpush1.bf16.msra.mxu0 %v11540_v10  ;;  %v13024_v53 = vld [vmem:[%s16872_s10 + $0x4d8] sm:$0xff]  }
0x11e9   :  { %11606 = vmatprep.subr.msk.bf16.mxu1 %vm3311_vm13, %v11591_v52  ;;  %11608 = vmatprep.subr.msk.bf16.mxu0 %vm3311_vm13, %v11593_v62  ;;  %v13025_v10 = vld [vmem:[%s16872_s10 + $0x418] sm:$0xff]   ;;  %v13027_v62 = vld [vmem:[%s16872_s10 + $0x450] sm:$0xff]  }
0x11ea   :  { %v13026_v52 = vld [vmem:[%s16872_s10 + $0x498] sm:$0xff]  }
0x11eb   :  { %11603 = vmatmul.mubr.msk.bf16.vlgmr.msra.gmra.mxu1 %vm129_vm1, %v16077_v46  ;;  %11605 = vmatmul.mubr.msk.bf16.vlgmr.msra.gmra.mxu0 %vm129_vm1, %v16077_v46 }
0x11ec   :  { %9058 = vmatpush1.bf16.msra.mxu1 %v8780_v29  ;;  %9101 = vmatpush1.bf16.msra.mxu0 %v8786_v43  ;;  %v13034_v29 = vld [vmem:[%s16872_s10 + $0x488] sm:$0xff]   ;;  %v13035_v43 = vld [vmem:[%s16872_s10 + $0x440] sm:$0xff]  }
0x11ed   :  { %9059 = vmatprep.subr.bf16.mxu1 %v11575_v48  ;;  %9102 = vmatprep.subr.bf16.mxu0 %v11577_v5  ;;  %v13036_v48 = vld [vmem:[%s16872_s10 + $0x4c0] sm:$0xff]  }
0x11ee   :  { %9081 = vmatprep.mubr.bf16.mxu1 %v16927_v14  ;;  %9124 = vmatprep.mubr.bf16.mxu0 %v16927_v14  ;;  %v13008_v14 = vld [vmem:[%s16872_s10 + $0x4f8] sm:$0xff]   ;;  %v13037_v5 = vld [vmem:[%s16872_s10 + $0x400] sm:$0xff]  }
0x11f0   :  { %9060 = vmatpush1.bf16.msra.mxu1 %v11574_v63  ;;  %9103 = vmatpush1.bf16.msra.mxu0 %v11576_v41 }
0x11f1   :  { %9061 = vmatprep.subr.bf16.mxu1 %v11559_v9  ;;  %9104 = vmatprep.subr.bf16.mxu0 %v11561_v54  ;;  %v8363_v9 = vrot.slane %v16338_v0, %v13612_v49  ;;  %v8371_v54 = vrot.slane %v16338_v0, %v14703_v37 }
0x11f4   :  { %9062 = vmatpush1.bf16.msra.mxu1 %v11558_v27  ;;  %9105 = vmatpush1.bf16.msra.mxu0 %v11560_v33 }
0x11f5   :  { %9063 = vmatprep.subr.bf16.mxu1 %v11543_v30  ;;  %9106 = vmatprep.subr.bf16.mxu0 %v11545_v13 }
0x11f8   :  { %9064 = vmatpush1.bf16.msra.mxu1 %v11542_v6  ;;  %9107 = vmatpush1.bf16.msra.mxu0 %v11544_v56 }
0x11f9   :  { %12356 = vmatprep.subr.bf16.mxu1 %v13007_v20  ;;  %12378 = vmatprep.subr.bf16.mxu0 %v13008_v14 }
0x11fb   :  { %11607 = vmatmul.mubr.msk.bf16.vlgmr.msra.gmra.mxu1 %vm129_vm1, %v16077_v46  ;;  %11609 = vmatmul.mubr.msk.bf16.vlgmr.msra.gmra.mxu0 %vm129_vm1, %v16077_v46  ;;  %v13016_v46 = vld [vmem:[%s16872_s10 + $0x4e8] sm:$0xff]  }
0x11fc   :  { %12357 = vmatpush3.bf16.msra.mxu1 %v13009_v42  ;;  %12379 = vmatpush3.bf16.msra.mxu0 %v13010_v32 }
0x11fd   :  { %12358 = vmatprep.subr.bf16.mxu1 %v13011_v38  ;;  %12380 = vmatprep.subr.bf16.mxu0 %v13012_v21 }
0x1200   :  { %12359 = vmatpush3.bf16.msra.mxu1 %v13013_v40  ;;  %12381 = vmatpush3.bf16.msra.mxu0 %v13014_v7 }
0x1201   :  { %12360 = vmatprep.subr.bf16.mxu1 %v13015_v26  ;;  %12382 = vmatprep.subr.bf16.mxu0 %v13016_v46 }
0x1204   :  { %12361 = vmatpush3.bf16.msra.mxu1 %v13017_v8  ;;  %12383 = vmatpush3.bf16.msra.mxu0 %v13018_v57 }
0x1205   :  { %12362 = vmatprep.subr.bf16.mxu1 %v13019_v61  ;;  %12384 = vmatprep.subr.bf16.mxu0 %v13020_v18 }
0x1208   :  { %12363 = vmatpush3.bf16.msra.mxu1 %v13021_v24  ;;  %12385 = vmatpush3.bf16.msra.mxu0 %v13022_v45 }
0x1209   :  { %12364 = vmatprep.subr.bf16.mxu1 %v13023_v59  ;;  %12386 = vmatprep.subr.bf16.mxu0 %v13024_v53 }
0x120c   :  { %12365 = vmatpush3.bf16.msra.mxu1 %v13025_v10  ;;  %12387 = vmatpush3.bf16.msra.mxu0 %v13026_v52  ;;  %v13041_v10 = vld [vmem:[%s16872_s10 + $0x538] sm:$0xff]  }
0x120d   :  { %12366 = vmatprep.subr.bf16.mxu1 %v13027_v62  ;;  %12388 = vmatprep.subr.bf16.mxu0 %v13028_v44  ;;  %v13042_v52 = vld [vmem:[%s16872_s10 + $0x5b8] sm:$0xff]  }
0x1210   :  { %12367 = vmatpush3.bf16.msra.mxu1 %v13029_v55  ;;  %12389 = vmatpush3.bf16.msra.mxu0 %v13030_v19  ;;  %v13043_v55 = vld [vmem:[%s16872_s10 + $0x570] sm:$0xff]  }
0x1211   :  { %12368 = vmatprep.subr.bf16.mxu1 %v13031_v3  ;;  %12390 = vmatprep.subr.bf16.mxu0 %v13032_v25  ;;  %v13044_v19 = vld [vmem:[%s16872_s10 + $0x5f0] sm:$0xff]  }
0x1212   :  { %v13045_v3 = vld [vmem:[%s16872_s10 + $0x530] sm:$0xff]  }
0x1213   :  { %v13046_v25 = vld [vmem:[%s16872_s10 + $0x5b0] sm:$0xff]  }
0x1214   :  { %12369 = vmatpush3.bf16.msra.mxu1 %v13033_v4  ;;  %12391 = vmatpush3.bf16.msra.mxu0 %v13034_v29 }
0x1215   :  { %12370 = vmatprep.subr.bf16.mxu1 %v13035_v43  ;;  %12392 = vmatprep.subr.bf16.mxu0 %v13036_v48  ;;  %v13047_v43 = vld [vmem:[%s16872_s10 + $0x568] sm:$0xff]  }
0x1216   :  { %v13048_v48 = vld [vmem:[%s16872_s10 + $0x5e8] sm:$0xff]  }
0x1218   :  { %12371 = vmatpush3.bf16.msra.mxu1 %v13037_v5  ;;  %12393 = vmatpush3.bf16.msra.mxu0 %v13038_v34  ;;  %v16939_v5 = vld [vmem:[#allocation7_spill] sm:$0xff] }
0x1219   :  { %12400 = vmatprep.subr.bf16.mxu1 %v13039_v28  ;;  %12422 = vmatprep.subr.bf16.mxu0 %v13040_v36  ;;  %v8379_v34 = vrot.slane %v16338_v0, %v16939_v5  ;;  %v16940_v28 = vld [vmem:[#allocation8_spill] sm:$0xff] }
0x121a   :  { %v8387_v36 = vrot.slane %v16338_v0, %v16940_v28 }
0x128b   :  { %v8825_v63 = vpop.f32.mrf.mxu1  ;;  %v8868_v41 = vpop.f32.mrf.mxu0 }
0x128c   :  { %v8826_v42 = vadd.f32 %v8825_v63, %v8359_v2  ;;  %v8869_v32 = vadd.f32 %v8868_v41, %v8367_v11 }
0x128d   :  { %v8827_v27 = vpop.f32.mrf.mxu1  ;;  %v8870_v33 = vpop.f32.mrf.mxu0 }
0x128e   :  { %v8828_v6 = vadd.f32 %v8827_v27, %v8363_v9  ;;  %v8871_v56 = vadd.f32 %v8870_v33, %v8371_v54  ;;  %v9135_v24 = vmax.f32 %v8826_v42, 0.0  ;;  %v9137_v45 = vmax.f32 %v8869_v32, 0.0  ;;  %v13051_v27 = vld [vmem:[%s16872_s10 + $0x560] sm:$0xff]  }
0x128f   :  { %v8829_v30 = vpop.f32.mrf.mxu1  ;;  %v8872_v13 = vpop.f32.mrf.mxu0  ;;  %v13052_v33 = vld [vmem:[%s16872_s10 + $0x5e0] sm:$0xff]  }
0x1290   :  { %v8830_v20 = vadd.f32 %v8829_v30, %v8359_v2  ;;  %v8873_v14 = vadd.f32 %v8872_v13, %v8367_v11  ;;  %v9136_v8 = vmax.f32 %v8828_v6, 0.0  ;;  %v9138_v57 = vmax.f32 %v8871_v56, 0.0  ;;  %v13053_v42 = vld [vmem:[%s16872_s10 + $0x520] sm:$0xff]  }
0x1291   :  { %v8831_v38 = vpop.f32.mrf.mxu1  ;;  %v8874_v21 = vpop.f32.mrf.mxu0  ;;  %v13054_v32 = vld [vmem:[%s16872_s10 + $0x5a0] sm:$0xff]  }
0x1292   :  { %v8832_v40 = vadd.f32 %v8831_v38, %v8363_v9  ;;  %v8875_v7 = vadd.f32 %v8874_v21, %v8371_v54  ;;  %v9151_v26 = vmax.f32 %v8830_v20, 0.0  ;;  %v9153_v46 = vmax.f32 %v8873_v14, 0.0  ;;  %v13049_v9 = vld [vmem:[%s16872_s10 + $0x528] sm:$0xff]   ;;  %v13055_v38 = vld [vmem:[%s16872_s10 + $0x558] sm:$0xff]  }
0x1293   :  { %v13050_v54 = vld [vmem:[%s16872_s10 + $0x5a8] sm:$0xff]   ;;  %v13056_v21 = vld [vmem:[%s16872_s10 + $0x5d8] sm:$0xff]  }
0x1294   :  { %v9152_v61 = vmax.f32 %v8832_v40, 0.0  ;;  %v9154_v18 = vmax.f32 %v8875_v7, 0.0  ;;  %v9167_v62 = vpack.c.bf16 %v9151_v26, %v9135_v24  ;;  %v9169_v44 = vpack.c.bf16 %v9153_v46, %v9137_v45  ;;  %v13059_v24 = vld [vmem:[%s16872_s10 + $0x550] sm:$0xff]  }
0x1295   :  { %v13060_v45 = vld [vmem:[%s16872_s10 + $0x5d0] sm:$0xff]  }
0x1296   :  { %v9168_v59 = vpack.c.bf16 %v9152_v61, %v9136_v8  ;;  %v9170_v53 = vpack.c.bf16 %v9154_v18, %v9138_v57  ;;  %v13057_v61 = vld [vmem:[%s16872_s10 + $0x518] sm:$0xff]  }
0x1297   :  { %v13058_v18 = vld [vmem:[%s16872_s10 + $0x598] sm:$0xff]  }
0x1298   :  { %10248 = vmatprep.mubr.bf16.mxu1 %v9168_v59  ;;  %10289 = vmatprep.mubr.bf16.mxu0 %v9170_v53  ;;  %v13061_v59 = vld [vmem:[%s16872_s10 + $0x510] sm:$0xff]  }
0x1299   :  { %10249 = vmatmul.mubr.bf16.vlgmr.msra.gmra.mxu1 %v9167_v62  ;;  %10290 = vmatmul.mubr.bf16.vlgmr.msra.gmra.mxu0 %v9169_v44  ;;  %v13062_v53 = vld [vmem:[%s16872_s10 + $0x590] sm:$0xff]   ;;  %v13063_v62 = vld [vmem:[%s16872_s10 + $0x548] sm:$0xff]  }
0x129a   :  { %12401 = vmatpush3.bf16.msra.mxu1 %v13041_v10  ;;  %12423 = vmatpush3.bf16.msra.mxu0 %v13042_v52  ;;  %v13064_v44 = vld [vmem:[%s16872_s10 + $0x5c8] sm:$0xff]  }
0x129b   :  { %v16366_v4 = vpop.f32.mrf.mxu1  ;;  %v16368_v29 = vpop.f32.mrf.mxu0  ;;  %12402 = vmatprep.subr.bf16.mxu1 %v13043_v55  ;;  %12424 = vmatprep.subr.bf16.mxu0 %v13044_v19  ;;  %v16941_v55 = vld [vmem:[#allocation9_spill] sm:$0xff] }
0x129c   :  { %v8375_v19 = vrot.slane %v16338_v0, %v16941_v55 }
0x129d   :  { %v8913_v63 = vpop.f32.mrf.mxu1  ;;  %v8956_v41 = vpop.f32.mrf.mxu0 }
0x129e   :  { %12403 = vmatpush3.bf16.msra.mxu1 %v13045_v3  ;;  %12425 = vmatpush3.bf16.msra.mxu0 %v13046_v25  ;;  %v8914_v30 = vadd.f32 %v8913_v63, %v8379_v34  ;;  %v8957_v13 = vadd.f32 %v8956_v41, %v8387_v36  ;;  %v16942_v3 = vld [vmem:[#allocation10_spill] sm:$0xff]  ;;  %v13065_v63 = vld [vmem:[%s16872_s10 + $0x508] sm:$0xff]  }
0x129f   :  { %v8915_v2 = vpop.f32.mrf.mxu1  ;;  %v8958_v11 = vpop.f32.mrf.mxu0  ;;  %12404 = vmatprep.subr.bf16.mxu1 %v13047_v43  ;;  %12426 = vmatprep.subr.bf16.mxu0 %v13048_v48  ;;  %v8383_v25 = vrot.slane %v16338_v0, %v16942_v3  ;;  %v16439_v43 = vld [vmem:[%s16871_s9 + $0x18] sm:$0xff]  ;;  %v13066_v0 = vld [vmem:[%s16872_s10 + $0x588] sm:$0xff]  }
0x12a0   :  { %v9140_v40 = vmax.f32 %v8914_v30, 0.0  ;;  %v9142_v7 = vmax.f32 %v8957_v13, 0.0  ;;  %v8916_v41 = vadd.f32 %v8915_v2, %v8375_v19  ;;  %v13068_v30 = vld [vmem:[%s16872_s10 + $0x5c0] sm:$0xff]   ;;  %v8912_v2 = vadd.f32 %v16366_v4, %v8375_v19  ;;  %v13077_v19 = vld [vmem:[%s16872_s10 + $0x630] sm:$0xff]  }
0x12a1   :  { %v8917_v6 = vpop.f32.mrf.mxu1  ;;  %v8960_v56 = vpop.f32.mrf.mxu0 }
0x12a2   :  { %v8918_v20 = vadd.f32 %v8917_v6, %v8379_v34  ;;  %v8961_v14 = vadd.f32 %v8960_v56, %v8387_v36  ;;  %12405 = vmatpush3.bf16.msra.mxu1 %v13049_v9  ;;  %12427 = vmatpush3.bf16.msra.mxu0 %v13050_v54  ;;  %v8395_v36 = vrot.slane %v16439_v43, %v13612_v49  ;;  %v13067_v49 = vld [vmem:[%s16872_s10 + $0x540] sm:$0xff]  }
0x12a3   :  { %12406 = vmatprep.subr.bf16.mxu1 %v13051_v27  ;;  %12428 = vmatprep.subr.bf16.mxu0 %v13052_v33  ;;  %v8959_v9 = vadd.f32 %v8958_v11, %v8383_v25  ;;  %v8403_v54 = vrot.slane %v16439_v43, %v14703_v37  ;;  %v8955_v11 = vadd.f32 %v16368_v29, %v8383_v25  ;;  %v13071_v29 = vld [vmem:[%s16872_s10 + $0x678] sm:$0xff]   ;;  %v13078_v25 = vld [vmem:[%s16872_s10 + $0x6b0] sm:$0xff]  }
0x12a4   :  { %v9156_v26 = vmax.f32 %v8918_v20, 0.0  ;;  %v9158_v46 = vmax.f32 %v8961_v14, 0.0  ;;  %v13069_v14 = vld [vmem:[%s16872_s10 + $0x500] sm:$0xff]  }
0x12a6   :  { %v9172_v8 = vpack.c.bf16 %v9156_v26, %v9140_v40  ;;  %v9174_v57 = vpack.c.bf16 %v9158_v46, %v9142_v7  ;;  %12407 = vmatpush3.bf16.msra.mxu1 %v13053_v42  ;;  %12429 = vmatpush3.bf16.msra.mxu0 %v13054_v32  ;;  %v13070_v42 = vld [vmem:[%s16872_s10 + $0x580] sm:$0xff]   ;;  %v9155_v32 = vmax.f32 %v8916_v41, 0.0  ;;  %v9139_v7 = vmax.f32 %v8912_v2, 0.0  ;;  %v13087_v2 = vld [vmem:[%s16872_s10 + $0x658] sm:$0xff]  }
0x12a7   :  { %12408 = vmatprep.subr.bf16.mxu1 %v13055_v38  ;;  %12430 = vmatprep.subr.bf16.mxu0 %v13056_v21  ;;  %v9157_v38 = vmax.f32 %v8959_v9, 0.0  ;;  %v13072_v21 = vld [vmem:[%s16872_s10 + $0x6f8] sm:$0xff]   ;;  %v9141_v26 = vmax.f32 %v8955_v11, 0.0  ;;  %v13084_v41 = vld [vmem:[%s16872_s10 + $0x6e0] sm:$0xff]  }
0x12a8   :  { %10330 = vmatprep.mubr.bf16.mxu1 %v9172_v8  ;;  %10371 = vmatprep.mubr.bf16.mxu0 %v9174_v57  ;;  %v13073_v57 = vld [vmem:[%s16872_s10 + $0x638] sm:$0xff]  }
0x12a9   :  { %v13088_v11 = vld [vmem:[%s16872_s10 + $0x6d8] sm:$0xff]  }
0x12aa   :  { %12409 = vmatpush3.bf16.msra.mxu1 %v13057_v61  ;;  %12431 = vmatpush3.bf16.msra.mxu0 %v13058_v18  ;;  %v9171_v61 = vpack.c.bf16 %v9155_v32, %v9139_v7  ;;  %v9173_v18 = vpack.c.bf16 %v9157_v38, %v9141_v26  ;;  %v13093_v32 = vld [vmem:[%s16872_s10 + $0x610] sm:$0xff]   ;;  %v8399_v7 = vrot.slane %v16439_v43, %v16938_v15  ;;  %v13099_v15 = vld [vmem:[%s16872_s10 + $0x640] sm:$0xff]  }
0x12ab   :  { %v16422_v10 = vpop.f32.mrf.mxu1  ;;  %v16424_v52 = vpop.f32.mrf.mxu0  ;;  %12410 = vmatprep.subr.bf16.mxu1 %v13059_v24  ;;  %12432 = vmatprep.subr.bf16.mxu0 %v13060_v45  ;;  %v13074_v45 = vld [vmem:[%s16872_s10 + $0x6b8] sm:$0xff]  }
0x12ad   :  { %v8999_v48 = vpop.f32.mrf.mxu1  ;;  %v9042_v34 = vpop.f32.mrf.mxu0 }
0x12ae   :  { %12411 = vmatpush3.bf16.msra.mxu1 %v13061_v59  ;;  %12433 = vmatpush3.bf16.msra.mxu0 %v13062_v53  ;;  %v9000_v6 = vadd.f32 %v8999_v48, %v8395_v36  ;;  %v9043_v4 = vadd.f32 %v9042_v34, %v8403_v54  ;;  %v13075_v53 = vld [vmem:[%s16872_s10 + $0x670] sm:$0xff]   ;;  %v13079_v48 = vld [vmem:[%s16872_s10 + $0x668] sm:$0xff]  }
0x12af   :  { %v16451_v27 = vpop.f32.mrf.mxu1  ;;  %v16453_v33 = vpop.f32.mrf.mxu0  ;;  %12412 = vmatprep.subr.bf16.mxu1 %v13063_v62  ;;  %12434 = vmatprep.subr.bf16.mxu0 %v13064_v44  ;;  %v13076_v62 = vld [vmem:[%s16872_s10 + $0x6f0] sm:$0xff]   ;;  %v13080_v34 = vld [vmem:[%s16872_s10 + $0x6e8] sm:$0xff]  }
0x12b0   :  { %v9144_v8 = vmax.f32 %v9000_v6, 0.0  ;;  %v9146_v24 = vmax.f32 %v9043_v4, 0.0  ;;  %v13094_v4 = vld [vmem:[%s16872_s10 + $0x690] sm:$0xff]  }
0x12b1   :  { %v9003_v13 = vpop.f32.mrf.mxu1  ;;  %v9046_v37 = vpop.f32.mrf.mxu0 }
0x12b2   :  { %v9004_v56 = vadd.f32 %v9003_v13, %v8395_v36  ;;  %v9047_v20 = vadd.f32 %v9046_v37, %v8403_v54  ;;  %12413 = vmatpush3.bf16.msra.mxu1 %v13065_v63  ;;  %12435 = vmatpush3.bf16.msra.mxu0 %v13066_v0  ;;  %v13081_v36 = vld [vmem:[%s16872_s10 + $0x628] sm:$0xff]   ;;  %v13083_v0 = vld [vmem:[%s16872_s10 + $0x660] sm:$0xff]   ;;  %v13089_v37 = vld [vmem:[%s16872_s10 + $0x618] sm:$0xff]  }
0x12b3   :  { %12414 = vmatprep.subr.bf16.mxu1 %v13067_v49  ;;  %12436 = vmatprep.subr.bf16.mxu0 %v13068_v30  ;;  %v13082_v63 = vld [vmem:[%s16872_s10 + $0x6a8] sm:$0xff]   ;;  %v13085_v54 = vld [vmem:[%s16872_s10 + $0x620] sm:$0xff]  }
0x12b4   :  { %v9160_v40 = vmax.f32 %v9004_v56, 0.0  ;;  %v9162_v46 = vmax.f32 %v9047_v20, 0.0  ;;  %v13086_v30 = vld [vmem:[%s16872_s10 + $0x6a0] sm:$0xff]   ;;  %v13090_v56 = vld [vmem:[%s16872_s10 + $0x698] sm:$0xff]   ;;  %v13091_v20 = vld [vmem:[%s16872_s10 + $0x650] sm:$0xff]  }
0x12b6   :  { %12415 = vmatpush3.bf16.msra.mxu1 %v13069_v14  ;;  %12437 = vmatpush3.bf16.msra.mxu0 %v13070_v42  ;;  %v9176_v59 = vpack.c.bf16 %v9160_v40, %v9144_v8  ;;  %v9178_v44 = vpack.c.bf16 %v9162_v46, %v9146_v24  ;;  %v13092_v14 = vld [vmem:[%s16872_s10 + $0x6d0] sm:$0xff]   ;;  %v8391_v40 = vrot.slane %v16439_v43, %v16937_v47  ;;  %v13097_v46 = vld [vmem:[%s16872_s10 + $0x608] sm:$0xff]  }
0x12b7   :  { %12444 = vmatprep.subr.bf16.mxu1 %v13071_v29  ;;  %12466 = vmatprep.subr.bf16.mxu0 %v13072_v21  ;;  %v13095_v29 = vld [vmem:[%s16872_s10 + $0x648] sm:$0xff]   ;;  %v8419_v24 = vrot.slane %v16439_v43, %v16940_v28  ;;  %v13102_v28 = vld [vmem:[%s16872_s10 + $0x680] sm:$0xff]  }
0x12b8   :  { %v13096_v21 = vld [vmem:[%s16872_s10 + $0x6c8] sm:$0xff]   ;;  %v9002_v8 = vadd.f32 %v16451_v27, %v8391_v40  ;;  %v8998_v27 = vadd.f32 %v16422_v10, %v8391_v40  ;;  %v13103_v10 = vld [vmem:[%s16872_s10 + $0x778] sm:$0xff]   ;;  %v13115_v40 = vld [vmem:[%s16872_s10 + $0x760] sm:$0xff]  }
0x12b9   :  { %10331 = vmatmul.mubr.bf16.vlgmr.msra.gmra.mxu1 %v9171_v61  ;;  %10372 = vmatmul.mubr.bf16.vlgmr.msra.gmra.mxu0 %v9173_v18  ;;  %v13098_v47 = vld [vmem:[%s16872_s10 + $0x688] sm:$0xff]   ;;  %v9045_v18 = vadd.f32 %v16453_v33, %v8399_v7 }
0x12ba   :  { %12445 = vmatpush3.bf16.msra.mxu1 %v13073_v57  ;;  %10412 = vmatprep.mubr.bf16.mxu1 %v9176_v59  ;;  %v8411_v57 = vrot.slane %v16439_v43, %v16939_v5  ;;  %v13100_v5 = vld [vmem:[%s16872_s10 + $0x6c0] sm:$0xff]   ;;  %v9041_v59 = vadd.f32 %v16424_v52, %v8399_v7  ;;  %v9159_v33 = vmax.f32 %v9002_v8, 0.0  ;;  %v13119_v8 = vld [vmem:[%s16872_s10 + $0x758] sm:$0xff]  }
0x12bb   :  { %12467 = vmatpush3.bf16.msra.mxu0 %v13074_v45  ;;  %10453 = vmatprep.mubr.bf16.mxu0 %v9178_v44  ;;  %v16511_v9 = vpop.f32.mrf.mxu1  ;;  %v16516_v49 = vpop.f32.mrf.mxu0  ;;  %v13116_v7 = vld [vmem:[%s16872_s10 + $0x7e0] sm:$0xff]  }
0x12bc   :  { %12446 = vmatprep.subr.bf16.mxu1 %v13075_v53  ;;  %12468 = vmatprep.subr.bf16.mxu0 %v13076_v62  ;;  %v13101_v62 = vld [vmem:[%s16872_s10 + $0x600] sm:$0xff]  }
0x12bd   :  { %v9085_v13 = vpop.f32.mrf.mxu1  ;;  %v9128_v6 = vpop.f32.mrf.mxu0 }
0x12be   :  { %12447 = vmatpush3.bf16.msra.mxu1 %v13077_v19  ;;  %v9086_v44 = vadd.f32 %v9085_v13, %v8411_v57  ;;  %v9161_v19 = vmax.f32 %v9045_v18, 0.0  ;;  %v9129_v52 = vadd.f32 %v9128_v6, %v8419_v24  ;;  %v13107_v13 = vld [vmem:[%s16872_s10 + $0x770] sm:$0xff]  }
0x12bf   :  { %12469 = vmatpush3.bf16.msra.mxu0 %v13078_v25  ;;  %12448 = vmatprep.subr.bf16.mxu1 %v13079_v48  ;;  %v16539_v42 = vpop.f32.mrf.mxu1  ;;  %v16544_v38 = vpop.f32.mrf.mxu0  ;;  %v13104_v25 = vld [vmem:[%s16872_s10 + $0x7f8] sm:$0xff]   ;;  %v9143_v48 = vmax.f32 %v8998_v27, 0.0  ;;  %v13108_v6 = vld [vmem:[%s16872_s10 + $0x7f0] sm:$0xff]   ;;  %v13127_v27 = vld [vmem:[%s16872_s10 + $0x748] sm:$0xff]  }
0x12c0   :  { %12470 = vmatprep.subr.bf16.mxu0 %v13080_v34  ;;  %v13124_v18 = vld [vmem:[%s16872_s10 + $0x7d0] sm:$0xff]  }
0x12c1   :  { %v9089_v26 = vpop.f32.mrf.mxu1  ;;  %v9132_v61 = vpop.f32.mrf.mxu0 }
0x12c2   :  { %12449 = vmatpush3.bf16.msra.mxu1 %v13081_v36  ;;  %v9090_v45 = vadd.f32 %v9089_v26, %v8411_v57  ;;  %v9133_v53 = vadd.f32 %v9132_v61, %v8419_v24  ;;  %v9145_v36 = vmax.f32 %v9041_v59, 0.0  ;;  %v13117_v26 = vld [vmem:[%s16872_s10 + $0x720] sm:$0xff]   ;;  %v13120_v57 = vld [vmem:[%s16872_s10 + $0x7d8] sm:$0xff]   ;;  %v13125_v24 = vld [vmem:[%s16872_s10 + $0x710] sm:$0xff]   ;;  %v8407_v59 = vrot.slane %v16439_v43, %v16941_v55 }
0x12c3   :  { %12471 = vmatpush3.bf16.msra.mxu0 %v13082_v63  ;;  %12450 = vmatprep.subr.bf16.mxu1 %v13083_v0  ;;  %v13105_v0 = vld [vmem:[%s16872_s10 + $0x738] sm:$0xff]   ;;  %v13131_v55 = vld [vmem:[%s16872_s10 + $0x740] sm:$0xff]  }
0x12c4   :  { %12472 = vmatprep.subr.bf16.mxu0 %v13084_v41  ;;  %v9164_v34 = vmax.f32 %v9090_v45, 0.0  ;;  %v9166_v63 = vmax.f32 %v9133_v53, 0.0  ;;  %v9175_v41 = vpack.c.bf16 %v9159_v33, %v9143_v48  ;;  %v13121_v61 = vld [vmem:[%s16872_s10 + $0x718] sm:$0xff]   ;;  %v13128_v45 = vld [vmem:[%s16872_s10 + $0x7c8] sm:$0xff]   ;;  %v8415_v53 = vrot.slane %v16439_v43, %v16942_v3  ;;  %v13132_v3 = vld [vmem:[%s16872_s10 + $0x7c0] sm:$0xff]  }
0x12c5   :  { %v9088_v33 = vadd.f32 %v16539_v42, %v8407_v59  ;;  %v9084_v43 = vadd.f32 %v16511_v9, %v8407_v59 }
0x12c6   :  { %12451 = vmatpush3.bf16.msra.mxu1 %v13085_v54  ;;  %v9148_v54 = vmax.f32 %v9086_v44, 0.0  ;;  %v13130_v44 = vld [vmem:[%s16872_s10 + $0x788] sm:$0xff]   ;;  %v9127_v42 = vadd.f32 %v16516_v49, %v8415_v53 }
0x12c7   :  { %12473 = vmatpush3.bf16.msra.mxu0 %v13086_v30  ;;  %12452 = vmatprep.subr.bf16.mxu1 %v13087_v2  ;;  %v13106_v30 = vld [vmem:[%s16872_s10 + $0x7b8] sm:$0xff]   ;;  %v9177_v2 = vpack.c.bf16 %v9161_v19, %v9145_v36  ;;  %v9163_v19 = vmax.f32 %v9088_v33, 0.0 }
0x12c8   :  { %12474 = vmatprep.subr.bf16.mxu0 %v13088_v11  ;;  %v9150_v11 = vmax.f32 %v9129_v52, 0.0  ;;  %v9149_v48 = vmax.f32 %v9127_v42, 0.0 }
0x12ca   :  { %12453 = vmatpush3.bf16.msra.mxu1 %v13089_v37  ;;  %v9180_v37 = vpack.c.bf16 %v9164_v34, %v9148_v54 }
0x12cb   :  { %12475 = vmatpush3.bf16.msra.mxu0 %v13090_v56  ;;  %12454 = vmatprep.subr.bf16.mxu1 %v13091_v20  ;;  %v9182_v56 = vpack.c.bf16 %v9166_v63, %v9150_v11  ;;  %v13109_v20 = vld [vmem:[%s16872_s10 + $0x730] sm:$0xff]  }
0x12cc   :  { %12476 = vmatprep.subr.bf16.mxu0 %v13092_v14  ;;  %v13110_v14 = vld [vmem:[%s16872_s10 + $0x7b0] sm:$0xff]  }
0x12ce   :  { %12455 = vmatpush3.bf16.msra.mxu1 %v13093_v32  ;;  %v13111_v32 = vld [vmem:[%s16872_s10 + $0x768] sm:$0xff]  }
0x12cf   :  { %12477 = vmatpush3.bf16.msra.mxu0 %v13094_v4  ;;  %12456 = vmatprep.subr.bf16.mxu1 %v13095_v29  ;;  %v13112_v4 = vld [vmem:[%s16872_s10 + $0x7e8] sm:$0xff]  }
0x12d0   :  { %12478 = vmatprep.subr.bf16.mxu0 %v13096_v21  ;;  %v13113_v29 = vld [vmem:[%s16872_s10 + $0x728] sm:$0xff]  }
0x12d1   :  { %v13114_v21 = vld [vmem:[%s16872_s10 + $0x7a8] sm:$0xff]  }
0x12d2   :  { %12457 = vmatpush3.bf16.msra.mxu1 %v13097_v46  ;;  %v13118_v46 = vld [vmem:[%s16872_s10 + $0x7a0] sm:$0xff]  }
0x12d3   :  { %12479 = vmatpush3.bf16.msra.mxu0 %v13098_v47  ;;  %12458 = vmatprep.subr.bf16.mxu1 %v13099_v15  ;;  %v13122_v47 = vld [vmem:[%s16872_s10 + $0x798] sm:$0xff]   ;;  %v13123_v15 = vld [vmem:[%s16872_s10 + $0x750] sm:$0xff]  }
0x12d4   :  { %12480 = vmatprep.subr.bf16.mxu0 %v13100_v5  ;;  %v13126_v5 = vld [vmem:[%s16872_s10 + $0x790] sm:$0xff]  }
0x12d6   :  { %12459 = vmatpush3.bf16.msra.mxu1 %v13101_v62  ;;  %v13129_v62 = vld [vmem:[%s16872_s10 + $0x708] sm:$0xff]  }
0x12d7   :  { %12481 = vmatpush3.bf16.msra.mxu0 %v13102_v28  ;;  %12488 = vmatprep.subr.bf16.mxu1 %v13103_v10  ;;  %v9131_v28 = vadd.f32 %v16544_v38, %v8415_v53  ;;  %v13133_v10 = vld [vmem:[%s16872_s10 + $0x700] sm:$0xff]  }
0x12d8   :  { %12510 = vmatprep.subr.bf16.mxu0 %v13104_v25  ;;  %v13134_v38 = vld [vmem:[%s16872_s10 + $0x780] sm:$0xff]   ;;  %v9147_v25 = vmax.f32 %v9084_v43, 0.0 }
0x12d9   :  { %10413 = vmatmul.mubr.bf16.vlgmr.msra.gmra.mxu1 %v9175_v41  ;;  %v9165_v52 = vmax.f32 %v9131_v28, 0.0 }
0x12da   :  { %10454 = vmatmul.mubr.bf16.vlgmr.msra.gmra.mxu0 %v9177_v2  ;;  %12489 = vmatpush3.bf16.msra.mxu1 %v13105_v0  ;;  %v9179_v9 = vpack.c.bf16 %v9163_v19, %v9147_v25 }
0x12db   :  { %10494 = vmatprep.mubr.bf16.mxu1 %v9180_v37  ;;  %12511 = vmatpush3.bf16.msra.mxu0 %v13106_v30  ;;  %v9181_v49 = vpack.c.bf16 %v9165_v52, %v9149_v48 }
0x12dc   :  { %10535 = vmatprep.mubr.bf16.mxu0 %v9182_v56  ;;  %12490 = vmatprep.subr.bf16.mxu1 %v13107_v13 }
0x12dd   :  { %12512 = vmatprep.subr.bf16.mxu0 %v13108_v6 }
0x12de   :  { %12491 = vmatpush3.bf16.msra.mxu1 %v13109_v20 }
0x12df   :  { %12513 = vmatpush3.bf16.msra.mxu0 %v13110_v14  ;;  %12492 = vmatprep.subr.bf16.mxu1 %v13111_v32 }
0x12e0   :  { %12514 = vmatprep.subr.bf16.mxu0 %v13112_v4  ;;  %v11867_v4 = vld [vmem:[%s16873_s11 + $0x1] ss:$0 sm:$0xff] }
0x12e2   :  { %12493 = vmatpush3.bf16.msra.mxu1 %v13113_v29 }
0x12e3   :  { %12515 = vmatpush3.bf16.msra.mxu0 %v13114_v21  ;;  %12494 = vmatprep.subr.bf16.mxu1 %v13115_v40 }
0x12e4   :  { %12516 = vmatprep.subr.bf16.mxu0 %v13116_v7 }
0x12e6   :  { %12495 = vmatpush3.bf16.msra.mxu1 %v13117_v26 }
0x12e7   :  { %12517 = vmatpush3.bf16.msra.mxu0 %v13118_v46  ;;  %12496 = vmatprep.subr.bf16.mxu1 %v13119_v8 }
0x12e8   :  { %12518 = vmatprep.subr.bf16.mxu0 %v13120_v57 }
0x12ea   :  { %12497 = vmatpush3.bf16.msra.mxu1 %v13121_v61 }
0x12eb   :  { %12519 = vmatpush3.bf16.msra.mxu0 %v13122_v47  ;;  %12498 = vmatprep.subr.bf16.mxu1 %v13123_v15 }
0x12ec   :  { %12520 = vmatprep.subr.bf16.mxu0 %v13124_v18 }
0x12ee   :  { %12499 = vmatpush3.bf16.msra.mxu1 %v13125_v24 }
0x12ef   :  { %12521 = vmatpush3.bf16.msra.mxu0 %v13126_v5  ;;  %12500 = vmatprep.subr.bf16.mxu1 %v13127_v27 }
0x12f0   :  { %12522 = vmatprep.subr.bf16.mxu0 %v13128_v45 }
0x12f2   :  { %12501 = vmatpush3.bf16.msra.mxu1 %v13129_v62 }
0x12f3   :  { %12523 = vmatpush3.bf16.msra.mxu0 %v13130_v44  ;;  %12502 = vmatprep.subr.bf16.mxu1 %v13131_v55 }
0x12f4   :  { %12524 = vmatprep.subr.bf16.mxu0 %v13132_v3 }
0x12f6   :  { %12503 = vmatpush3.bf16.msra.mxu1 %v13133_v10 }
0x12f7   :  { %12525 = vmatpush3.bf16.msra.mxu0 %v13134_v38 }
0x12f9   :  { %10495 = vmatmul.mubr.bf16.vlgmr.msra.gmra.mxu1 %v9179_v9 }
0x12fa   :  { %10536 = vmatmul.mubr.bf16.vlgmr.msra.gmra.mxu0 %v9181_v49 }
0x1359   :  { %v12372_v34 = vpop.f32.mrf.mxu1  ;;  %v12394_v36 = vpop.f32.mrf.mxu0 }
0x135b   :  { %v12373_v63 = vpop.f32.mrf.mxu1  ;;  %v12395_v0 = vpop.f32.mrf.mxu0 }
0x135c   :  { %v12374_v32 = vadd.f32 %v12373_v63, %v12372_v34  ;;  %v12396_v8 = vadd.f32 %v12395_v0, %v12394_v36 }
0x135d   :  { %v12375_v41 = vpop.f32.mrf.mxu1  ;;  %v12397_v54 = vpop.f32.mrf.mxu0 }
0x135e   :  { %v10251_v40 = vadd.f32 %v12374_v32, %v11867_v4 }
0x135f   :  { %v12376_v30 = vpop.f32.mrf.mxu1  ;;  %v12398_v11 = vpop.f32.mrf.mxu0 }
0x1360   :  { %v12377_v7 = vadd.f32 %v12376_v30, %v12375_v41  ;;  %v10292_v61 = vadd.f32 %v12396_v8, %v10251_v40  ;;  %v12399_v24 = vadd.f32 %v12398_v11, %v12397_v54 }
0x1362   :  { %v10254_v47 = vadd.f32 %v12377_v7, %v11867_v4 }
0x1364   :  { %v10295_v45 = vadd.f32 %v12399_v24, %v10254_v47 }
0x1379   :  { %v12416_v2 = vpop.f32.mrf.mxu1  ;;  %v12438_v13 = vpop.f32.mrf.mxu0 }
0x137b   :  { %v12417_v37 = vpop.f32.mrf.mxu1  ;;  %v12439_v6 = vpop.f32.mrf.mxu0 }
0x137c   :  { %v12418_v57 = vadd.f32 %v12417_v37, %v12416_v2  ;;  %v12440_v59 = vadd.f32 %v12439_v6, %v12438_v13 }
0x137d   :  { %v12419_v56 = vpop.f32.mrf.mxu1  ;;  %v12441_v20 = vpop.f32.mrf.mxu0 }
0x137e   :  { %v10333_v5 = vadd.f32 %v12418_v57, %v10292_v61 }
0x137f   :  { %v12420_v14 = vpop.f32.mrf.mxu1  ;;  %v12442_v21 = vpop.f32.mrf.mxu0 }
0x1380   :  { %v12421_v27 = vadd.f32 %v12420_v14, %v12419_v56  ;;  %v10374_v44 = vadd.f32 %v12440_v59, %v10333_v5  ;;  %v12443_v28 = vadd.f32 %v12442_v21, %v12441_v20 }
0x1382   :  { %v10336_v55 = vadd.f32 %v12421_v27, %v10295_v45 }
0x1384   :  { %v10377_v19 = vadd.f32 %v12443_v28, %v10336_v55 }
0x1399   :  { %v12460_v29 = vpop.f32.mrf.mxu1 }
0x139a   :  { %v12482_v26 = vpop.f32.mrf.mxu0 }
0x139b   :  { %v12461_v46 = vpop.f32.mrf.mxu1 }
0x139c   :  { %v12483_v15 = vpop.f32.mrf.mxu0  ;;  %v12462_v53 = vadd.f32 %v12461_v46, %v12460_v29 }
0x139d   :  { %v12463_v18 = vpop.f32.mrf.mxu1  ;;  %v12484_v38 = vadd.f32 %v12483_v15, %v12482_v26 }
0x139e   :  { %v12485_v62 = vpop.f32.mrf.mxu0  ;;  %v10415_v3 = vadd.f32 %v12462_v53, %v10374_v44 }
0x139f   :  { %v12464_v33 = vpop.f32.mrf.mxu1 }
0x13a0   :  { %v12465_v43 = vadd.f32 %v12464_v33, %v12463_v18  ;;  %v12486_v42 = vpop.f32.mrf.mxu0  ;;  %v10456_v48 = vadd.f32 %v12484_v38, %v10415_v3 }
0x13a1   :  { %v12487_v63 = vadd.f32 %v12486_v42, %v12485_v62 }
0x13a2   :  { %v10418_v9 = vadd.f32 %v12465_v43, %v10377_v19 }
0x13a4   :  { %v10459_v2 = vadd.f32 %v12487_v63, %v10418_v9 }
0x13b9   :  { %v12504_v10 = vpop.f32.mrf.mxu1 }
0x13ba   :  { %v12526_v52 = vpop.f32.mrf.mxu0 }
0x13bb   :  { %v12505_v25 = vpop.f32.mrf.mxu1 }
0x13bc   :  { %v12506_v49 = vadd.f32 %v12505_v25, %v12504_v10  ;;  %v12527_v34 = vpop.f32.mrf.mxu0 }
0x13bd   :  { %v12507_v36 = vpop.f32.mrf.mxu1  ;;  %v12528_v41 = vadd.f32 %v12527_v34, %v12526_v52 }
0x13be   :  { %v10497_v0 = vadd.f32 %v12506_v49, %v10456_v48  ;;  %v12529_v54 = vpop.f32.mrf.mxu0 }
0x13bf   :  { %v12508_v30 = vpop.f32.mrf.mxu1 }
0x13c0   :  { %v10538_v11 = vadd.f32 %v12528_v41, %v10497_v0  ;;  %v12509_v13 = vadd.f32 %v12508_v30, %v12507_v36  ;;  %v12530_v37 = vpop.f32.mrf.mxu0 }
0x13c1   :  { %v12531_v14 = vadd.f32 %v12530_v37, %v12529_v54 }
0x13c2   :  { %v10546_v6 = vcombine.high %v10538_v11, %v10538_v11  ;;  %v10553_v56 = vrot.slane %v10538_v11, %v13546_v22  ;;  %v10500_v20 = vadd.f32 %v12509_v13, %v10459_v2 }
0x13c4   :  { %v10560_v32 = vrot.slane %v10546_v6, %v13546_v22  ;;  %v10561_v4 = vcombine.high %v10553_v56, %v10553_v56  ;;  %v10541_v29 = vadd.f32 %v12531_v14, %v10500_v20  ;;  %v10588_v40 = vadd.f32 %v10553_v56, %v16033_v58 }
0x13c6   :  { %v10562_v21 = vcombine.high %v10560_v32, %v10560_v32  ;;  %v10589_v7 = vadd.f32 %v10561_v4, %v16035_v23  ;;  %v10563_v26 = vcombine.high %v10541_v29, %v10541_v29  ;;  %v10570_v46 = vrot.slane %v10541_v29, %v13546_v22 }
0x13c7   :  { %v10590_v8 = vadd.f32 %v10560_v32, %v16037_v17 }
0x13c8   :  { %v10577_v57 = vrot.slane %v10563_v26, %v13546_v22  ;;  %v10591_v61 = vadd.f32 %v10562_v21, %v16039_v16  ;;  %v10608_v47 = vcombine.low %v10588_v40, %v10589_v7  ;;  %v10578_v15 = vcombine.high %v10570_v46, %v10570_v46 }
0x13c9   :  { %v10592_v5 = vadd.f32 %v10570_v46, %v16045_v39 }
0x13ca   :  { %v10579_v18 = vcombine.high %v10577_v57, %v10577_v57  ;;  %v10609_v24 = vcombine.low %v10590_v8, %v10591_v61  ;;  %v10593_v27 = vadd.f32 %v10578_v15, %v16047_v1  ;;  %v10594_v58 = vadd.f32 %v10577_v57, %v16049_v12 }
0x13cb   :  { %v10616_v23 = vrot.slane %v10608_v47, %v13546_v22 }
0x13cc   :  { %v10623_v45 = vrot.slane %v10609_v24, %v13546_v22  ;;  %v10595_v17 = vadd.f32 %v10579_v18, %v16051_v50  ;;  %v10625_v59 = vcombine.low %v10592_v5, %v10593_v27 }
0x13ce   :  { %v10624_v53 = vcombine.low %v10616_v23, %v10623_v45  ;;  %v10626_v62 = vcombine.low %v10594_v58, %v10595_v17  ;;  %v10633_v33 = vrot.slane %v10625_v59, %v13546_v22 }
0x13d0   :  { %v10644_v16 = vsel %vm129_vm1, %v10624_v53, 0.0  ;;  %v10640_v44 = vrot.slane %v10626_v62, %v13546_v22 }
0x13d1   :  { %10645 = vadd.xlane.f32.xlu1 %v10644_v16 }
0x13d2   :  { %v10641_v39 = vcombine.low %v10633_v33, %v10640_v44 }
0x13d4   :  { %v10647_v1 = vsel %vm129_vm1, %v10641_v39, 0.0 }
0x13d5   :  { %10648 = vadd.xlane.f32.xlu0 %v10647_v1 }
0x145a   :  { %v10646_v12 = vpop.xlane.xlu1 %10645 }
0x145b   :  { %v10650_v55 = vmul.f32 0.016666668, %v10646_v12 }
0x145d   :  { %v10660_v28 = vrot.slane %v10650_v55, %v14233_v35  ;;  %v10667_v50 = vrot.slane %v10650_v55, %v14236_v60  ;;  %v10674_v3 = vrot.slane %v10650_v55, %v14239_v31  ;;  %v10681_v43 = vrot.slane %v10650_v55, %v14242_v51 }
0x145e   :  { %v10649_v42 = vpop.xlane.xlu0 %10648 }
0x145f   :  { %v10718_v10 = vsub.f32 %v10588_v40, %v10660_v28  ;;  %v10719_v19 = vsub.f32 %v10589_v7, %v10667_v50  ;;  %v10720_v38 = vsub.f32 %v10590_v8, %v10674_v3  ;;  %v10721_v52 = vsub.f32 %v10591_v61, %v10681_v43 }
0x1460   :  { %v10651_v25 = vmul.f32 0.016666668, %v10649_v42 }
0x1461   :  { %v10726_v48 = vmul.f32 %v10718_v10, %v10718_v10  ;;  %v10727_v9 = vmul.f32 %v10719_v19, %v10719_v19  ;;  %v10728_v49 = vmul.f32 %v10720_v38, %v10720_v38  ;;  %v10729_v34 = vmul.f32 %v10721_v52, %v10721_v52 }
0x1462   :  { %v10688_v36 = vrot.slane %v10651_v25, %v14233_v35  ;;  %v10695_v63 = vrot.slane %v10651_v25, %v14236_v60  ;;  %v10702_v0 = vrot.slane %v10651_v25, %v14239_v31  ;;  %v10709_v41 = vrot.slane %v10651_v25, %v14242_v51 }
0x1463   :  { %v10742_v54 = vcombine.low %v10726_v48, %v10727_v9  ;;  %v10743_v30 = vcombine.low %v10728_v49, %v10729_v34 }
0x1464   :  { %v10722_v2 = vsub.f32 %v10592_v5, %v10688_v36  ;;  %v10723_v11 = vsub.f32 %v10593_v27, %v10695_v63  ;;  %v10724_v13 = vsub.f32 %v10594_v58, %v10702_v0  ;;  %v10725_v37 = vsub.f32 %v10595_v17, %v10709_v41  ;;  %v11998_v5 = vld [vmem:[%s16874_s12 + $0x1] ss:$0 sm:$0xff]  ;;  %s13418_s12 = smov [#allocation2]  }
0x1465   :  { %v10750_v6 = vrot.slane %v10742_v54, %v13546_v22  ;;  %v10757_v56 = vrot.slane %v10743_v30, %v13546_v22  ;;  %v11999_v58 = vld [vmem:[%s16875_s13 + $0x1] ss:$0 sm:$0xff]  ;;  %v10869_v23 = vcombine.high %v11998_v5, %v11998_v5  ;;  %v10876_v17 = vrot.slane %v11998_v5, %v13546_v22  ;;  %s11074_s13 = sshll.u32 %s13418_s12, 4  ;;  %s11075_s13 = int_to_ptr.vmem [resolvable:$true] %s11074_s13 }
0x1466   :  { %v10730_v20 = vmul.f32 %v10722_v2, %v10722_v2  ;;  %v10731_v14 = vmul.f32 %v10723_v11, %v10723_v11  ;;  %v10732_v32 = vmul.f32 %v10724_v13, %v10724_v13  ;;  %v10733_v4 = vmul.f32 %v10725_v37, %v10725_v37  ;;  %s13369_s1 = scalar_lea.vmem %s11075_s13, 256  ;;  %p13374_p1 = scmp.lt.s32.totalorder %s11075_s13, %s11075_s13 }
0x1467   :  { %v10758_v29 = vcombine.low %v10750_v6, %v10757_v56  ;;  %v10903_v45 = vcombine.high %v11999_v58, %v11999_v58  ;;  %v10883_v59 = vrot.slane %v10869_v23, %v13546_v22  ;;  %v10910_v53 = vrot.slane %v11999_v58, %v13546_v22  ;;  %p13370_p0 = scmp.ne.s32.totalorder %s11075_s13, %s13369_s1  ;;  %p13375_p2 = scmp.lt.s32.totalorder %s13369_s1, %s13369_s1 }
0x1468   :  { %v10759_v21 = vcombine.low %v10730_v20, %v10731_v14  ;;  %v10760_v40 = vcombine.low %v10732_v32, %v10733_v4  ;;  %v10884_v33 = vcombine.high %v10876_v17, %v10876_v17 }
0x1469   :  { %v10778_v7 = vsel %vm129_vm1, %v10758_v29, 0.0  ;;  %v10917_v62 = vrot.slane %v10903_v45, %v13546_v22  ;;  %v10885_v44 = vcombine.high %v10883_v59, %v10883_v59  ;;  %v10918_v28 = vcombine.high %v10910_v53, %v10910_v53  ;;  %p13376_p3 = por %p13375_p2, %p13374_p1 }
0x146a   :  { %10779 = vadd.xlane.f32.xlu1 %v10778_v7  ;;  %v10767_v26 = vrot.slane %v10759_v21, %v13546_v22  ;;  %v10774_v46 = vrot.slane %v10760_v40, %v13546_v22 }
0x146b   :  { %v10919_v50 = vcombine.high %v10917_v62, %v10917_v62  ;;  %p13377_p4 = pnand %p13376_p3, %p13370_p0 }
0x146c   :  { %v10775_v8 = vcombine.low %v10767_v26, %v10774_v46 }
0x146e   :  { %v10781_v57 = vsel %vm129_vm1, %v10775_v8, 0.0 }
0x146f   :  { %10782 = vadd.xlane.f32.xlu0 %v10781_v57 }
0x14f3   :  { %v10780_v61 = vpop.xlane.xlu1 %10779 }
0x14f4   :  { %v10784_v47 = vmul.f32 0.016666668, %v10780_v61 }
0x14f6   :  { %v10786_v15 = vadd.f32 1e-05, %v10784_v47 }
0x14f8   :  { %13307 = vrsqrt.f32 %v10786_v15  ;;  %v10783_v18 = vpop.xlane.xlu0 %10782 }
0x14f9   :  { %v10785_v24 = vmul.f32 0.016666668, %v10783_v18 }
0x14fb   :  { %v10787_v27 = vadd.f32 1e-05, %v10785_v24 }
0x14fd   :  { %13309 = vrsqrt.f32 %v10787_v27 }
0x1505   :  { %v13308_v16 = vpop.eup %13307 }
0x1506   :  { %v10798_v39 = vrot.slane %v13308_v16, %v14233_v35  ;;  %v10805_v1 = vrot.slane %v13308_v16, %v14236_v60  ;;  %v10812_v12 = vrot.slane %v13308_v16, %v14239_v31  ;;  %v10819_v55 = vrot.slane %v13308_v16, %v14242_v51 }
0x1508   :  { %v10856_v3 = vmul.f32 %v10798_v39, %v10718_v10  ;;  %v10857_v43 = vmul.f32 %v10805_v1, %v10719_v19  ;;  %v10858_v42 = vmul.f32 %v10812_v12, %v10720_v38  ;;  %v10859_v25 = vmul.f32 %v10819_v55, %v10721_v52 }
0x150a   :  { %v13310_v48 = vpop.eup %13309  ;;  %v10890_v9 = vmul.f32 %v10876_v17, %v10856_v3  ;;  %v10891_v22 = vmul.f32 %v10884_v33, %v10857_v43  ;;  %v10892_v49 = vmul.f32 %v10883_v59, %v10858_v42  ;;  %v10893_v34 = vmul.f32 %v10885_v44, %v10859_v25 }
0x150b   :  { %v10826_v36 = vrot.slane %v13310_v48, %v14233_v35  ;;  %v10833_v63 = vrot.slane %v13310_v48, %v14236_v60  ;;  %v10840_v0 = vrot.slane %v13310_v48, %v14239_v31  ;;  %v10847_v41 = vrot.slane %v13310_v48, %v14242_v51 }
0x150c   :  { %v16742_v54 = vadd.f32 %v10910_v53, %v10890_v9  ;;  %v16744_v30 = vadd.f32 %v10918_v28, %v10891_v22  ;;  %v16746_v10 = vadd.f32 %v10917_v62, %v10892_v49  ;;  %v16748_v19 = vadd.f32 %v10919_v50, %v10893_v34 }
0x150d   :  { %v10860_v38 = vmul.f32 %v10826_v36, %v10722_v2  ;;  %v10861_v52 = vmul.f32 %v10833_v63, %v10723_v11  ;;  %v10862_v6 = vmul.f32 %v10840_v0, %v10724_v13  ;;  %v10863_v56 = vmul.f32 %v10847_v41, %v10725_v37 }
0x150e   :  { %v10940_v31 = vmin.f32 %v16742_v54, 20.0  ;;  %v10941_v51 = vmin.f32 %v16744_v30, 20.0  ;;  %v10942_v32 = vmin.f32 %v16746_v10, 20.0  ;;  %v10943_v2 = vmin.f32 %v16748_v19, 20.0 }
0x150f   :  { %v10894_v20 = vmul.f32 %v10876_v17, %v10860_v38  ;;  %v10895_v35 = vmul.f32 %v10884_v33, %v10861_v52  ;;  %v10896_v14 = vmul.f32 %v10883_v59, %v10862_v6  ;;  %v10897_v60 = vmul.f32 %v10885_v44, %v10863_v56 }
0x1510   :  { %v10948_v13 = vmul.f32 1.442695, %v10940_v31  ;;  %v10950_v37 = vmul.f32 1.442695, %v10941_v51  ;;  %v10952_v40 = vmul.f32 1.442695, %v10942_v32 }
0x1511   :  { %v16753_v4 = vadd.f32 %v10910_v53, %v10894_v20  ;;  %v16755_v29 = vadd.f32 %v10918_v28, %v10895_v35  ;;  %v16757_v21 = vadd.f32 %v10917_v62, %v10896_v14  ;;  %v16760_v11 = vadd.f32 %v10919_v50, %v10897_v60 }
0x1512   :  { %13311 = vpow2.f32 %v10948_v13  ;;  %v10954_v8 = vmul.f32 1.442695, %v10943_v2  ;;  %vm10932_vm14 = vcmp.gt.f32.partialorder %v16742_v54, 20.0  ;;  %vm10933_vm15 = vcmp.gt.f32.partialorder %v16744_v30, 20.0 }
0x1513   :  { %v10944_v7 = vmin.f32 %v16753_v4, 20.0  ;;  %v10945_v26 = vmin.f32 %v16755_v29, 20.0  ;;  %v10946_v46 = vmin.f32 %v16757_v21, 20.0  ;;  %v10947_v57 = vmin.f32 %v16760_v11, 20.0 }
0x1514   :  { %13313 = vpow2.f32 %v10950_v37  ;;  %vm10934_vm0 = vcmp.gt.f32.partialorder %v16746_v10, 20.0  ;;  %vm10935_vm1 = vcmp.gt.f32.partialorder %v16748_v19, 20.0  ;;  %vm10936_vm4 = vcmp.gt.f32.partialorder %v16753_v4, 20.0 }
0x1515   :  { %v10956_v61 = vmul.f32 1.442695, %v10944_v7  ;;  %13315 = vpow2.f32 %v10952_v40  ;;  %v10958_v47 = vmul.f32 1.442695, %v10945_v26  ;;  %v10960_v15 = vmul.f32 1.442695, %v10946_v46 }
0x1516   :  { %13317 = vpow2.f32 %v10954_v8  ;;  %v10962_v18 = vmul.f32 1.442695, %v10947_v57  ;;  %vm10937_vm7 = vcmp.gt.f32.partialorder %v16755_v29, 20.0  ;;  %vm10938_vm10 = vcmp.gt.f32.partialorder %v16757_v21, 20.0 }
0x1517   :  { %13319 = vpow2.f32 %v10956_v61  ;;  %vm10939_vm13 = vcmp.gt.f32.partialorder %v16760_v11, 20.0 }
0x1518   :  { %13321 = vpow2.f32 %v10958_v47 }
0x1519   :  { %13323 = vpow2.f32 %v10960_v15 }
0x151a   :  { %13325 = vpow2.f32 %v10962_v18 }
0x151f   :  { %v13312_v24 = vpop.eup %13311 }
0x1520   :  { %v10964_v27 = vadd.f32 1.0, %v13312_v24  ;;  %v10967_v44 = vmul.f32 -0.5, %v13312_v24  ;;  %v10970_v50 = vand.u32 2147483647, %v13312_v24 }
0x1521   :  { %v13314_v5 = vpop.eup %13313 }
0x1522   :  { %v13316_v58 = vpop.eup %13315  ;;  %v10973_v23 = vadd.f32 1.0, %v13314_v5  ;;  %13327 = vlog2.f32 %v10964_v27  ;;  %v10976_v39 = vmul.f32 -0.5, %v13314_v5  ;;  %v10979_v3 = vand.u32 2147483647, %v13314_v5 }
0x1523   :  { %v13318_v45 = vpop.eup %13317  ;;  %v10982_v17 = vadd.f32 1.0, %v13316_v58  ;;  %v10985_v12 = vmul.f32 -0.5, %v13316_v58  ;;  %v10968_v42 = vadd.f32 1.0, %v10967_v44  ;;  %v10988_v22 = vand.u32 2147483647, %v13316_v58 }
0x1524   :  { %v16766_v59 = vpop.eup %13319  ;;  %13329 = vlog2.f32 %v10973_v23  ;;  %v10991_v53 = vadd.f32 1.0, %v13318_v45  ;;  %v10994_v43 = vmul.f32 -0.5, %v13318_v45  ;;  %v10977_v25 = vadd.f32 1.0, %v10976_v39 }
0x1525   :  { %13331 = vlog2.f32 %v10982_v17  ;;  %v16768_v62 = vpop.eup %13321  ;;  %v11000_v33 = vadd.f32 1.0, %v16766_v59  ;;  %v10986_v9 = vadd.f32 1.0, %v10985_v12  ;;  %v10997_v49 = vand.u32 2147483647, %v13318_v45 }
0x1526   :  { %v16770_v16 = vpop.eup %13323  ;;  %13333 = vlog2.f32 %v10991_v53  ;;  %v11009_v55 = vadd.f32 1.0, %v16768_v62  ;;  %v11003_v34 = vmul.f32 -0.5, %v16766_v59  ;;  %vm16783_vm2 = vcmp.lt.f32.partialorder %v10970_v50, 0.0004427343 }
0x1527   :  { %v16773_v1 = vpop.eup %13325  ;;  %13335 = vlog2.f32 %v11000_v33  ;;  %v11018_v28 = vadd.f32 1.0, %v16770_v16  ;;  %v10995_v63 = vadd.f32 1.0, %v10994_v43  ;;  %v10969_v41 = vmul.f32 %v13312_v24, %v10968_v42 }
0x1528   :  { %13337 = vlog2.f32 %v11009_v55  ;;  %v11027_v48 = vadd.f32 1.0, %v16773_v1  ;;  %v10978_v38 = vmul.f32 %v13314_v5, %v10977_v25  ;;  %vm16787_vm3 = vcmp.lt.f32.partialorder %v10979_v3, 0.0004427343 }
0x1529   :  { %13339 = vlog2.f32 %v11018_v28  ;;  %v11012_v6 = vmul.f32 -0.5, %v16768_v62  ;;  %v10987_v35 = vmul.f32 %v13316_v58, %v10986_v9  ;;  %vm16793_vm5 = vcmp.lt.f32.partialorder %v10988_v22, 0.0004427343 }
0x152a   :  { %13341 = vlog2.f32 %v11027_v48  ;;  %vm16797_vm6 = vcmp.lt.f32.partialorder %v10997_v49, 0.0004427343  ;;  %v11004_v32 = vadd.f32 1.0, %v11003_v34  ;;  %v11006_v2 = vand.u32 2147483647, %v16766_v59 }
0x152b   :  { %v11021_v13 = vmul.f32 -0.5, %v16770_v16  ;;  %v10996_v7 = vmul.f32 %v13318_v45, %v10995_v63  ;;  %v11015_v26 = vand.u32 2147483647, %v16768_v62  ;;  %v11013_v57 = vadd.f32 1.0, %v11012_v6 }
0x152c   :  { %v11030_v61 = vmul.f32 -0.5, %v16773_v1  ;;  %v11005_v27 = vmul.f32 %v16766_v59, %v11004_v32  ;;  %v11024_v53 = vand.u32 2147483647, %v16770_v16  ;;  %vm11007_vm8 = vcmp.lt.f32.partialorder %v11006_v2, 0.0004427343 }
0x152d   :  { %v11022_v58 = vadd.f32 1.0, %v11021_v13  ;;  %v11014_v44 = vmul.f32 %v16768_v62, %v11013_v57  ;;  %v11033_v50 = vand.u32 2147483647, %v16773_v1  ;;  %vm11016_vm9 = vcmp.lt.f32.partialorder %v11015_v26, 0.0004427343 }
0x152e   :  { %v11031_v39 = vadd.f32 1.0, %v11030_v61  ;;  %vm11025_vm11 = vcmp.lt.f32.partialorder %v11024_v53, 0.0004427343 }
0x152f   :  { %v13328_v0 = vpop.eup %13327  ;;  %v11023_v43 = vmul.f32 %v16770_v16, %v11022_v58  ;;  %vm11034_vm12 = vcmp.lt.f32.partialorder %v11033_v50, 0.0004427343 }
0x1530   :  { %v10966_v20 = vmul.f32 0.6931472, %v13328_v0  ;;  %v11032_v22 = vmul.f32 %v16773_v1, %v11031_v39 }
0x1531   :  { %v13330_v56 = vpop.eup %13329 }
0x1532   :  { %v13332_v31 = vpop.eup %13331  ;;  %v10975_v51 = vmul.f32 0.6931472, %v13330_v56  ;;  %v10972_v37 = vsel %vm16783_vm2, %v10969_v41, %v10966_v20 }
0x1533   :  { %v10984_v40 = vmul.f32 0.6931472, %v13332_v31  ;;  %v13334_v46 = vpop.eup %13333  ;;  %v11036_v47 = vsel %vm10932_vm14, %v16742_v54, %v10972_v37  ;;  %vm11060_vm14 = vcmask 484352  }
0x1534   :  { %v10981_v8 = vsel %vm16787_vm3, %v10978_v38, %v10975_v51  ;;  %v10993_v18 = vmul.f32 0.6931472, %v13334_v46  ;;  %13343 = vtanh.f32 %v11036_v47  ;;  %v13336_v5 = vpop.eup %13335 }
0x1535   :  { %v10990_v15 = vsel %vm16793_vm5, %v10987_v35, %v10984_v40  ;;  %v11037_v24 = vsel %vm10933_vm15, %v16744_v30, %v10981_v8  ;;  %v11002_v17 = vmul.f32 0.6931472, %v13336_v5  ;;  %v13338_v33 = vpop.eup %13337 }
0x1536   :  { %v11038_v23 = vsel %vm10934_vm0, %v16746_v10, %v10990_v15  ;;  %13345 = vtanh.f32 %v11037_v24  ;;  %v10999_v45 = vsel %vm16797_vm6, %v10996_v7, %v10993_v18  ;;  %v13340_v12 = vpop.eup %13339  ;;  %v11011_v28 = vmul.f32 0.6931472, %v13338_v33 }
0x1537   :  { %13347 = vtanh.f32 %v11038_v23  ;;  %v11039_v59 = vsel %vm10935_vm1, %v16748_v19, %v10999_v45  ;;  %v11008_v55 = vsel %vm11007_vm8, %v11005_v27, %v11002_v17  ;;  %v11020_v3 = vmul.f32 0.6931472, %v13340_v12  ;;  %v13342_v62 = vpop.eup %13341 }
0x1538   :  { %13349 = vtanh.f32 %v11039_v59  ;;  %v11040_v42 = vsel %vm10936_vm4, %v16753_v4, %v11008_v55  ;;  %v11017_v25 = vsel %vm11016_vm9, %v11014_v44, %v11011_v28  ;;  %v11029_v9 = vmul.f32 0.6931472, %v13342_v62 }
0x1539   :  { %13351 = vtanh.f32 %v11040_v42  ;;  %v11026_v48 = vsel %vm11025_vm11, %v11023_v43, %v11020_v3  ;;  %v11041_v49 = vsel %vm10937_vm7, %v16755_v29, %v11017_v25 }
0x153a   :  { %v11042_v16 = vsel %vm10938_vm10, %v16757_v21, %v11026_v48  ;;  %13353 = vtanh.f32 %v11041_v49  ;;  %v11035_v34 = vsel %vm11034_vm12, %v11032_v22, %v11029_v9 }
0x153b   :  { %13355 = vtanh.f32 %v11042_v16  ;;  %v11043_v36 = vsel %vm10939_vm13, %v16760_v11, %v11035_v34 }
0x153c   :  { %13357 = vtanh.f32 %v11043_v36 }
0x1541   :  { %v13344_v63 = vpop.eup %13343 }
0x1542   :  { %v11052_v1 = vmul.f32 %v13344_v63, %v16742_v54 }
0x1543   :  { %v13346_v0 = vpop.eup %13345 }
0x1544   :  { %v13348_v41 = vpop.eup %13347  ;;  %v11053_v38 = vmul.f32 %v13346_v0, %v16744_v30  ;;  %11061 = vst.msk [vmem:[#allocation2] sm:$0x3] %vm11060_vm14, %v11052_v1 }
0x1545   :  { %v11054_v52 = vmul.f32 %v13348_v41, %v16746_v10  ;;  %v13350_v6 = vpop.eup %13349 }
0x1546   :  { %11062 = vst.msk [vmem:[#allocation2 + $0x2] sm:$0x3] %vm11060_vm14, %v11053_v38  ;;  %v11055_v56 = vmul.f32 %v13350_v6, %v16748_v19  ;;  %v13352_v20 = vpop.eup %13351 }
0x1547   :  { %11063 = vst.msk [vmem:[#allocation2 + $0x4] sm:$0x3] %vm11060_vm14, %v11054_v52  ;;  %v11056_v35 = vmul.f32 %v13352_v20, %v16753_v4  ;;  %v13354_v54 = vpop.eup %13353 }
0x1548   :  { %11064 = vst.msk [vmem:[#allocation2 + $0x6] sm:$0x3] %vm11060_vm14, %v11055_v56  ;;  %v13356_v14 = vpop.eup %13355  ;;  %v11057_v30 = vmul.f32 %v13354_v54, %v16755_v29 }
0x1549   :  { %11065 = vst.msk [vmem:[#allocation2 + $0x8] sm:$0x3] %vm11060_vm14, %v11056_v35  ;;  %v11058_v10 = vmul.f32 %v13356_v14, %v16757_v21  ;;  %v13358_v60 = vpop.eup %13357 }
0x154a   :  { %11066 = vst.msk [vmem:[#allocation2 + $0xa] sm:$0x3] %vm11060_vm14, %v11057_v30  ;;  %v11059_v19 = vmul.f32 %v13358_v60, %v16760_v11 }
0x154b   :  { %11067 = vst.msk [vmem:[#allocation2 + $0xc] sm:$0x3] %vm11060_vm14, %v11058_v10 }
0x154c   :  { %11068 = vst.msk [vmem:[#allocation2 + $0xe] sm:$0x3] %vm11060_vm14, %v11059_v19 }
0x154d   :  { %13380 = shalt.err (!%p13377_p4)
}
0x154e   :  { %s13419_s30 = smov 32  }
0x154f   :  { %11080 = dma.vmem_to_hbm [thread:$0]  %s11075_s13, 256, %s16876_s14, [#allocation3], %s13419_s30, %s13419_s30, %s13399_s21  }
0x1550   :  { %13389 = dma.done.wait [#allocation3], 256  }
0x1551   :  { %13390 = vsyncadd [#allocation3], 4294967040 }
0x1552   :  { %11084 = vsyncpa [#allocation3], 1 }

</bundles_post_ra>
